<compile_context>
chip_gen: v7x
topology: tpu7x:2x2x1
jax: 0.10.0
libtpu: 0.0.40
codegen_flags: <defaults>
</compile_context>

<pallas_src>
import numpy as np
import jax
import jax.numpy as jnp
from jax.experimental import pallas as pl
from jax.experimental.pallas import tpu as pltpu

# ----- EncoderModel config (small test sizes consistent with the module) ----------
DIM = 3                      # _dimension
NUM_STRIDES = 2              # num_stride
M = 4                        # feat_per_pixel; 'constant' -> nPlanes = [4, 4]
C_IN = 1                     # input_feat_enc
LEAKINESS = 0.0              # leakiness_enc -> LeakyReLU == ReLU
SPATIAL = 16                 # inp_spatial_size
OUT_SPATIAL = SPATIAL // 4 ** (NUM_STRIDES - 1)      # = 4
USE_LINEAR_OUTPUT = True
NUM_OUTPUT_FEATS = 32
LIN_IN = M * OUT_SPATIAL ** DIM                      # = 256

S2 = SPATIAL * SPATIAL               # 256  lanes of the (x, y*16+z) voxel slab
C1COLS = M * S2                      # 1024 stage-1 output columns, order (m, y, z)
KCAT = 3 * S2                        # 768  concatenated x-tap lanes (kd, y, z)
PCOLS = SPATIAL * NUM_OUTPUT_FEATS   # 512  lane-dense folded stage-2/3 columns (x, n)

TB = 8                               # batch elements per grid step
TBR = TB * SPATIAL                   # 128  LHS rows per MXU matmul


# ================================ Pallas kernel ====================================
def _fused_encoder_kernel(xcat_ref, mask_ref, a3_ref, wb_ref, bd_ref, b3_ref,
                          out_ref):
    """TB batch elements end-to-end, everything VMEM-resident.

    xcat: (128, 768)  bf16  three x-shifted voxel slabs concat'd along lanes
    mask: (128, 256)  f32   active-site mask, rows = (b, x), lanes = y*16+z
    a3:   (768, 1024) bf16  3x3x3 subm-conv, (x,y,z) taps absorbed (banded)
    wb:   (1024, 512) bf16  ReLU->Conv(2,2)->AvgPool(2,2)->Linear folded; cols=(x,n)
    bd:   (16, 512)   f32   0/1 block-diagonal selector (row x keeps lane block x)
    b3:   (1, 32)     f32   linear bias
    out:  (8, 32)     f32
    """
    # --- SubmanifoldConvolution 3x3x3: ONE (128,768)x(768,1024) bf16 MXU matmul ----
    x1 = jnp.dot(xcat_ref[...], a3_ref[...],
                 preferred_element_type=jnp.float32)              # (128, 1024) f32
    # --- active-site mask (lane-tiled in-kernel over the M channel blocks) +
    #     BatchNorm(identity) + LeakyReLU(leak=0) == masked ReLU (all f32 VPU) ------
    mask4 = jnp.concatenate([mask_ref[...]] * M, axis=1)          # (128, 1024) f32
    r = jnp.maximum(x1 * mask4, 0.0).astype(jnp.bfloat16)         # bf16 only for MXU
    # --- Conv(k=2,s=2) + AvgPool(2,2) + Linear, folded into one lane-dense matmul --
    p = jnp.dot(r, wb_ref[...], preferred_element_type=jnp.float32)   # (128, 512)
    # --- block-diagonal select (constant mask, no per-step iota/idiv) + x-sum ------
    q = p.reshape(TB, SPATIAL, PCOLS) * bd_ref[...]               # (8, 16, 512)
    s = jnp.sum(q, axis=1)                                        # (8, 512)
    # --- fold the 16 lane blocks of 32 with an XLU roll-tree (no fold matmul) ------
    s = s + pltpu.roll(s, 256, axis=1)
    s = s + pltpu.roll(s, 128, axis=1)
    s = s + pltpu.roll(s, 64, axis=1)
    s = s + pltpu.roll(s, 32, axis=1)
    out_ref[...] = s[:, :NUM_OUTPUT_FEATS] + b3_ref[...]


# ================================ Pallas wrapper ===================================
def fused_encoder(xcat, mask2, a3, wb, bd, b3_2d, b_pad):
    num_tiles = b_pad // TB
    # Tiny batch (single grid step): run single-core so v7x does not DMA a second
    # copy of the resident constants for negligible work; parallel once B grows.
    semantics = ("arbitrary",) if num_tiles == 1 else ("parallel",)
    out = pl.pallas_call(
        _fused_encoder_kernel,
        out_shape=jax.ShapeDtypeStruct((b_pad, NUM_OUTPUT_FEATS), jnp.float32),
        grid=(num_tiles,),
        in_specs=[
            pl.BlockSpec((TBR, KCAT), lambda t: (t, 0)),
            pl.BlockSpec((TBR, S2), lambda t: (t, 0)),
            pl.BlockSpec((KCAT, C1COLS), lambda t: (0, 0)),           # resident
            pl.BlockSpec((C1COLS, PCOLS), lambda t: (0, 0)),          # resident
            pl.BlockSpec((SPATIAL, PCOLS), lambda t: (0, 0)),         # resident
            pl.BlockSpec((1, NUM_OUTPUT_FEATS), lambda t: (0, 0)),    # resident
        ],
        out_specs=pl.BlockSpec((TB, NUM_OUTPUT_FEATS), lambda t: (t, 0)),
        compiler_params=pltpu.CompilerParams(
            dimension_semantics=semantics,
            vmem_limit_bytes=32 * 1024 * 1024),
    )(xcat, mask2, a3, wb, bd, b3_2d)
    return out


# ================================== JAX glue =======================================
def voxelize(point_cloud, batch_size):
    # InputLayer(dim, spatial_size, mode=3): sum features of duplicate coordinates.
    coords = point_cloud[:, 0:DIM + 1].astype(jnp.float32)
    feats = point_cloud[:, DIM + 1:].astype(jnp.float32)
    xi = coords[:, 0].astype(jnp.int32)
    yi = coords[:, 1].astype(jnp.int32)
    zi = coords[:, 2].astype(jnp.int32)
    bi = coords[:, 3].astype(jnp.int32)
    dense = jnp.zeros((batch_size, C_IN, SPATIAL, SPATIAL, SPATIAL), jnp.float32)
    dense = dense.at[bi, :, xi, yi, zi].add(feats)
    count = jnp.zeros((batch_size, SPATIAL, SPATIAL, SPATIAL), jnp.float32)
    count = count.at[bi, xi, yi, zi].add(1.0)
    mask = (count > 0).astype(jnp.float32).reshape(
        batch_size, 1, SPATIAL, SPATIAL, SPATIAL)
    return dense, mask


def init_params(key):
    k1, k2, k3, k4 = jax.random.split(key, 4)
    w1 = jax.random.normal(k1, (M, C_IN, 3, 3, 3), jnp.float32) * 0.2    # subm conv
    w2 = jax.random.normal(k2, (M, M, 2, 2, 2), jnp.float32) * 0.2       # strided conv
    w3 = jax.random.normal(k3, (NUM_OUTPUT_FEATS, LIN_IN), jnp.float32) * 0.05
    b3 = jax.random.normal(k4, (NUM_OUTPUT_FEATS,), jnp.float32) * 0.1
    return w1, w2, w3, b3


def make_fused_params(params):
    """Hoisted (init-time) weight folding — no per-forward XLA weight math."""
    w1, w2, w3, b3 = (np.asarray(p, dtype=np.float32) for p in params)
    S = SPATIAL
    # 0/1 tap-shift selectors: sel[k, p_in, p_out] = 1 iff p_in == p_out + k - 1
    sel = np.zeros((3, S, S), np.float32)
    for k in range(3):
        for p_out in range(S):
            p_in = p_out + k - 1
            if 0 <= p_in < S:
                sel[k, p_in, p_out] = 1.0
    # a3[kd*256 + y'*16+z', m*256+y*16+z] = w1[m,0,kd, y'-y+1, z'-z+1] (0 off-grid)
    a3 = np.einsum('mkhw,hab,wcd->kacmbd', w1[:, 0], sel, sel)
    a3 = np.ascontiguousarray(a3.reshape(3 * S * S, M * S * S))
    # W23[x, m*256+y*16+z, n] = (1/8) * sum_c2 w3[n, c2*64 + (x//4)*16 + (y//4)*4 + z//4]
    #                                          * w2[c2, m, x%2, y%2, z%2]
    w3r = w3.reshape(NUM_OUTPUT_FEATS, M, OUT_SPATIAL, OUT_SPATIAL, OUT_SPATIAL)
    g_idx = np.arange(S) // 4
    h_idx = np.arange(S) % 2
    G = w3r[:, :, g_idx[:, None, None], g_idx[None, :, None], g_idx[None, None, :]]
    H = w2[:, :, h_idx[:, None, None], h_idx[None, :, None], h_idx[None, None, :]]
    w23 = np.einsum('ncxyz,cmxyz->xmyzn', G, H) / 8.0        # (16, 4, 16, 16, 32)
    # lane-dense layout: wb[m*256+y*16+z, x*32+n] = W23[x, (m,y,z), n]
    wb = np.ascontiguousarray(
        np.transpose(w23, (1, 2, 3, 0, 4)).reshape(M * S * S, S * NUM_OUTPUT_FEATS))
    # constant block-diagonal selector (16, 512): row x keeps lane block x
    bd = (np.arange(PCOLS)[None, :] // NUM_OUTPUT_FEATS
          == np.arange(S)[:, None]).astype(np.float32)
    b3_2d = b3.reshape(1, NUM_OUTPUT_FEATS)
    return (jnp.asarray(a3, dtype=jnp.bfloat16),      # bf16 resident constants
            jnp.asarray(wb, dtype=jnp.bfloat16),
            jnp.asarray(bd, dtype=jnp.float32),
            jnp.asarray(b3_2d, dtype=jnp.float32))


def encoder_forward(point_cloud, fused_params, batch_size):
    a3, wb, bd, b3_2d = fused_params
    dense, mask = voxelize(point_cloud, batch_size)
    b_pad = ((batch_size + TB - 1) // TB) * TB                 # pad batch to TB tile
    x2d = dense.reshape(batch_size, SPATIAL, S2)               # (B, 16, 256) rows=x
    xpad = jnp.pad(x2d, ((0, b_pad - batch_size), (1, 1), (0, 0)))
    # three x-shifted slabs concatenated along lanes -> single K=768 stage-1 matmul
    xcat = jnp.concatenate([xpad[:, kd:kd + SPATIAL, :] for kd in range(3)], axis=-1)
    xcat = xcat.reshape(b_pad * SPATIAL, KCAT).astype(jnp.bfloat16)
    m2 = jnp.pad(mask.reshape(batch_size, SPATIAL, S2),
                 ((0, b_pad - batch_size), (0, 0), (0, 0)))
    m2 = m2.reshape(b_pad * SPATIAL, S2)                       # f32, tiled in-kernel
    # TODO(synk): only the use_linear_output=True configuration is wired (the linear
    # head is folded into the fused weight matrix).
    out = fused_encoder(xcat, m2, a3, wb, bd, b3_2d, b_pad)
    return out[:batch_size]


encoder_forward_jit = jax.jit(encoder_forward, static_argnums=2)


# =========================== dense JAX reference (check) ==========================
def reference_forward(point_cloud, params, batch_size):
    w1, w2, w3, b3 = params
    dense, mask = voxelize(point_cloud, batch_size)
    dn = jax.lax.conv_general_dilated(
        dense, w1, window_strides=(1, 1, 1), padding=((1, 1), (1, 1), (1, 1)),
        dimension_numbers=('NCDHW', 'OIDHW', 'NCDHW'),
        precision=jax.lax.Precision.HIGHEST)
    x1 = jnp.maximum(dn * mask, 0.0)
    x2 = jax.lax.conv_general_dilated(
        x1, w2, window_strides=(2, 2, 2), padding='VALID',
        dimension_numbers=('NCDHW', 'OIDHW', 'NCDHW'),
        precision=jax.lax.Precision.HIGHEST)
    x3 = jax.lax.reduce_window(x2, 0.0, jax.lax.add,
                               (1, 1, 2, 2, 2), (1, 1, 2, 2, 2), 'VALID') / 8.0
    xf = x3.reshape(batch_size, -1)
    return jnp.dot(xf, w3.T, precision=jax.lax.Precision.HIGHEST) + b3


# ===================================== main =======================================
if __name__ == "__main__":
    key = jax.random.PRNGKey(0)
    kp, kc, kf = jax.random.split(key, 3)
    params = init_params(kp)
    fused_params = make_fused_params(params)

    N, B = 64, 2
    coords = jax.random.randint(kc, (N, DIM), 0, SPATIAL).astype(jnp.float32)
    batch_idx = jnp.concatenate(
        [jnp.zeros((N // 2, 1)), jnp.ones((N // 2, 1))], axis=0).astype(jnp.float32)
    feats = jax.random.normal(kf, (N, C_IN), jnp.float32)
    point_cloud = jnp.concatenate([coords, batch_idx, feats], axis=1)   # (64, 5)

    y = jax.block_until_ready(encoder_forward_jit(point_cloud, fused_params, B))
    y_ref = jax.block_until_ready(reference_forward(point_cloud, params, B))
    np.testing.assert_allclose(np.asarray(y), np.asarray(y_ref),
                               rtol=2e-2, atol=1e-3)
    assert y.shape == (B, NUM_OUTPUT_FEATS) and y.dtype == jnp.float32
    print("KERNEL_OK")
</pallas_src>

<mosaic_0001>
module attributes {stable_mosaic.version = 11 : i64} {
  func.func private @main(%arg0: i32) attributes {dimension_semantics = [#tpu.dimension_semantics<core_parallel>], iteration_bounds = array<i64: 2>, tpu.core_type = #tpu.core_type<sc_scalar_subcore>, window_params = []} {
    return
  }
}

module attributes {stable_mosaic.version = 11 : i64} {
  func.func private @main(%arg0: i32) attributes {dimension_semantics = [#tpu.dimension_semantics<core_parallel>], iteration_bounds = array<i64: 2>, tpu.core_type = #tpu.core_type<sc_scalar_subcore>, window_params = []} {
    return
  }
}

module attributes {stable_mosaic.version = 11 : i64} {
  func.func @_fused_encoder_kernel(%arg0: i32, %arg1: memref<128x768xbf16, #tpu.memory_space<vmem>>, %arg2: memref<128x256xf32, #tpu.memory_space<vmem>>, %arg3: memref<768x1024xbf16, #tpu.memory_space<vmem>>, %arg4: memref<1024x512xbf16, #tpu.memory_space<vmem>>, %arg5: memref<16x512xf32, #tpu.memory_space<vmem>>, %arg6: memref<1x32xf32, #tpu.memory_space<vmem>>, %arg7: memref<8x32xf32, #tpu.memory_space<vmem>>) attributes {dimension_semantics = [#tpu.dimension_semantics<arbitrary>], iteration_bounds = array<i64: 1>, scalar_prefetch = 0 : i64, scratch_operands = 0 : i64, tpu.core_type = #tpu.core_type<tc>, window_params = [{transform_indices = @transform_0, window_bounds = array<i64: 128, 768>}, {transform_indices = @transform_1, window_bounds = array<i64: 128, 256>}, {pipeline_mode = #tpu.pipeline_mode<synchronous>, transform_indices = @transform_2, window_bounds = array<i64: 768, 1024>}, {pipeline_mode = #tpu.pipeline_mode<synchronous>, transform_indices = @transform_3, window_bounds = array<i64: 1024, 512>}, {pipeline_mode = #tpu.pipeline_mode<synchronous>, transform_indices = @transform_4, window_bounds = array<i64: 16, 512>}, {pipeline_mode = #tpu.pipeline_mode<synchronous>, transform_indices = @transform_5, window_bounds = array<i64: 1, 32>}, {transform_indices = @transform_6, window_bounds = array<i64: 8, 32>}]} {
    %c0 = arith.constant 0 : index
    %c0_0 = arith.constant 0 : index
    %0 = vector.load %arg1[%c0, %c0_0] : memref<128x768xbf16, #tpu.memory_space<vmem>>, vector<128x768xbf16>
    %c0_1 = arith.constant 0 : index
    %c0_2 = arith.constant 0 : index
    %1 = vector.load %arg3[%c0_1, %c0_2] : memref<768x1024xbf16, #tpu.memory_space<vmem>>, vector<768x1024xbf16>
    %cst = arith.constant dense<0.000000e+00> : vector<128x1024xf32>
    %2 = tpu.matmul %0, %1, %cst {dimension_numbers = #tpu.dot_dimension_numbers<[1], [0], [0], [1], [0, 0, 1, 1], [], []>} : vector<128x768xbf16>, vector<768x1024xbf16>, vector<128x1024xf32> -> vector<128x1024xf32>
    %c0_3 = arith.constant 0 : index
    %c0_4 = arith.constant 0 : index
    %3 = vector.load %arg2[%c0_3, %c0_4] : memref<128x256xf32, #tpu.memory_space<vmem>>, vector<128x256xf32>
    %4 = tpu.concatenate %3, %3, %3, %3 in 1 : vector<128x256xf32>, vector<128x256xf32>, vector<128x256xf32>, vector<128x256xf32> -> vector<128x1024xf32>
    %5 = arith.mulf %2, %4 : vector<128x1024xf32>
    %cst_5 = arith.constant 0.000000e+00 : f32
    %6 = vector.broadcast %cst_5 : f32 to vector<128x1024xf32>
    %7 = arith.maximumf %5, %6 : vector<128x1024xf32>
    %8 = arith.truncf %7 : vector<128x1024xf32> to vector<128x1024xbf16>
    %c0_6 = arith.constant 0 : index
    %c0_7 = arith.constant 0 : index
    %9 = vector.load %arg4[%c0_6, %c0_7] : memref<1024x512xbf16, #tpu.memory_space<vmem>>, vector<1024x512xbf16>
    %cst_8 = arith.constant dense<0.000000e+00> : vector<128x512xf32>
    %10 = tpu.matmul %8, %9, %cst_8 {dimension_numbers = #tpu.dot_dimension_numbers<[1], [0], [0], [1], [0, 0, 1, 1], [], []>} : vector<128x1024xbf16>, vector<1024x512xbf16>, vector<128x512xf32> -> vector<128x512xf32>
    %11 = vector.shape_cast %10 : vector<128x512xf32> to vector<8x16x512xf32>
    %c0_9 = arith.constant 0 : index
    %c0_10 = arith.constant 0 : index
    %12 = vector.load %arg5[%c0_9, %c0_10] : memref<16x512xf32, #tpu.memory_space<vmem>>, vector<16x512xf32>
    %13 = vector.shape_cast %12 : vector<16x512xf32> to vector<1x16x512xf32>
    %14 = vector.broadcast %13 : vector<1x16x512xf32> to vector<8x16x512xf32>
    %15 = arith.mulf %11, %14 : vector<8x16x512xf32>
    %cst_11 = arith.constant dense<0.000000e+00> : vector<8x512xf32>
    %16 = vector.multi_reduction <add>, %15, %cst_11 [1] : vector<8x16x512xf32> to vector<8x512xf32>
    %c256_i32 = arith.constant 256 : i32
    %17 = tpu.dynamic_rotate %16 by %c256_i32 dim 1 : vector<8x512xf32>, i32 -> vector<8x512xf32>
    %18 = arith.addf %16, %17 : vector<8x512xf32>
    %c128_i32 = arith.constant 128 : i32
    %19 = tpu.dynamic_rotate %18 by %c128_i32 dim 1 : vector<8x512xf32>, i32 -> vector<8x512xf32>
    %20 = arith.addf %18, %19 : vector<8x512xf32>
    %c64_i32 = arith.constant 64 : i32
    %21 = tpu.dynamic_rotate %20 by %c64_i32 dim 1 : vector<8x512xf32>, i32 -> vector<8x512xf32>
    %22 = arith.addf %20, %21 : vector<8x512xf32>
    %c32_i32 = arith.constant 32 : i32
    %23 = tpu.dynamic_rotate %22 by %c32_i32 dim 1 : vector<8x512xf32>, i32 -> vector<8x512xf32>
    %24 = arith.addf %22, %23 : vector<8x512xf32>
    %25 = vector.extract_strided_slice %24 {offsets = [0, 0], sizes = [8, 32], strides = [1, 1]} : vector<8x512xf32> to vector<8x32xf32>
    %c0_12 = arith.constant 0 : index
    %c0_13 = arith.constant 0 : index
    %26 = vector.load %arg6[%c0_12, %c0_13] : memref<1x32xf32, #tpu.memory_space<vmem>>, vector<1x32xf32>
    %27 = vector.broadcast %26 : vector<1x32xf32> to vector<8x32xf32>
    %28 = arith.addf %25, %27 : vector<8x32xf32>
    %c0_14 = arith.constant 0 : index
    %c0_15 = arith.constant 0 : index
    %29 = vector.load %arg7[%c0_14, %c0_15] : memref<8x32xf32, #tpu.memory_space<vmem>>, vector<8x32xf32>
    tpu.vector_store %arg7[%c0_14, %c0_15], %28 {strides = array<i32>} : memref<8x32xf32, #tpu.memory_space<vmem>>, vector<8x32xf32>,
    return
  }
  func.func @transform_0(%arg0: i32) -> (i32, i32) {
    %c0_i32 = arith.constant 0 : i32
    %c0_i32_0 = arith.constant 0 : i32
    return %arg0, %c0_i32 : i32, i32
  }
  func.func @transform_1(%arg0: i32) -> (i32, i32) {
    %c0_i32 = arith.constant 0 : i32
    %c0_i32_0 = arith.constant 0 : i32
    return %arg0, %c0_i32 : i32, i32
  }
  func.func @transform_2(%arg0: i32) -> (i32, i32) {
    %c0_i32 = arith.constant 0 : i32
    %c0_i32_0 = arith.constant 0 : i32
    %c0_i32_1 = arith.constant 0 : i32
    return %c0_i32, %c0_i32_0 : i32, i32
  }
  func.func @transform_3(%arg0: i32) -> (i32, i32) {
    %c0_i32 = arith.constant 0 : i32
    %c0_i32_0 = arith.constant 0 : i32
    %c0_i32_1 = arith.constant 0 : i32
    return %c0_i32, %c0_i32_0 : i32, i32
  }
  func.func @transform_4(%arg0: i32) -> (i32, i32) {
    %c0_i32 = arith.constant 0 : i32
    %c0_i32_0 = arith.constant 0 : i32
    %c0_i32_1 = arith.constant 0 : i32
    return %c0_i32, %c0_i32_0 : i32, i32
  }
  func.func @transform_5(%arg0: i32) -> (i32, i32) {
    %c0_i32 = arith.constant 0 : i32
    %c0_i32_0 = arith.constant 0 : i32
    %c0_i32_1 = arith.constant 0 : i32
    return %c0_i32, %c0_i32_0 : i32, i32
  }
  func.func @transform_6(%arg0: i32) -> (i32, i32) {
    %c0_i32 = arith.constant 0 : i32
    %c0_i32_0 = arith.constant 0 : i32
    return %arg0, %c0_i32 : i32, i32
  }
}

</mosaic_0001>

<bundles_post_ra>
// kernel: encoder_forward.1
= control target key start
LH: loop header
LB: loop body
LE: loop exit
PB: predicated region body
PF: predicated region fallthrough
CT: control target
= control target key end

     0   :  { %vm7091_vm0 = vcmask 1041409   ;;  %vm7093_vm1 = vcmask 1042434   ;;  %vm7095_vm2 = vcmask 1043459   ;;  %vm7097_vm3 = vcmask 1044484   ;;  %s9277_s28 = smov 32   ;;  %s12396_s2 = inlined_call_operand.vmem [shape: bf16[768,1024], index: 2, kind: input, shape index: {}]   ;;  %s12397_s0 = inlined_call_operand.vmem [shape: bf16[128,768], index: 0, kind: input, shape index: {}]   ;;  %s12398_s3 = inlined_call_operand.vmem [shape: bf16[1024,512], index: 3, kind: input, shape index: {}]   ;;  %s12399_s1 = inlined_call_operand.vmem [shape: f32[128,256], index: 1, kind: input, shape index: {}]   ;;  %s12400_s4 = inlined_call_operand.vmem [shape: f32[16,512], index: 4, kind: input, shape index: {}]   ;;  %s12401_s5 = inlined_call_operand.vmem [shape: f32[1,32], index: 5, kind: input, shape index: {}]   ;;  %s12402_s6 = inlined_call_operand.vmem [shape: f32[8,32], index: 6, kind: output, shape index: {}]  }
   0x1   :  { %v71_v0 = vld [vmem:[%s12396_s2] sm:$0xff]  ;;  %v72_v2 = vld [vmem:[%s12396_s2 + $0x8] sm:$0xff]  ;;  %vm7099_vm4 = vcmask 1045509   ;;  %vm7101_vm5 = vcmask 1046534   ;;  %vm7103_vm6 = vcmask 1047559   ;;  %vm7595_vm9 = vcmask 261120  }
   0x2   :  { %v75_v1 = vld [vmem:[%s12396_s2 + $0x20] sm:$0xff]  ;;  %v76_v4 = vld [vmem:[%s12396_s2 + $0x28] sm:$0xff] }
   0x3   :  { %v7650_v3 = vcombine.high %v71_v0, %v75_v1  ;;  %v7649_v5 = vcombine.low %v71_v0, %v75_v1  ;;  %v79_v6 = vld [vmem:[%s12396_s2 + $0x40] sm:$0xff]  ;;  %v7652_v8 = vcombine.high %v72_v2, %v76_v4  ;;  %v7651_v9 = vcombine.low %v72_v2, %v76_v4  ;;  %v80_v11 = vld [vmem:[%s12396_s2 + $0x48] sm:$0xff] }
   0x4   :  { %v83_v7 = vld [vmem:[%s12396_s2 + $0x60] sm:$0xff]  ;;  %v84_v12 = vld [vmem:[%s12396_s2 + $0x68] sm:$0xff] }
   0x5   :  { %v7658_v10 = vcombine.high %v79_v6, %v83_v7  ;;  %v87_v13 = vld [vmem:[%s12396_s2 + $0x80] sm:$0xff]  ;;  %2615 = vmatprep.subr.bf16.mxu0 %v7650_v3  ;;  %v7660_v14 = vcombine.high %v80_v11, %v84_v12  ;;  %v88_v16 = vld [vmem:[%s12396_s2 + $0x88] sm:$0xff]  ;;  %2954 = vmatprep.subr.bf16.mxu1 %v7652_v8  ;;  %v7657_v18 = vcombine.low %v79_v6, %v83_v7 }
   0x6   :  { %v91_v15 = vld [vmem:[%s12396_s2 + $0xa0] sm:$0xff]  ;;  %v92_v17 = vld [vmem:[%s12396_s2 + $0xa8] sm:$0xff]  ;;  %2616 = vmatpush1.bf16.msra.mxu0 %v7649_v5  ;;  %2955 = vmatpush1.bf16.msra.mxu1 %v7651_v9  ;;  %v7659_v19 = vcombine.low %v80_v11, %v84_v12 }
   0x7   :  { %2617 = vmatprep.subr.bf16.mxu0 %v7658_v10  ;;  %v7666_v20 = vcombine.high %v87_v13, %v91_v15  ;;  %2956 = vmatprep.subr.bf16.mxu1 %v7660_v14  ;;  %v7668_v21 = vcombine.high %v88_v16, %v92_v17  ;;  %v95_v22 = vld [vmem:[%s12396_s2 + $0xc0] sm:$0xff]  ;;  %v96_v24 = vld [vmem:[%s12396_s2 + $0xc8] sm:$0xff]  ;;  %v7665_v26 = vcombine.low %v87_v13, %v91_v15 }
   0x8   :  { %v99_v23 = vld [vmem:[%s12396_s2 + $0xe0] sm:$0xff]  ;;  %v100_v25 = vld [vmem:[%s12396_s2 + $0xe8] sm:$0xff]  ;;  %v7667_v27 = vcombine.low %v88_v16, %v92_v17 }
   0x9   :  { %v7674_v28 = vcombine.high %v95_v22, %v99_v23  ;;  %v7676_v29 = vcombine.high %v96_v24, %v100_v25  ;;  %v103_v30 = vld [vmem:[%s12396_s2 + $0x100] sm:$0xff]  ;;  %v104_v32 = vld [vmem:[%s12396_s2 + $0x108] sm:$0xff]  ;;  %v7673_v34 = vcombine.low %v95_v22, %v99_v23  ;;  %v7675_v35 = vcombine.low %v96_v24, %v100_v25 }
   0xa   :  { %2618 = vmatpush1.bf16.msra.mxu0 %v7657_v18  ;;  %2957 = vmatpush1.bf16.msra.mxu1 %v7659_v19  ;;  %v107_v31 = vld [vmem:[%s12396_s2 + $0x120] sm:$0xff]  ;;  %v108_v33 = vld [vmem:[%s12396_s2 + $0x128] sm:$0xff] }
   0xb   :  { %2619 = vmatprep.subr.bf16.mxu0 %v7666_v20  ;;  %2958 = vmatprep.subr.bf16.mxu1 %v7668_v21  ;;  %v7682_v36 = vcombine.high %v103_v30, %v107_v31  ;;  %v7684_v37 = vcombine.high %v104_v32, %v108_v33  ;;  %v111_v38 = vld [vmem:[%s12396_s2 + $0x140] sm:$0xff]  ;;  %v112_v40 = vld [vmem:[%s12396_s2 + $0x148] sm:$0xff]  ;;  %v7681_v42 = vcombine.low %v103_v30, %v107_v31 }
   0xc   :  { %v115_v39 = vld [vmem:[%s12396_s2 + $0x160] sm:$0xff]  ;;  %v116_v41 = vld [vmem:[%s12396_s2 + $0x168] sm:$0xff]  ;;  %v7683_v43 = vcombine.low %v104_v32, %v108_v33 }
   0xd   :  { %v7690_v44 = vcombine.high %v111_v38, %v115_v39  ;;  %v7692_v45 = vcombine.high %v112_v40, %v116_v41  ;;  %v119_v46 = vld [vmem:[%s12396_s2 + $0x180] sm:$0xff]  ;;  %v120_v48 = vld [vmem:[%s12396_s2 + $0x188] sm:$0xff]  ;;  %v7689_v50 = vcombine.low %v111_v38, %v115_v39  ;;  %v7691_v51 = vcombine.low %v112_v40, %v116_v41 }
   0xe   :  { %2620 = vmatpush1.bf16.msra.mxu0 %v7665_v26  ;;  %2959 = vmatpush1.bf16.msra.mxu1 %v7667_v27  ;;  %v123_v47 = vld [vmem:[%s12396_s2 + $0x1a0] sm:$0xff]  ;;  %v124_v49 = vld [vmem:[%s12396_s2 + $0x1a8] sm:$0xff] }
   0xf   :  { %2621 = vmatprep.subr.bf16.mxu0 %v7674_v28  ;;  %2960 = vmatprep.subr.bf16.mxu1 %v7676_v29  ;;  %v7698_v52 = vcombine.high %v119_v46, %v123_v47  ;;  %v7700_v53 = vcombine.high %v120_v48, %v124_v49  ;;  %v127_v54 = vld [vmem:[%s12396_s2 + $0x1c0] sm:$0xff]  ;;  %v128_v57 = vld [vmem:[%s12396_s2 + $0x1c8] sm:$0xff]  ;;  %v7697_v59 = vcombine.low %v119_v46, %v123_v47 }
  0x10   :  { %v131_v55 = vld [vmem:[%s12396_s2 + $0x1e0] sm:$0xff]  ;;  %v132_v58 = vld [vmem:[%s12396_s2 + $0x1e8] sm:$0xff]  ;;  %v7699_v60 = vcombine.low %v120_v48, %v124_v49 }
  0x11   :  { %v8740_v56 = vld [vmem:[%s12397_s0 + $0x4] ss:$24 sps:$4 sm:$0xff]   ;;  %v7706_v61 = vcombine.high %v127_v54, %v131_v55  ;;  %v7708_v62 = vcombine.high %v128_v57, %v132_v58  ;;  %v136_v1 = vld [vmem:[%s12396_s2 + $0x208] sm:$0xff]  ;;  %v7705_v3 = vcombine.low %v127_v54, %v131_v55  ;;  %v7707_v4 = vcombine.low %v128_v57, %v132_v58 }
  0x12   :  { %2622 = vmatpush1.bf16.msra.mxu0 %v7673_v34  ;;  %2961 = vmatpush1.bf16.msra.mxu1 %v7675_v35  ;;  %v135_v63 = vld [vmem:[%s12396_s2 + $0x200] sm:$0xff]  ;;  %v140_v2 = vld [vmem:[%s12396_s2 + $0x228] sm:$0xff] }
  0x13   :  { %2623 = vmatprep.subr.bf16.mxu0 %v7682_v36  ;;  %2962 = vmatprep.subr.bf16.mxu1 %v7684_v37  ;;  %v139_v0 = vld [vmem:[%s12396_s2 + $0x220] sm:$0xff]  ;;  %v7716_v6 = vcombine.high %v136_v1, %v140_v2  ;;  %v144_v9 = vld [vmem:[%s12396_s2 + $0x248] sm:$0xff]  ;;  %v7715_v12 = vcombine.low %v136_v1, %v140_v2 }
  0x14   :  { %2647 = vmatprep.mubr.bf16.mxu0 %v8740_v56  ;;  %2986 = vmatprep.mubr.bf16.mxu1 %v8740_v56  ;;  %v7714_v5 = vcombine.high %v135_v63, %v139_v0  ;;  %v143_v7 = vld [vmem:[%s12396_s2 + $0x240] sm:$0xff]  ;;  %v148_v10 = vld [vmem:[%s12396_s2 + $0x268] sm:$0xff]  ;;  %v7713_v11 = vcombine.low %v135_v63, %v139_v0 }
  0x15   :  { %v147_v8 = vld [vmem:[%s12396_s2 + $0x260] sm:$0xff]  ;;  %v7724_v14 = vcombine.high %v144_v9, %v148_v10  ;;  %v152_v17 = vld [vmem:[%s12396_s2 + $0x288] sm:$0xff]  ;;  %v7723_v20 = vcombine.low %v144_v9, %v148_v10 }
  0x16   :  { %2624 = vmatpush1.bf16.msra.mxu0 %v7681_v42  ;;  %2963 = vmatpush1.bf16.msra.mxu1 %v7683_v43  ;;  %v7722_v13 = vcombine.high %v143_v7, %v147_v8  ;;  %v151_v15 = vld [vmem:[%s12396_s2 + $0x280] sm:$0xff]  ;;  %v156_v18 = vld [vmem:[%s12396_s2 + $0x2a8] sm:$0xff]  ;;  %v7721_v19 = vcombine.low %v143_v7, %v147_v8 }
  0x17   :  { %2625 = vmatprep.subr.bf16.mxu0 %v7690_v44  ;;  %2964 = vmatprep.subr.bf16.mxu1 %v7692_v45  ;;  %v155_v16 = vld [vmem:[%s12396_s2 + $0x2a0] sm:$0xff]  ;;  %v7732_v22 = vcombine.high %v152_v17, %v156_v18  ;;  %v160_v25 = vld [vmem:[%s12396_s2 + $0x2c8] sm:$0xff]  ;;  %v7731_v28 = vcombine.low %v152_v17, %v156_v18 }
  0x18   :  { %v7730_v21 = vcombine.high %v151_v15, %v155_v16  ;;  %v159_v23 = vld [vmem:[%s12396_s2 + $0x2c0] sm:$0xff]  ;;  %v164_v26 = vld [vmem:[%s12396_s2 + $0x2e8] sm:$0xff]  ;;  %v7729_v27 = vcombine.low %v151_v15, %v155_v16 }
  0x19   :  { %v163_v24 = vld [vmem:[%s12396_s2 + $0x2e0] sm:$0xff]  ;;  %v7740_v30 = vcombine.high %v160_v25, %v164_v26  ;;  %v168_v33 = vld [vmem:[%s12396_s2 + $0x308] sm:$0xff]  ;;  %v7739_v36 = vcombine.low %v160_v25, %v164_v26 }
  0x1a   :  { %2626 = vmatpush1.bf16.msra.mxu0 %v7689_v50  ;;  %2965 = vmatpush1.bf16.msra.mxu1 %v7691_v51  ;;  %v7738_v29 = vcombine.high %v159_v23, %v163_v24  ;;  %v167_v31 = vld [vmem:[%s12396_s2 + $0x300] sm:$0xff]  ;;  %v172_v34 = vld [vmem:[%s12396_s2 + $0x328] sm:$0xff]  ;;  %v7737_v35 = vcombine.low %v159_v23, %v163_v24 }
  0x1b   :  { %2627 = vmatprep.subr.bf16.mxu0 %v7698_v52  ;;  %2966 = vmatprep.subr.bf16.mxu1 %v7700_v53  ;;  %v171_v32 = vld [vmem:[%s12396_s2 + $0x320] sm:$0xff]  ;;  %v7748_v38 = vcombine.high %v168_v33, %v172_v34  ;;  %v176_v41 = vld [vmem:[%s12396_s2 + $0x348] sm:$0xff]  ;;  %v7747_v44 = vcombine.low %v168_v33, %v172_v34 }
  0x1c   :  { %v7746_v37 = vcombine.high %v167_v31, %v171_v32  ;;  %v175_v39 = vld [vmem:[%s12396_s2 + $0x340] sm:$0xff]  ;;  %v180_v42 = vld [vmem:[%s12396_s2 + $0x368] sm:$0xff]  ;;  %v7745_v43 = vcombine.low %v167_v31, %v171_v32 }
  0x1d   :  { %v179_v40 = vld [vmem:[%s12396_s2 + $0x360] sm:$0xff]  ;;  %v7756_v46 = vcombine.high %v176_v41, %v180_v42  ;;  %v184_v49 = vld [vmem:[%s12396_s2 + $0x388] sm:$0xff]  ;;  %v7755_v52 = vcombine.low %v176_v41, %v180_v42 }
  0x1e   :  { %2628 = vmatpush1.bf16.msra.mxu0 %v7697_v59  ;;  %2967 = vmatpush1.bf16.msra.mxu1 %v7699_v60  ;;  %v7754_v45 = vcombine.high %v175_v39, %v179_v40  ;;  %v183_v47 = vld [vmem:[%s12396_s2 + $0x380] sm:$0xff]  ;;  %v188_v50 = vld [vmem:[%s12396_s2 + $0x3a8] sm:$0xff]  ;;  %v7753_v51 = vcombine.low %v175_v39, %v179_v40 }
  0x1f   :  { %2629 = vmatprep.subr.bf16.mxu0 %v7706_v61  ;;  %2968 = vmatprep.subr.bf16.mxu1 %v7708_v62  ;;  %v187_v48 = vld [vmem:[%s12396_s2 + $0x3a0] sm:$0xff]  ;;  %v7764_v54 = vcombine.high %v184_v49, %v188_v50  ;;  %v192_v57 = vld [vmem:[%s12396_s2 + $0x3c8] sm:$0xff]  ;;  %v7763_v60 = vcombine.low %v184_v49, %v188_v50 }
  0x20   :  { %v7762_v53 = vcombine.high %v183_v47, %v187_v48  ;;  %v191_v55 = vld [vmem:[%s12396_s2 + $0x3c0] sm:$0xff]  ;;  %v196_v58 = vld [vmem:[%s12396_s2 + $0x3e8] sm:$0xff]  ;;  %v7761_v59 = vcombine.low %v183_v47, %v187_v48 }
  0x21   :  { %v195_v56 = vld [vmem:[%s12396_s2 + $0x3e0] sm:$0xff]  ;;  %v7772_v62 = vcombine.high %v192_v57, %v196_v58  ;;  %v200_v1 = vld [vmem:[%s12396_s2 + $0x408] sm:$0xff] }
  0x22   :  { %2630 = vmatpush1.bf16.msra.mxu0 %v7705_v3  ;;  %2969 = vmatpush1.bf16.msra.mxu1 %v7707_v4  ;;  %v7770_v61 = vcombine.high %v191_v55, %v195_v56  ;;  %v199_v63 = vld [vmem:[%s12396_s2 + $0x400] sm:$0xff]  ;;  %v204_v2 = vld [vmem:[%s12396_s2 + $0x428] sm:$0xff]  ;;  %v7769_v3 = vcombine.low %v191_v55, %v195_v56  ;;  %v7771_v4 = vcombine.low %v192_v57, %v196_v58 }
  0x23   :  { %2631 = vmatprep.subr.bf16.mxu0 %v7714_v5  ;;  %2970 = vmatprep.subr.bf16.mxu1 %v7716_v6  ;;  %v203_v0 = vld [vmem:[%s12396_s2 + $0x420] sm:$0xff]  ;;  %v7780_v6 = vcombine.high %v200_v1, %v204_v2  ;;  %v208_v10 = vld [vmem:[%s12396_s2 + $0x448] sm:$0xff] }
  0x24   :  { %v7778_v5 = vcombine.high %v199_v63, %v203_v0  ;;  %v207_v7 = vld [vmem:[%s12396_s2 + $0x440] sm:$0xff]  ;;  %v8743_v16 = vld [vmem:[%s12397_s0 + $0x34] ss:$24 sps:$4 sm:$0xff]  }
  0x25   :  { %v211_v8 = vld [vmem:[%s12396_s2 + $0x460] sm:$0xff]  ;;  %v244_v47 = vld [vmem:[%s12396_s2 + $0x568] sm:$0xff] }
  0x26   :  { %2632 = vmatpush1.bf16.msra.mxu0 %v7713_v11  ;;  %2971 = vmatpush1.bf16.msra.mxu1 %v7715_v12  ;;  %v8742_v9 = vld [vmem:[%s12397_s0] ss:$24 sps:$4 sm:$0xff]   ;;  %v212_v11 = vld [vmem:[%s12396_s2 + $0x468] sm:$0xff]  ;;  %v7777_v12 = vcombine.low %v199_v63, %v203_v0  ;;  %v8746_v34 = vld [vmem:[%s12397_s0 + $0x64] ss:$24 sps:$4 sm:$0xff]  }
  0x27   :  { %2633 = vmatprep.subr.bf16.mxu0 %v7722_v13  ;;  %2972 = vmatprep.subr.bf16.mxu1 %v7724_v14  ;;  %v7779_v13 = vcombine.low %v200_v1, %v204_v2  ;;  %v7786_v14 = vcombine.high %v207_v7, %v211_v8  ;;  %v7788_v15 = vcombine.high %v208_v10, %v212_v11  ;;  %v215_v17 = vld [vmem:[%s12396_s2 + $0x480] sm:$0xff]  ;;  %v248_v55 = vld [vmem:[%s12396_s2 + $0x588] sm:$0xff] }
  0x28   :  { %v219_v18 = vld [vmem:[%s12396_s2 + $0x4a0] sm:$0xff]  ;;  %v252_v56 = vld [vmem:[%s12396_s2 + $0x5a8] sm:$0xff] }
  0x29   :  { %v7794_v23 = vcombine.high %v215_v17, %v219_v18  ;;  %v223_v25 = vld [vmem:[%s12396_s2 + $0x4c0] sm:$0xff]  ;;  %v8751_v63 = vld [vmem:[%s12397_s0 + $0x90] ss:$24 sps:$4 sm:$0xff]  }
  0x2a   :  { %2634 = vmatpush1.bf16.msra.mxu0 %v7721_v19  ;;  %2973 = vmatpush1.bf16.msra.mxu1 %v7723_v20  ;;  %v216_v19 = vld [vmem:[%s12396_s2 + $0x488] sm:$0xff]  ;;  %v227_v26 = vld [vmem:[%s12396_s2 + $0x4e0] sm:$0xff] }
  0x2b   :  { %2635 = vmatprep.subr.bf16.mxu0 %v7730_v21  ;;  %2974 = vmatprep.subr.bf16.mxu1 %v7732_v22  ;;  %v220_v20 = vld [vmem:[%s12396_s2 + $0x4a8] sm:$0xff]  ;;  %v7785_v21 = vcombine.low %v207_v7, %v211_v8  ;;  %v7787_v22 = vcombine.low %v208_v10, %v212_v11  ;;  %v7802_v32 = vcombine.high %v223_v25, %v227_v26  ;;  %v263_v7 = vld [vmem:[%s12396_s2 + $0x600] sm:$0xff] }
  0x2c   :  { %v7796_v24 = vcombine.high %v216_v19, %v220_v20  ;;  %v7795_v31 = vcombine.low %v216_v19, %v220_v20  ;;  %v7801_v39 = vcombine.low %v223_v25, %v227_v26  ;;  %v256_v0 = vld [vmem:[%s12396_s2 + $0x5c8] sm:$0xff]  ;;  %v267_v8 = vld [vmem:[%s12396_s2 + $0x620] sm:$0xff] }
  0x2d   :  { %v260_v1 = vld [vmem:[%s12396_s2 + $0x5e8] sm:$0xff]  ;;  %v7841_v20 = vcombine.low %v263_v7, %v267_v8  ;;  %v279_v25 = vld [vmem:[%s12396_s2 + $0x680] sm:$0xff] }
  0x2e   :  { %2636 = vmatpush1.bf16.msra.mxu0 %v7729_v27  ;;  %2975 = vmatpush1.bf16.msra.mxu1 %v7731_v28  ;;  %v8745_v27 = vld [vmem:[%s12397_s0 + $0x30] ss:$24 sps:$4 sm:$0xff]   ;;  %v283_v26 = vld [vmem:[%s12396_s2 + $0x6a0] sm:$0xff] }
  0x2f   :  { %2637 = vmatprep.subr.bf16.mxu0 %v7738_v29  ;;  %2976 = vmatprep.subr.bf16.mxu1 %v7740_v30  ;;  %v224_v28 = vld [vmem:[%s12396_s2 + $0x4c8] sm:$0xff]  ;;  %v7793_v30 = vcombine.low %v215_v17, %v219_v18  ;;  %v8754_v17 = vld [vmem:[%s12397_s0 + $0xc0] ss:$24 sps:$4 sm:$0xff]  }
  0x30   :  { %v228_v29 = vld [vmem:[%s12396_s2 + $0x4e8] sm:$0xff] }
  0x31   :  { %v7804_v33 = vcombine.high %v224_v28, %v228_v29  ;;  %v7803_v40 = vcombine.low %v224_v28, %v228_v29  ;;  %v268_v10 = vld [vmem:[%s12396_s2 + $0x628] sm:$0xff] }
  0x32   :  { %2638 = vmatpush1.bf16.msra.mxu0 %v7737_v35  ;;  %2977 = vmatpush1.bf16.msra.mxu1 %v7739_v36  ;;  %v231_v35 = vld [vmem:[%s12396_s2 + $0x500] sm:$0xff]  ;;  %v272_v18 = vld [vmem:[%s12396_s2 + $0x648] sm:$0xff] }
  0x33   :  { %2639 = vmatprep.subr.bf16.mxu0 %v7746_v37  ;;  %2978 = vmatprep.subr.bf16.mxu1 %v7748_v38  ;;  %v235_v36 = vld [vmem:[%s12396_s2 + $0x520] sm:$0xff]  ;;  %v232_v37 = vld [vmem:[%s12396_s2 + $0x508] sm:$0xff] }
  0x34   :  { %v236_v38 = vld [vmem:[%s12396_s2 + $0x528] sm:$0xff]  ;;  %v7810_v41 = vcombine.high %v231_v35, %v235_v36  ;;  %v7809_v48 = vcombine.low %v231_v35, %v235_v36 }
  0x35   :  { %v7812_v42 = vcombine.high %v232_v37, %v236_v38  ;;  %v7811_v49 = vcombine.low %v232_v37, %v236_v38  ;;  %v276_v19 = vld [vmem:[%s12396_s2 + $0x668] sm:$0xff]  ;;  %v7857_v38 = vcombine.low %v279_v25, %v283_v26 }
  0x36   :  { %2640 = vmatpush1.bf16.msra.mxu0 %v7745_v43  ;;  %2979 = vmatpush1.bf16.msra.mxu1 %v7747_v44  ;;  %v239_v43 = vld [vmem:[%s12396_s2 + $0x540] sm:$0xff]  ;;  %v284_v28 = vld [vmem:[%s12396_s2 + $0x6a8] sm:$0xff] }
  0x37   :  { %2641 = vmatprep.subr.bf16.mxu0 %v7754_v45  ;;  %2980 = vmatprep.subr.bf16.mxu1 %v7756_v46  ;;  %v243_v44 = vld [vmem:[%s12396_s2 + $0x560] sm:$0xff]  ;;  %v240_v46 = vld [vmem:[%s12396_s2 + $0x548] sm:$0xff] }
  0x38   :  { %v8748_v45 = vld [vmem:[%s12397_s0 + $0x60] ss:$24 sps:$4 sm:$0xff]   ;;  %v7818_v50 = vcombine.high %v239_v43, %v243_v44  ;;  %v7817_v57 = vcombine.low %v239_v43, %v243_v44  ;;  %v7819_v58 = vcombine.low %v240_v46, %v244_v47  ;;  %v8757_v35 = vld [vmem:[%s12397_s0 + $0xf0] ss:$24 sps:$4 sm:$0xff]  }
  0x39   :  { %v288_v36 = vld [vmem:[%s12396_s2 + $0x6c8] sm:$0xff]  ;;  %v295_v43 = vld [vmem:[%s12396_s2 + $0x700] sm:$0xff] }
  0x3a   :  { %2642 = vmatpush1.bf16.msra.mxu0 %v7753_v51  ;;  %2981 = vmatpush1.bf16.msra.mxu1 %v7755_v52  ;;  %v7820_v51 = vcombine.high %v240_v46, %v244_v47  ;;  %v8749_v52 = vld [vmem:[%s12397_s0 + $0x94] ss:$24 sps:$4 sm:$0xff]   ;;  %v299_v44 = vld [vmem:[%s12396_s2 + $0x720] sm:$0xff] }
  0x3b   :  { %2643 = vmatprep.subr.bf16.mxu0 %v7762_v53  ;;  %2982 = vmatprep.subr.bf16.mxu1 %v7764_v54  ;;  %v247_v53 = vld [vmem:[%s12396_s2 + $0x580] sm:$0xff]  ;;  %v292_v37 = vld [vmem:[%s12396_s2 + $0x6e8] sm:$0xff] }
  0x3c   :  { %v251_v54 = vld [vmem:[%s12396_s2 + $0x5a0] sm:$0xff]  ;;  %v300_v46 = vld [vmem:[%s12396_s2 + $0x728] sm:$0xff] }
  0x3d   :  { %v7825_v2 = vcombine.low %v247_v53, %v251_v54 }
  0x3e   :  { %2644 = vmatpush1.bf16.msra.mxu0 %v7761_v59  ;;  %2983 = vmatpush1.bf16.msra.mxu1 %v7763_v60  ;;  %v7826_v59 = vcombine.high %v247_v53, %v251_v54  ;;  %v7828_v60 = vcombine.high %v248_v55, %v252_v56  ;;  %v8760_v53 = vld [vmem:[%s12397_s0 + $0x120] ss:$24 sps:$4 sm:$0xff]   ;;  %v304_v54 = vld [vmem:[%s12396_s2 + $0x748] sm:$0xff] }
  0x3f   :  { %2645 = vmatprep.subr.bf16.mxu0 %v7770_v61  ;;  %2984 = vmatprep.subr.bf16.mxu1 %v7772_v62  ;;  %v255_v61 = vld [vmem:[%s12396_s2 + $0x5c0] sm:$0xff] }
  0x40   :  { %v259_v62 = vld [vmem:[%s12396_s2 + $0x5e0] sm:$0xff] }
  0x41   :  { %v7833_v11 = vcombine.low %v255_v61, %v259_v62 }
  0x42   :  { %2646 = vmatpush1.bf16.msra.mxu0 %v7769_v3  ;;  %2985 = vmatpush1.bf16.msra.mxu1 %v7771_v4  ;;  %v7827_v3 = vcombine.low %v248_v55, %v252_v56  ;;  %v7834_v4 = vcombine.high %v255_v61, %v259_v62  ;;  %v308_v55 = vld [vmem:[%s12396_s2 + $0x768] sm:$0xff]  ;;  %v7873_v56 = vcombine.low %v295_v43, %v299_v44  ;;  %v311_v61 = vld [vmem:[%s12396_s2 + $0x780] sm:$0xff] }
  0x43   :  { %2728 = vmatprep.subr.bf16.mxu0 %v7778_v5  ;;  %3067 = vmatprep.subr.bf16.mxu1 %v7780_v6  ;;  %v7836_v5 = vcombine.high %v256_v0, %v260_v1  ;;  %v8752_v6 = vld [vmem:[%s12397_s0 + $0xc4] ss:$24 sps:$4 sm:$0xff]  }
  0x44   :  { %v315_v62 = vld [vmem:[%s12396_s2 + $0x7a0] sm:$0xff] }
  0x45   :  { %2648 = vmatmul.mubr.bf16.vlgmr.msra.gmra.mrb[0].mxu0 %v8742_v9  ;;  %2987 = vmatmul.mubr.bf16.vlgmr.msra.gmra.mrb[0].mxu1 %v8742_v9  ;;  %v264_v9 = vld [vmem:[%s12396_s2 + $0x608] sm:$0xff] }
  0x46   :  { %2729 = vmatpush1.bf16.msra.mxu0 %v7777_v12  ;;  %3068 = vmatpush1.bf16.msra.mxu1 %v7779_v13  ;;  %v7835_v12 = vcombine.low %v256_v0, %v260_v1  ;;  %v7842_v13 = vcombine.high %v263_v7, %v267_v8  ;;  %v316_v0 = vld [vmem:[%s12396_s2 + $0x7a8] sm:$0xff] }
  0x47   :  { %2730 = vmatprep.subr.bf16.mxu0 %v7786_v14  ;;  %3069 = vmatprep.subr.bf16.mxu1 %v7788_v15  ;;  %v7844_v14 = vcombine.high %v264_v9, %v268_v10  ;;  %v271_v15 = vld [vmem:[%s12396_s2 + $0x640] sm:$0xff]  ;;  %v8763_v7 = vld [vmem:[%s12397_s0 + $0x150] ss:$24 sps:$4 sm:$0xff]  }
  0x48   :  { %2657 = vmatprep.mubr.bf16.mxu0 %v8743_v16  ;;  %2996 = vmatprep.mubr.bf16.mxu1 %v8743_v16  ;;  %v275_v16 = vld [vmem:[%s12396_s2 + $0x660] sm:$0xff]  ;;  %v320_v8 = vld [vmem:[%s12396_s2 + $0x7c8] sm:$0xff] }
  0x49   :  { %v7849_v29 = vcombine.low %v271_v15, %v275_v16 }
  0x4a   :  { %2731 = vmatpush1.bf16.msra.mxu0 %v7785_v21  ;;  %3070 = vmatpush1.bf16.msra.mxu1 %v7787_v22  ;;  %v7843_v21 = vcombine.low %v264_v9, %v268_v10  ;;  %v7850_v22 = vcombine.high %v271_v15, %v275_v16  ;;  %v324_v9 = vld [vmem:[%s12396_s2 + $0x7e8] sm:$0xff]  ;;  %v7889_v10 = vcombine.low %v311_v61, %v315_v62  ;;  %v327_v15 = vld [vmem:[%s12396_s2 + $0x800] sm:$0xff] }
  0x4b   :  { %2732 = vmatprep.subr.bf16.mxu0 %v7794_v23  ;;  %3071 = vmatprep.subr.bf16.mxu1 %v7796_v24  ;;  %v7852_v23 = vcombine.high %v272_v18, %v276_v19  ;;  %v8755_v24 = vld [vmem:[%s12397_s0 + $0xf4] ss:$24 sps:$4 sm:$0xff]   ;;  %v331_v16 = vld [vmem:[%s12396_s2 + $0x820] sm:$0xff] }
  0x4d   :  { %2658 = vmatmul.mubr.bf16.gmra.mrb[4].mxu0 %v8745_v27  ;;  %2997 = vmatmul.mubr.bf16.gmra.mrb[4].mxu1 %v8745_v27  ;;  %v280_v27 = vld [vmem:[%s12396_s2 + $0x688] sm:$0xff] }
  0x4e   :  { %2733 = vmatpush1.bf16.msra.mxu0 %v7793_v30  ;;  %3072 = vmatpush1.bf16.msra.mxu1 %v7795_v31  ;;  %v7851_v30 = vcombine.low %v272_v18, %v276_v19  ;;  %v7858_v31 = vcombine.high %v279_v25, %v283_v26  ;;  %v332_v18 = vld [vmem:[%s12396_s2 + $0x828] sm:$0xff] }
  0x4f   :  { %2734 = vmatprep.subr.bf16.mxu0 %v7802_v32  ;;  %3073 = vmatprep.subr.bf16.mxu1 %v7804_v33  ;;  %v7860_v32 = vcombine.high %v280_v27, %v284_v28  ;;  %v287_v33 = vld [vmem:[%s12396_s2 + $0x6c0] sm:$0xff]  ;;  %v336_v26 = vld [vmem:[%s12396_s2 + $0x848] sm:$0xff] }
  0x50   :  { %2667 = vmatprep.mubr.bf16.mxu0 %v8746_v34  ;;  %3006 = vmatprep.mubr.bf16.mxu1 %v8746_v34  ;;  %v291_v34 = vld [vmem:[%s12396_s2 + $0x6e0] sm:$0xff] }
  0x51   :  { %v7865_v47 = vcombine.low %v287_v33, %v291_v34  ;;  %v8764_v25 = vld [vmem:[%s12397_s0 + $0x8] ss:$24 sps:$4 sm:$0xff]  }
  0x52   :  { %2735 = vmatpush1.bf16.msra.mxu0 %v7801_v39  ;;  %3074 = vmatpush1.bf16.msra.mxu1 %v7803_v40  ;;  %v7859_v39 = vcombine.low %v280_v27, %v284_v28  ;;  %v7866_v40 = vcombine.high %v287_v33, %v291_v34  ;;  %v340_v27 = vld [vmem:[%s12396_s2 + $0x868] sm:$0xff]  ;;  %v7905_v28 = vcombine.low %v327_v15, %v331_v16  ;;  %v343_v33 = vld [vmem:[%s12396_s2 + $0x880] sm:$0xff] }
  0x53   :  { %2736 = vmatprep.subr.bf16.mxu0 %v7810_v41  ;;  %3075 = vmatprep.subr.bf16.mxu1 %v7812_v42  ;;  %v7868_v41 = vcombine.high %v288_v36, %v292_v37  ;;  %v8758_v42 = vld [vmem:[%s12397_s0 + $0x124] ss:$24 sps:$4 sm:$0xff]  }
  0x54   :  { %v347_v34 = vld [vmem:[%s12396_s2 + $0x8a0] sm:$0xff] }
  0x55   :  { %2668 = vmatmul.mubr.bf16.gmra.mrb[8].mxu0 %v8748_v45  ;;  %3007 = vmatmul.mubr.bf16.gmra.mrb[8].mxu1 %v8748_v45  ;;  %v296_v45 = vld [vmem:[%s12396_s2 + $0x708] sm:$0xff] }
  0x56   :  { %2737 = vmatpush1.bf16.msra.mxu0 %v7809_v48  ;;  %3076 = vmatpush1.bf16.msra.mxu1 %v7811_v49  ;;  %v7867_v48 = vcombine.low %v288_v36, %v292_v37  ;;  %v7874_v49 = vcombine.high %v295_v43, %v299_v44  ;;  %v348_v36 = vld [vmem:[%s12396_s2 + $0x8a8] sm:$0xff]  ;;  %v8769_v43 = vld [vmem:[%s12397_s0 + $0x38] ss:$24 sps:$4 sm:$0xff]  }
  0x57   :  { %2738 = vmatprep.subr.bf16.mxu0 %v7818_v50  ;;  %3077 = vmatprep.subr.bf16.mxu1 %v7820_v51  ;;  %v7876_v50 = vcombine.high %v296_v45, %v300_v46  ;;  %v303_v51 = vld [vmem:[%s12396_s2 + $0x740] sm:$0xff]  ;;  %v352_v44 = vld [vmem:[%s12396_s2 + $0x8c8] sm:$0xff] }
  0x58   :  { %2677 = vmatprep.mubr.bf16.mxu0 %v8749_v52  ;;  %3016 = vmatprep.mubr.bf16.mxu1 %v8749_v52  ;;  %v307_v52 = vld [vmem:[%s12396_s2 + $0x760] sm:$0xff] }
  0x59   :  { %v7881_v1 = vcombine.low %v303_v51, %v307_v52 }
  0x5a   :  { %2739 = vmatpush1.bf16.msra.mxu0 %v7817_v57  ;;  %3078 = vmatpush1.bf16.msra.mxu1 %v7819_v58  ;;  %v7875_v57 = vcombine.low %v296_v45, %v300_v46  ;;  %v7882_v58 = vcombine.high %v303_v51, %v307_v52  ;;  %v356_v45 = vld [vmem:[%s12396_s2 + $0x8e8] sm:$0xff]  ;;  %v7921_v46 = vcombine.low %v343_v33, %v347_v34  ;;  %v359_v51 = vld [vmem:[%s12396_s2 + $0x900] sm:$0xff] }
  0x5b   :  { %2740 = vmatprep.subr.bf16.mxu0 %v7826_v59  ;;  %3079 = vmatprep.subr.bf16.mxu1 %v7828_v60  ;;  %v7884_v59 = vcombine.high %v304_v54, %v308_v55  ;;  %v8761_v60 = vld [vmem:[%s12397_s0 + $0x154] ss:$24 sps:$4 sm:$0xff]   ;;  %v363_v52 = vld [vmem:[%s12396_s2 + $0x920] sm:$0xff] }
  0x5d   :  { %2678 = vmatmul.mubr.bf16.gmra.mrb[12].mxu0 %v8751_v63  ;;  %3017 = vmatmul.mubr.bf16.gmra.mrb[12].mxu1 %v8751_v63  ;;  %v312_v63 = vld [vmem:[%s12396_s2 + $0x788] sm:$0xff] }
  0x5e   :  { %2741 = vmatpush1.bf16.msra.mxu0 %v7825_v2  ;;  %3080 = vmatpush1.bf16.msra.mxu1 %v7827_v3  ;;  %v7883_v2 = vcombine.low %v304_v54, %v308_v55  ;;  %v7890_v3 = vcombine.high %v311_v61, %v315_v62  ;;  %v364_v54 = vld [vmem:[%s12396_s2 + $0x928] sm:$0xff] }
  0x5f   :  { %2742 = vmatprep.subr.bf16.mxu0 %v7834_v4  ;;  %3081 = vmatprep.subr.bf16.mxu1 %v7836_v5  ;;  %v7892_v4 = vcombine.high %v312_v63, %v316_v0  ;;  %v319_v5 = vld [vmem:[%s12396_s2 + $0x7c0] sm:$0xff]  ;;  %v368_v62 = vld [vmem:[%s12396_s2 + $0x948] sm:$0xff] }
  0x60   :  { %2687 = vmatprep.mubr.bf16.mxu0 %v8752_v6  ;;  %3026 = vmatprep.mubr.bf16.mxu1 %v8752_v6  ;;  %v323_v6 = vld [vmem:[%s12396_s2 + $0x7e0] sm:$0xff] }
  0x61   :  { %v7897_v19 = vcombine.low %v319_v5, %v323_v6  ;;  %v8772_v61 = vld [vmem:[%s12397_s0 + $0x68] ss:$24 sps:$4 sm:$0xff]  }
  0x62   :  { %2743 = vmatpush1.bf16.msra.mxu0 %v7833_v11  ;;  %3082 = vmatpush1.bf16.msra.mxu1 %v7835_v12  ;;  %v7891_v11 = vcombine.low %v312_v63, %v316_v0  ;;  %v7898_v12 = vcombine.high %v319_v5, %v323_v6  ;;  %v372_v63 = vld [vmem:[%s12396_s2 + $0x968] sm:$0xff]  ;;  %v7937_v0 = vcombine.low %v359_v51, %v363_v52  ;;  %v375_v5 = vld [vmem:[%s12396_s2 + $0x980] sm:$0xff] }
  0x63   :  { %2744 = vmatprep.subr.bf16.mxu0 %v7842_v13  ;;  %3083 = vmatprep.subr.bf16.mxu1 %v7844_v14  ;;  %v7900_v13 = vcombine.high %v320_v8, %v324_v9  ;;  %v8766_v14 = vld [vmem:[%s12397_s0 + $0xc] ss:$24 sps:$4 sm:$0xff]  }
  0x64   :  { %v379_v6 = vld [vmem:[%s12396_s2 + $0x9a0] sm:$0xff] }
  0x65   :  { %2688 = vmatmul.mubr.bf16.gmra.mrb[16].mxu0 %v8754_v17  ;;  %3027 = vmatmul.mubr.bf16.gmra.mrb[16].mxu1 %v8754_v17  ;;  %v328_v17 = vld [vmem:[%s12396_s2 + $0x808] sm:$0xff] }
  0x66   :  { %2745 = vmatpush1.bf16.msra.mxu0 %v7841_v20  ;;  %3084 = vmatpush1.bf16.msra.mxu1 %v7843_v21  ;;  %v7899_v20 = vcombine.low %v320_v8, %v324_v9  ;;  %v7906_v21 = vcombine.high %v327_v15, %v331_v16  ;;  %v380_v8 = vld [vmem:[%s12396_s2 + $0x9a8] sm:$0xff]  ;;  %v8775_v15 = vld [vmem:[%s12397_s0 + $0x98] ss:$24 sps:$4 sm:$0xff]  }
  0x67   :  { %2746 = vmatprep.subr.bf16.mxu0 %v7850_v22  ;;  %3085 = vmatprep.subr.bf16.mxu1 %v7852_v23  ;;  %v7908_v22 = vcombine.high %v328_v17, %v332_v18  ;;  %v335_v23 = vld [vmem:[%s12396_s2 + $0x840] sm:$0xff]  ;;  %v384_v16 = vld [vmem:[%s12396_s2 + $0x9c8] sm:$0xff] }
  0x68   :  { %2697 = vmatprep.mubr.bf16.mxu0 %v8755_v24  ;;  %3036 = vmatprep.mubr.bf16.mxu1 %v8755_v24  ;;  %v339_v24 = vld [vmem:[%s12396_s2 + $0x860] sm:$0xff] }
  0x69   :  { %v7913_v37 = vcombine.low %v335_v23, %v339_v24 }
  0x6a   :  { %2747 = vmatpush1.bf16.msra.mxu0 %v7849_v29  ;;  %3086 = vmatpush1.bf16.msra.mxu1 %v7851_v30  ;;  %v7907_v29 = vcombine.low %v328_v17, %v332_v18  ;;  %v7914_v30 = vcombine.high %v335_v23, %v339_v24  ;;  %v388_v17 = vld [vmem:[%s12396_s2 + $0x9e8] sm:$0xff]  ;;  %v7953_v18 = vcombine.low %v375_v5, %v379_v6  ;;  %v391_v23 = vld [vmem:[%s12396_s2 + $0xa00] sm:$0xff] }
  0x6b   :  { %2748 = vmatprep.subr.bf16.mxu0 %v7858_v31  ;;  %3087 = vmatprep.subr.bf16.mxu1 %v7860_v32  ;;  %v7916_v31 = vcombine.high %v336_v26, %v340_v27  ;;  %v8767_v32 = vld [vmem:[%s12397_s0 + $0x3c] ss:$24 sps:$4 sm:$0xff]   ;;  %v395_v24 = vld [vmem:[%s12396_s2 + $0xa20] sm:$0xff] }
  0x6d   :  { %2698 = vmatmul.mubr.bf16.gmra.mrb[20].mxu0 %v8757_v35  ;;  %3037 = vmatmul.mubr.bf16.gmra.mrb[20].mxu1 %v8757_v35  ;;  %v344_v35 = vld [vmem:[%s12396_s2 + $0x888] sm:$0xff] }
  0x6e   :  { %2749 = vmatpush1.bf16.msra.mxu0 %v7857_v38  ;;  %3088 = vmatpush1.bf16.msra.mxu1 %v7859_v39  ;;  %v7915_v38 = vcombine.low %v336_v26, %v340_v27  ;;  %v7922_v39 = vcombine.high %v343_v33, %v347_v34  ;;  %v396_v26 = vld [vmem:[%s12396_s2 + $0xa28] sm:$0xff] }
  0x6f   :  { %2750 = vmatprep.subr.bf16.mxu0 %v7866_v40  ;;  %3089 = vmatprep.subr.bf16.mxu1 %v7868_v41  ;;  %v7924_v40 = vcombine.high %v344_v35, %v348_v36  ;;  %v351_v41 = vld [vmem:[%s12396_s2 + $0x8c0] sm:$0xff]  ;;  %v400_v34 = vld [vmem:[%s12396_s2 + $0xa48] sm:$0xff] }
  0x70   :  { %2707 = vmatprep.mubr.bf16.mxu0 %v8758_v42  ;;  %3046 = vmatprep.mubr.bf16.mxu1 %v8758_v42  ;;  %v355_v42 = vld [vmem:[%s12396_s2 + $0x8e0] sm:$0xff] }
  0x71   :  { %v7929_v55 = vcombine.low %v351_v41, %v355_v42  ;;  %v8778_v33 = vld [vmem:[%s12397_s0 + $0xc8] ss:$24 sps:$4 sm:$0xff]  }
  0x72   :  { %2751 = vmatpush1.bf16.msra.mxu0 %v7865_v47  ;;  %3090 = vmatpush1.bf16.msra.mxu1 %v7867_v48  ;;  %v7923_v47 = vcombine.low %v344_v35, %v348_v36  ;;  %v7930_v48 = vcombine.high %v351_v41, %v355_v42  ;;  %v404_v35 = vld [vmem:[%s12396_s2 + $0xa68] sm:$0xff]  ;;  %v7969_v36 = vcombine.low %v391_v23, %v395_v24  ;;  %v407_v41 = vld [vmem:[%s12396_s2 + $0xa80] sm:$0xff] }
  0x73   :  { %2752 = vmatprep.subr.bf16.mxu0 %v7874_v49  ;;  %3091 = vmatprep.subr.bf16.mxu1 %v7876_v50  ;;  %v7932_v49 = vcombine.high %v352_v44, %v356_v45  ;;  %v8770_v50 = vld [vmem:[%s12397_s0 + $0x6c] ss:$24 sps:$4 sm:$0xff]  }
  0x74   :  { %v411_v42 = vld [vmem:[%s12396_s2 + $0xaa0] sm:$0xff] }
  0x75   :  { %2708 = vmatmul.mubr.bf16.gmra.mrb[24].mxu0 %v8760_v53  ;;  %3047 = vmatmul.mubr.bf16.gmra.mrb[24].mxu1 %v8760_v53  ;;  %v360_v53 = vld [vmem:[%s12396_s2 + $0x908] sm:$0xff] }
  0x76   :  { %2753 = vmatpush1.bf16.msra.mxu0 %v7873_v56  ;;  %3092 = vmatpush1.bf16.msra.mxu1 %v7875_v57  ;;  %v7931_v56 = vcombine.low %v352_v44, %v356_v45  ;;  %v7938_v57 = vcombine.high %v359_v51, %v363_v52  ;;  %v412_v44 = vld [vmem:[%s12396_s2 + $0xaa8] sm:$0xff]  ;;  %v8781_v51 = vld [vmem:[%s12397_s0 + $0xf8] ss:$24 sps:$4 sm:$0xff]  }
  0x77   :  { %2754 = vmatprep.subr.bf16.mxu0 %v7882_v58  ;;  %3093 = vmatprep.subr.bf16.mxu1 %v7884_v59  ;;  %v7940_v58 = vcombine.high %v360_v53, %v364_v54  ;;  %v367_v59 = vld [vmem:[%s12396_s2 + $0x940] sm:$0xff]  ;;  %v416_v52 = vld [vmem:[%s12396_s2 + $0xac8] sm:$0xff] }
  0x78   :  { %2717 = vmatprep.mubr.bf16.mxu0 %v8761_v60  ;;  %3056 = vmatprep.mubr.bf16.mxu1 %v8761_v60  ;;  %v371_v60 = vld [vmem:[%s12396_s2 + $0x960] sm:$0xff] }
  0x79   :  { %v7945_v9 = vcombine.low %v367_v59, %v371_v60 }
  0x7a   :  { %2755 = vmatpush1.bf16.msra.mxu0 %v7881_v1  ;;  %3094 = vmatpush1.bf16.msra.mxu1 %v7883_v2  ;;  %v7939_v1 = vcombine.low %v360_v53, %v364_v54  ;;  %v7946_v2 = vcombine.high %v367_v59, %v371_v60  ;;  %v420_v53 = vld [vmem:[%s12396_s2 + $0xae8] sm:$0xff]  ;;  %v7985_v54 = vcombine.low %v407_v41, %v411_v42  ;;  %v423_v59 = vld [vmem:[%s12396_s2 + $0xb00] sm:$0xff] }
  0x7b   :  { %2756 = vmatprep.subr.bf16.mxu0 %v7890_v3  ;;  %3095 = vmatprep.subr.bf16.mxu1 %v7892_v4  ;;  %v7948_v3 = vcombine.high %v368_v62, %v372_v63  ;;  %v8773_v4 = vld [vmem:[%s12397_s0 + $0x9c] ss:$24 sps:$4 sm:$0xff]   ;;  %v427_v60 = vld [vmem:[%s12396_s2 + $0xb20] sm:$0xff] }
  0x7d   :  { %2718 = vmatmul.mubr.bf16.gmra.mrb[28].mxu0 %v8763_v7  ;;  %3057 = vmatmul.mubr.bf16.gmra.mrb[28].mxu1 %v8763_v7  ;;  %v376_v7 = vld [vmem:[%s12396_s2 + $0x988] sm:$0xff] }
  0x7e   :  { %2757 = vmatpush1.bf16.msra.mxu0 %v7889_v10  ;;  %3096 = vmatpush1.bf16.msra.mxu1 %v7891_v11  ;;  %v7947_v10 = vcombine.low %v368_v62, %v372_v63  ;;  %v7954_v11 = vcombine.high %v375_v5, %v379_v6  ;;  %v428_v62 = vld [vmem:[%s12396_s2 + $0xb28] sm:$0xff] }
  0x7f   :  { %2758 = vmatprep.subr.bf16.mxu0 %v7898_v12  ;;  %3097 = vmatprep.subr.bf16.mxu1 %v7900_v13  ;;  %v7956_v12 = vcombine.high %v376_v7, %v380_v8  ;;  %v383_v13 = vld [vmem:[%s12396_s2 + $0x9c0] sm:$0xff]  ;;  %v432_v6 = vld [vmem:[%s12396_s2 + $0xb48] sm:$0xff] }
  0x80   :  { %2760 = vmatprep.mubr.bf16.mxu0 %v8766_v14  ;;  %3099 = vmatprep.mubr.bf16.mxu1 %v8766_v14  ;;  %v387_v14 = vld [vmem:[%s12396_s2 + $0x9e0] sm:$0xff] }
  0x81   :  { %v7961_v27 = vcombine.low %v383_v13, %v387_v14  ;;  %v8784_v5 = vld [vmem:[%s12397_s0 + $0x128] ss:$24 sps:$4 sm:$0xff]  }
  0x82   :  { %2759 = vmatpush1.bf16.msra.mxu0 %v7897_v19  ;;  %3098 = vmatpush1.bf16.msra.mxu1 %v7899_v20  ;;  %v7955_v19 = vcombine.low %v376_v7, %v380_v8  ;;  %v7962_v20 = vcombine.high %v383_v13, %v387_v14  ;;  %v436_v7 = vld [vmem:[%s12396_s2 + $0xb68] sm:$0xff]  ;;  %v8001_v8 = vcombine.low %v423_v59, %v427_v60  ;;  %v439_v13 = vld [vmem:[%s12396_s2 + $0xb80] sm:$0xff] }
  0x83   :  { %2841 = vmatprep.subr.bf16.mxu0 %v7906_v21  ;;  %3180 = vmatprep.subr.bf16.mxu1 %v7908_v22  ;;  %v7964_v21 = vcombine.high %v384_v16, %v388_v17  ;;  %v8776_v22 = vld [vmem:[%s12397_s0 + $0xcc] ss:$24 sps:$4 sm:$0xff]  }
  0x84   :  { %v443_v14 = vld [vmem:[%s12396_s2 + $0xba0] sm:$0xff] }
  0x85   :  { %2761 = vmatmul.mubr.bf16.vlgmr.msra.gmra.mrb[0].mxu0 %v8764_v25  ;;  %3100 = vmatmul.mubr.bf16.vlgmr.msra.gmra.mrb[0].mxu1 %v8764_v25  ;;  %v392_v25 = vld [vmem:[%s12396_s2 + $0xa08] sm:$0xff] }
  0x86   :  { %2842 = vmatpush1.bf16.msra.mxu0 %v7905_v28  ;;  %3181 = vmatpush1.bf16.msra.mxu1 %v7907_v29  ;;  %v7963_v28 = vcombine.low %v384_v16, %v388_v17  ;;  %v7970_v29 = vcombine.high %v391_v23, %v395_v24  ;;  %v444_v16 = vld [vmem:[%s12396_s2 + $0xba8] sm:$0xff]  ;;  %v8787_v23 = vld [vmem:[%s12397_s0 + $0x158] ss:$24 sps:$4 sm:$0xff]  }
  0x87   :  { %2843 = vmatprep.subr.bf16.mxu0 %v7914_v30  ;;  %3182 = vmatprep.subr.bf16.mxu1 %v7916_v31  ;;  %v7972_v30 = vcombine.high %v392_v25, %v396_v26  ;;  %v399_v31 = vld [vmem:[%s12396_s2 + $0xa40] sm:$0xff]  ;;  %v448_v24 = vld [vmem:[%s12396_s2 + $0xbc8] sm:$0xff] }
  0x88   :  { %2770 = vmatprep.mubr.bf16.mxu0 %v8767_v32  ;;  %3109 = vmatprep.mubr.bf16.mxu1 %v8767_v32  ;;  %v403_v32 = vld [vmem:[%s12396_s2 + $0xa60] sm:$0xff] }
  0x89   :  { %v7977_v45 = vcombine.low %v399_v31, %v403_v32 }
  0x8a   :  { %2844 = vmatpush1.bf16.msra.mxu0 %v7913_v37  ;;  %3183 = vmatpush1.bf16.msra.mxu1 %v7915_v38  ;;  %v7971_v37 = vcombine.low %v392_v25, %v396_v26  ;;  %v7978_v38 = vcombine.high %v399_v31, %v403_v32  ;;  %v452_v25 = vld [vmem:[%s12396_s2 + $0xbe8] sm:$0xff]  ;;  %v8017_v26 = vcombine.low %v439_v13, %v443_v14  ;;  %v73_v31 = vld [vmem:[%s12396_s2 + $0x10] sm:$0xff] }
  0x8b   :  { %2845 = vmatprep.subr.bf16.mxu0 %v7922_v39  ;;  %3184 = vmatprep.subr.bf16.mxu1 %v7924_v40  ;;  %v7980_v39 = vcombine.high %v400_v34, %v404_v35  ;;  %v8779_v40 = vld [vmem:[%s12397_s0 + $0xfc] ss:$24 sps:$4 sm:$0xff]  }
  0x8c   :  { %v77_v32 = vld [vmem:[%s12396_s2 + $0x30] sm:$0xff] }
  0x8d   :  { %2771 = vmatmul.mubr.bf16.gmra.mrb[4].mxu0 %v8769_v43  ;;  %3110 = vmatmul.mubr.bf16.gmra.mrb[4].mxu1 %v8769_v43  ;;  %v408_v43 = vld [vmem:[%s12396_s2 + $0xa88] sm:$0xff] }
  0x8e   :  { %2846 = vmatpush1.bf16.msra.mxu0 %v7921_v46  ;;  %3185 = vmatpush1.bf16.msra.mxu1 %v7923_v47  ;;  %v7979_v46 = vcombine.low %v400_v34, %v404_v35  ;;  %v7986_v47 = vcombine.high %v407_v41, %v411_v42  ;;  %v78_v34 = vld [vmem:[%s12396_s2 + $0x38] sm:$0xff]  ;;  %v8788_v41 = vld [vmem:[%s12397_s0 + $0x10] ss:$24 sps:$4 sm:$0xff]  }
  0x8f   :  { %2847 = vmatprep.subr.bf16.mxu0 %v7930_v48  ;;  %3186 = vmatprep.subr.bf16.mxu1 %v7932_v49  ;;  %v7988_v48 = vcombine.high %v408_v43, %v412_v44  ;;  %v415_v49 = vld [vmem:[%s12396_s2 + $0xac0] sm:$0xff]  ;;  %v82_v42 = vld [vmem:[%s12396_s2 + $0x58] sm:$0xff] }
  0x90   :  { %2780 = vmatprep.mubr.bf16.mxu0 %v8770_v50  ;;  %3119 = vmatprep.mubr.bf16.mxu1 %v8770_v50  ;;  %v419_v50 = vld [vmem:[%s12396_s2 + $0xae0] sm:$0xff] }
  0x91   :  { %v7993_v63 = vcombine.low %v415_v49, %v419_v50 }
  0x92   :  { %2848 = vmatpush1.bf16.msra.mxu0 %v7929_v55  ;;  %3187 = vmatpush1.bf16.msra.mxu1 %v7931_v56  ;;  %v7987_v55 = vcombine.low %v408_v43, %v412_v44  ;;  %v7994_v56 = vcombine.high %v415_v49, %v419_v50  ;;  %v86_v43 = vld [vmem:[%s12396_s2 + $0x78] sm:$0xff]  ;;  %v7653_v44 = vcombine.low %v73_v31, %v77_v32  ;;  %v89_v49 = vld [vmem:[%s12396_s2 + $0x90] sm:$0xff] }
  0x93   :  { %2849 = vmatprep.subr.bf16.mxu0 %v7938_v57  ;;  %3188 = vmatprep.subr.bf16.mxu1 %v7940_v58  ;;  %v7996_v57 = vcombine.high %v416_v52, %v420_v53  ;;  %v8782_v58 = vld [vmem:[%s12397_s0 + $0x12c] ss:$24 sps:$4 sm:$0xff]   ;;  %v93_v50 = vld [vmem:[%s12396_s2 + $0xb0] sm:$0xff] }
  0x95   :  { %2781 = vmatmul.mubr.bf16.gmra.mrb[8].mxu0 %v8772_v61  ;;  %3120 = vmatmul.mubr.bf16.gmra.mrb[8].mxu1 %v8772_v61  ;;  %v424_v61 = vld [vmem:[%s12396_s2 + $0xb08] sm:$0xff] }
  0x96   :  { %2850 = vmatpush1.bf16.msra.mxu0 %v7937_v0  ;;  %3189 = vmatpush1.bf16.msra.mxu1 %v7939_v1  ;;  %v7995_v0 = vcombine.low %v416_v52, %v420_v53  ;;  %v8002_v1 = vcombine.high %v423_v59, %v427_v60  ;;  %v94_v52 = vld [vmem:[%s12396_s2 + $0xb8] sm:$0xff] }
  0x97   :  { %2851 = vmatprep.subr.bf16.mxu0 %v7946_v2  ;;  %3190 = vmatprep.subr.bf16.mxu1 %v7948_v3  ;;  %v8004_v2 = vcombine.high %v424_v61, %v428_v62  ;;  %v431_v3 = vld [vmem:[%s12396_s2 + $0xb40] sm:$0xff]  ;;  %v98_v60 = vld [vmem:[%s12396_s2 + $0xd8] sm:$0xff] }
  0x98   :  { %2790 = vmatprep.mubr.bf16.mxu0 %v8773_v4  ;;  %3129 = vmatprep.mubr.bf16.mxu1 %v8773_v4  ;;  %v435_v4 = vld [vmem:[%s12396_s2 + $0xb60] sm:$0xff] }
  0x99   :  { %v8009_v17 = vcombine.low %v431_v3, %v435_v4  ;;  %v8793_v59 = vld [vmem:[%s12397_s0 + $0x40] ss:$24 sps:$4 sm:$0xff]  }
  0x9a   :  { %2852 = vmatpush1.bf16.msra.mxu0 %v7945_v9  ;;  %3191 = vmatpush1.bf16.msra.mxu1 %v7947_v10  ;;  %v8003_v9 = vcombine.low %v424_v61, %v428_v62  ;;  %v8010_v10 = vcombine.high %v431_v3, %v435_v4  ;;  %v102_v61 = vld [vmem:[%s12396_s2 + $0xf8] sm:$0xff]  ;;  %v7669_v62 = vcombine.low %v89_v49, %v93_v50  ;;  %v105_v3 = vld [vmem:[%s12396_s2 + $0x110] sm:$0xff] }
  0x9b   :  { %2853 = vmatprep.subr.bf16.mxu0 %v7954_v11  ;;  %3192 = vmatprep.subr.bf16.mxu1 %v7956_v12  ;;  %v8012_v11 = vcombine.high %v432_v6, %v436_v7  ;;  %v8785_v12 = vld [vmem:[%s12397_s0 + $0x15c] ss:$24 sps:$4 sm:$0xff]  }
  0x9c   :  { %v109_v4 = vld [vmem:[%s12396_s2 + $0x130] sm:$0xff] }
  0x9d   :  { %2791 = vmatmul.mubr.bf16.gmra.mrb[12].mxu0 %v8775_v15  ;;  %3130 = vmatmul.mubr.bf16.gmra.mrb[12].mxu1 %v8775_v15  ;;  %v440_v15 = vld [vmem:[%s12396_s2 + $0xb88] sm:$0xff] }
  0x9e   :  { %2854 = vmatpush1.bf16.msra.mxu0 %v7953_v18  ;;  %3193 = vmatpush1.bf16.msra.mxu1 %v7955_v19  ;;  %v8011_v18 = vcombine.low %v432_v6, %v436_v7  ;;  %v8018_v19 = vcombine.high %v439_v13, %v443_v14  ;;  %v110_v6 = vld [vmem:[%s12396_s2 + $0x138] sm:$0xff]  ;;  %v8796_v13 = vld [vmem:[%s12397_s0 + $0x70] ss:$24 sps:$4 sm:$0xff]  }
  0x9f   :  { %2855 = vmatprep.subr.bf16.mxu0 %v7962_v20  ;;  %3194 = vmatprep.subr.bf16.mxu1 %v7964_v21  ;;  %v8020_v20 = vcombine.high %v440_v15, %v444_v16  ;;  %v447_v21 = vld [vmem:[%s12396_s2 + $0xbc0] sm:$0xff]  ;;  %v114_v14 = vld [vmem:[%s12396_s2 + $0x158] sm:$0xff] }
  0xa0   :  { %2800 = vmatprep.mubr.bf16.mxu0 %v8776_v22  ;;  %3139 = vmatprep.mubr.bf16.mxu1 %v8776_v22  ;;  %v451_v22 = vld [vmem:[%s12396_s2 + $0xbe0] sm:$0xff] }
  0xa1   :  { %v8025_v35 = vcombine.low %v447_v21, %v451_v22 }
  0xa2   :  { %2856 = vmatpush1.bf16.msra.mxu0 %v7961_v27  ;;  %3195 = vmatpush1.bf16.msra.mxu1 %v7963_v28  ;;  %v8019_v27 = vcombine.low %v440_v15, %v444_v16  ;;  %v8026_v28 = vcombine.high %v447_v21, %v451_v22  ;;  %v118_v15 = vld [vmem:[%s12396_s2 + $0x178] sm:$0xff]  ;;  %v7685_v16 = vcombine.low %v105_v3, %v109_v4  ;;  %v121_v21 = vld [vmem:[%s12396_s2 + $0x190] sm:$0xff] }
  0xa3   :  { %2857 = vmatprep.subr.bf16.mxu0 %v7970_v29  ;;  %3196 = vmatprep.subr.bf16.mxu1 %v7972_v30  ;;  %v8028_v29 = vcombine.high %v448_v24, %v452_v25  ;;  %v8790_v30 = vld [vmem:[%s12397_s0 + $0x14] ss:$24 sps:$4 sm:$0xff]  }
  0xa4   :  { %v125_v22 = vld [vmem:[%s12396_s2 + $0x1b0] sm:$0xff] }
  0xa5   :  { %2801 = vmatmul.mubr.bf16.gmra.mrb[16].mxu0 %v8778_v33  ;;  %3140 = vmatmul.mubr.bf16.gmra.mrb[16].mxu1 %v8778_v33  ;;  %v74_v33 = vld [vmem:[%s12396_s2 + $0x18] sm:$0xff] }
  0xa6   :  { %2858 = vmatpush1.bf16.msra.mxu0 %v7969_v36  ;;  %3197 = vmatpush1.bf16.msra.mxu1 %v7971_v37  ;;  %v8027_v36 = vcombine.low %v448_v24, %v452_v25  ;;  %v7654_v37 = vcombine.high %v73_v31, %v77_v32  ;;  %v126_v24 = vld [vmem:[%s12396_s2 + $0x1b8] sm:$0xff] }
  0xa7   :  { %2859 = vmatprep.subr.bf16.mxu0 %v7978_v38  ;;  %3198 = vmatprep.subr.bf16.mxu1 %v7980_v39  ;;  %v7656_v38 = vcombine.high %v74_v33, %v78_v34  ;;  %v81_v39 = vld [vmem:[%s12396_s2 + $0x50] sm:$0xff]  ;;  %v8799_v31 = vld [vmem:[%s12397_s0 + $0xa0] ss:$24 sps:$4 sm:$0xff]  }
  0xa8   :  { %2810 = vmatprep.mubr.bf16.mxu0 %v8779_v40  ;;  %3149 = vmatprep.mubr.bf16.mxu1 %v8779_v40  ;;  %v85_v40 = vld [vmem:[%s12396_s2 + $0x70] sm:$0xff]  ;;  %v130_v32 = vld [vmem:[%s12396_s2 + $0x1d8] sm:$0xff] }
  0xa9   :  { %v7661_v53 = vcombine.low %v81_v39, %v85_v40 }
  0xaa   :  { %2860 = vmatpush1.bf16.msra.mxu0 %v7977_v45  ;;  %3199 = vmatpush1.bf16.msra.mxu1 %v7979_v46  ;;  %v7655_v45 = vcombine.low %v74_v33, %v78_v34  ;;  %v7662_v46 = vcombine.high %v81_v39, %v85_v40  ;;  %v134_v33 = vld [vmem:[%s12396_s2 + $0x1f8] sm:$0xff]  ;;  %v7701_v34 = vcombine.low %v121_v21, %v125_v22  ;;  %v137_v39 = vld [vmem:[%s12396_s2 + $0x210] sm:$0xff] }
  0xab   :  { %2861 = vmatprep.subr.bf16.mxu0 %v7986_v47  ;;  %3200 = vmatprep.subr.bf16.mxu1 %v7988_v48  ;;  %v7664_v47 = vcombine.high %v82_v42, %v86_v43  ;;  %v8791_v48 = vld [vmem:[%s12397_s0 + $0x44] ss:$24 sps:$4 sm:$0xff]   ;;  %v141_v40 = vld [vmem:[%s12396_s2 + $0x230] sm:$0xff] }
  0xad   :  { %2811 = vmatmul.mubr.bf16.gmra.mrb[20].mxu0 %v8781_v51  ;;  %3150 = vmatmul.mubr.bf16.gmra.mrb[20].mxu1 %v8781_v51  ;;  %v90_v51 = vld [vmem:[%s12396_s2 + $0x98] sm:$0xff] }
  0xae   :  { %2862 = vmatpush1.bf16.msra.mxu0 %v7985_v54  ;;  %3201 = vmatpush1.bf16.msra.mxu1 %v7987_v55  ;;  %v7663_v54 = vcombine.low %v82_v42, %v86_v43  ;;  %v7670_v55 = vcombine.high %v89_v49, %v93_v50  ;;  %v142_v42 = vld [vmem:[%s12396_s2 + $0x238] sm:$0xff]  ;;  %v8802_v49 = vld [vmem:[%s12397_s0 + $0xd0] ss:$24 sps:$4 sm:$0xff]  }
  0xaf   :  { %2863 = vmatprep.subr.bf16.mxu0 %v7994_v56  ;;  %3202 = vmatprep.subr.bf16.mxu1 %v7996_v57  ;;  %v7672_v56 = vcombine.high %v90_v51, %v94_v52  ;;  %v97_v57 = vld [vmem:[%s12396_s2 + $0xd0] sm:$0xff]  ;;  %v146_v50 = vld [vmem:[%s12396_s2 + $0x258] sm:$0xff] }
  0xb0   :  { %2820 = vmatprep.mubr.bf16.mxu0 %v8782_v58  ;;  %3159 = vmatprep.mubr.bf16.mxu1 %v8782_v58  ;;  %v101_v58 = vld [vmem:[%s12396_s2 + $0xf0] sm:$0xff] }
  0xb1   :  { %v7677_v7 = vcombine.low %v97_v57, %v101_v58 }
  0xb2   :  { %2864 = vmatpush1.bf16.msra.mxu0 %v7993_v63  ;;  %3203 = vmatpush1.bf16.msra.mxu1 %v7995_v0  ;;  %v7671_v63 = vcombine.low %v90_v51, %v94_v52  ;;  %v7678_v0 = vcombine.high %v97_v57, %v101_v58  ;;  %v150_v51 = vld [vmem:[%s12396_s2 + $0x278] sm:$0xff]  ;;  %v7717_v52 = vcombine.low %v137_v39, %v141_v40  ;;  %v153_v57 = vld [vmem:[%s12396_s2 + $0x290] sm:$0xff] }
  0xb3   :  { %2865 = vmatprep.subr.bf16.mxu0 %v8002_v1  ;;  %3204 = vmatprep.subr.bf16.mxu1 %v8004_v2  ;;  %v7680_v1 = vcombine.high %v98_v60, %v102_v61  ;;  %v8794_v2 = vld [vmem:[%s12397_s0 + $0x74] ss:$24 sps:$4 sm:$0xff]  }
  0xb4   :  { %v157_v58 = vld [vmem:[%s12396_s2 + $0x2b0] sm:$0xff] }
  0xb5   :  { %2821 = vmatmul.mubr.bf16.gmra.mrb[24].mxu0 %v8784_v5  ;;  %3160 = vmatmul.mubr.bf16.gmra.mrb[24].mxu1 %v8784_v5  ;;  %v106_v5 = vld [vmem:[%s12396_s2 + $0x118] sm:$0xff] }
  0xb6   :  { %2866 = vmatpush1.bf16.msra.mxu0 %v8001_v8  ;;  %3205 = vmatpush1.bf16.msra.mxu1 %v8003_v9  ;;  %v7679_v8 = vcombine.low %v98_v60, %v102_v61  ;;  %v7686_v9 = vcombine.high %v105_v3, %v109_v4  ;;  %v158_v60 = vld [vmem:[%s12396_s2 + $0x2b8] sm:$0xff] }
  0xb7   :  { %2867 = vmatprep.subr.bf16.mxu0 %v8010_v10  ;;  %3206 = vmatprep.subr.bf16.mxu1 %v8012_v11  ;;  %v7688_v10 = vcombine.high %v106_v5, %v110_v6  ;;  %v113_v11 = vld [vmem:[%s12396_s2 + $0x150] sm:$0xff]  ;;  %v8805_v3 = vld [vmem:[%s12397_s0 + $0x100] ss:$24 sps:$4 sm:$0xff]  }
  0xb8   :  { %2830 = vmatprep.mubr.bf16.mxu0 %v8785_v12  ;;  %3169 = vmatprep.mubr.bf16.mxu1 %v8785_v12  ;;  %v117_v12 = vld [vmem:[%s12396_s2 + $0x170] sm:$0xff]  ;;  %v162_v4 = vld [vmem:[%s12396_s2 + $0x2d8] sm:$0xff] }
  0xb9   :  { %v7693_v25 = vcombine.low %v113_v11, %v117_v12 }
  0xba   :  { %2868 = vmatpush1.bf16.msra.mxu0 %v8009_v17  ;;  %3207 = vmatpush1.bf16.msra.mxu1 %v8011_v18  ;;  %v7687_v17 = vcombine.low %v106_v5, %v110_v6  ;;  %v7694_v18 = vcombine.high %v113_v11, %v117_v12  ;;  %v166_v5 = vld [vmem:[%s12396_s2 + $0x2f8] sm:$0xff]  ;;  %v7733_v6 = vcombine.low %v153_v57, %v157_v58  ;;  %v169_v11 = vld [vmem:[%s12396_s2 + $0x310] sm:$0xff] }
  0xbb   :  { %2869 = vmatprep.subr.bf16.mxu0 %v8018_v19  ;;  %3208 = vmatprep.subr.bf16.mxu1 %v8020_v20  ;;  %v7696_v19 = vcombine.high %v114_v14, %v118_v15  ;;  %v8797_v20 = vld [vmem:[%s12397_s0 + $0xa4] ss:$24 sps:$4 sm:$0xff]   ;;  %v173_v12 = vld [vmem:[%s12396_s2 + $0x330] sm:$0xff] }
  0xbd   :  { %2831 = vmatmul.mubr.bf16.gmra.mrb[28].mxu0 %v8787_v23  ;;  %3170 = vmatmul.mubr.bf16.gmra.mrb[28].mxu1 %v8787_v23  ;;  %v122_v23 = vld [vmem:[%s12396_s2 + $0x198] sm:$0xff] }
  0xbe   :  { %2870 = vmatpush1.bf16.msra.mxu0 %v8017_v26  ;;  %3209 = vmatpush1.bf16.msra.mxu1 %v8019_v27  ;;  %v7695_v26 = vcombine.low %v114_v14, %v118_v15  ;;  %v7702_v27 = vcombine.high %v121_v21, %v125_v22  ;;  %v174_v14 = vld [vmem:[%s12396_s2 + $0x338] sm:$0xff]  ;;  %v8808_v21 = vld [vmem:[%s12397_s0 + $0x130] ss:$24 sps:$4 sm:$0xff]  }
  0xbf   :  { %2871 = vmatprep.subr.bf16.mxu0 %v8026_v28  ;;  %3210 = vmatprep.subr.bf16.mxu1 %v8028_v29  ;;  %v7704_v28 = vcombine.high %v122_v23, %v126_v24  ;;  %v129_v29 = vld [vmem:[%s12396_s2 + $0x1d0] sm:$0xff]  ;;  %v178_v22 = vld [vmem:[%s12396_s2 + $0x358] sm:$0xff] }
  0xc0   :  { %2873 = vmatprep.mubr.bf16.mxu0 %v8790_v30  ;;  %3212 = vmatprep.mubr.bf16.mxu1 %v8790_v30  ;;  %v133_v30 = vld [vmem:[%s12396_s2 + $0x1f0] sm:$0xff] }
  0xc1   :  { %v7709_v43 = vcombine.low %v129_v29, %v133_v30 }
  0xc2   :  { %2872 = vmatpush1.bf16.msra.mxu0 %v8025_v35  ;;  %3211 = vmatpush1.bf16.msra.mxu1 %v8027_v36  ;;  %v7703_v35 = vcombine.low %v122_v23, %v126_v24  ;;  %v7710_v36 = vcombine.high %v129_v29, %v133_v30  ;;  %v182_v23 = vld [vmem:[%s12396_s2 + $0x378] sm:$0xff]  ;;  %v7749_v24 = vcombine.low %v169_v11, %v173_v12  ;;  %v185_v29 = vld [vmem:[%s12396_s2 + $0x390] sm:$0xff] }
  0xc3   :  { %3293 = vmatprep.subr.bf16.mxu0 %v7654_v37  ;;  %3632 = vmatprep.subr.bf16.mxu1 %v7656_v38  ;;  %v7712_v37 = vcombine.high %v130_v32, %v134_v33  ;;  %v8800_v38 = vld [vmem:[%s12397_s0 + $0xd4] ss:$24 sps:$4 sm:$0xff]  }
  0xc4   :  { %v189_v30 = vld [vmem:[%s12396_s2 + $0x3b0] sm:$0xff] }
  0xc5   :  { %2874 = vmatmul.mubr.bf16.vlgmr.msra.gmra.mrb[0].mxu0 %v8788_v41  ;;  %3213 = vmatmul.mubr.bf16.vlgmr.msra.gmra.mrb[0].mxu1 %v8788_v41  ;;  %v138_v41 = vld [vmem:[%s12396_s2 + $0x218] sm:$0xff] }
  0xc6   :  { %3294 = vmatpush1.bf16.msra.mxu0 %v7653_v44  ;;  %3633 = vmatpush1.bf16.msra.mxu1 %v7655_v45  ;;  %v7711_v44 = vcombine.low %v130_v32, %v134_v33  ;;  %v7718_v45 = vcombine.high %v137_v39, %v141_v40  ;;  %v190_v32 = vld [vmem:[%s12396_s2 + $0x3b8] sm:$0xff] }
  0xc7   :  { %3295 = vmatprep.subr.bf16.mxu0 %v7662_v46  ;;  %3634 = vmatprep.subr.bf16.mxu1 %v7664_v47  ;;  %v7720_v46 = vcombine.high %v138_v41, %v142_v42  ;;  %v145_v47 = vld [vmem:[%s12396_s2 + $0x250] sm:$0xff]  ;;  %v8811_v39 = vld [vmem:[%s12397_s0 + $0x160] ss:$24 sps:$4 sm:$0xff]  }
  0xc8   :  { %2883 = vmatprep.mubr.bf16.mxu0 %v8791_v48  ;;  %3222 = vmatprep.mubr.bf16.mxu1 %v8791_v48  ;;  %v149_v48 = vld [vmem:[%s12396_s2 + $0x270] sm:$0xff]  ;;  %v194_v40 = vld [vmem:[%s12396_s2 + $0x3d8] sm:$0xff] }
  0xc9   :  { %v7725_v61 = vcombine.low %v145_v47, %v149_v48 }
  0xca   :  { %3296 = vmatpush1.bf16.msra.mxu0 %v7661_v53  ;;  %3635 = vmatpush1.bf16.msra.mxu1 %v7663_v54  ;;  %v7719_v53 = vcombine.low %v138_v41, %v142_v42  ;;  %v7726_v54 = vcombine.high %v145_v47, %v149_v48  ;;  %v198_v41 = vld [vmem:[%s12396_s2 + $0x3f8] sm:$0xff]  ;;  %v7765_v42 = vcombine.low %v185_v29, %v189_v30  ;;  %v205_v47 = vld [vmem:[%s12396_s2 + $0x430] sm:$0xff] }
  0xcb   :  { %3297 = vmatprep.subr.bf16.mxu0 %v7670_v55  ;;  %3636 = vmatprep.subr.bf16.mxu1 %v7672_v56  ;;  %v7728_v55 = vcombine.high %v146_v50, %v150_v51  ;;  %v8803_v56 = vld [vmem:[%s12397_s0 + $0x104] ss:$24 sps:$4 sm:$0xff]  }
  0xcc   :  { %v202_v48 = vld [vmem:[%s12396_s2 + $0x418] sm:$0xff] }
  0xcd   :  { %2884 = vmatmul.mubr.bf16.gmra.mrb[4].mxu0 %v8793_v59  ;;  %3223 = vmatmul.mubr.bf16.gmra.mrb[4].mxu1 %v8793_v59  ;;  %v154_v59 = vld [vmem:[%s12396_s2 + $0x298] sm:$0xff] }
  0xce   :  { %3298 = vmatpush1.bf16.msra.mxu0 %v7669_v62  ;;  %3637 = vmatpush1.bf16.msra.mxu1 %v7671_v63  ;;  %v7727_v62 = vcombine.low %v146_v50, %v150_v51  ;;  %v7734_v63 = vcombine.high %v153_v57, %v157_v58  ;;  %v7775_v51 = vcombine.low %v194_v40, %v198_v41  ;;  %v210_v57 = vld [vmem:[%s12396_s2 + $0x458] sm:$0xff] }
  0xcf   :  { %3299 = vmatprep.subr.bf16.mxu0 %v7678_v0  ;;  %3638 = vmatprep.subr.bf16.mxu1 %v7680_v1  ;;  %v7736_v0 = vcombine.high %v154_v59, %v158_v60  ;;  %v161_v1 = vld [vmem:[%s12396_s2 + $0x2d0] sm:$0xff]  ;;  %v214_v58 = vld [vmem:[%s12396_s2 + $0x478] sm:$0xff] }
  0xd0   :  { %2893 = vmatprep.mubr.bf16.mxu0 %v8794_v2  ;;  %3232 = vmatprep.mubr.bf16.mxu1 %v8794_v2  ;;  %v165_v2 = vld [vmem:[%s12396_s2 + $0x2f0] sm:$0xff] }
  0xd1   :  { %v7741_v15 = vcombine.low %v161_v1, %v165_v2 }
  0xd2   :  { %3300 = vmatpush1.bf16.msra.mxu0 %v7677_v7  ;;  %3639 = vmatpush1.bf16.msra.mxu1 %v7679_v8  ;;  %v7735_v7 = vcombine.low %v154_v59, %v158_v60  ;;  %v7742_v8 = vcombine.high %v161_v1, %v165_v2  ;;  %v218_v1 = vld [vmem:[%s12396_s2 + $0x498] sm:$0xff] }
  0xd3   :  { %3301 = vmatprep.subr.bf16.mxu0 %v7686_v9  ;;  %3640 = vmatprep.subr.bf16.mxu1 %v7688_v10  ;;  %v7744_v9 = vcombine.high %v162_v4, %v166_v5  ;;  %v8806_v10 = vld [vmem:[%s12397_s0 + $0x134] ss:$24 sps:$4 sm:$0xff]   ;;  %v9197_v2 = vld [vmem:[%s12397_s0] ss:$24 sps:$4 sm:$0xff]  }
  0xd5   :  { %2894 = vmatmul.mubr.bf16.gmra.mrb[8].mxu0 %v8796_v13  ;;  %3233 = vmatmul.mubr.bf16.gmra.mrb[8].mxu1 %v8796_v13  ;;  %v170_v13 = vld [vmem:[%s12396_s2 + $0x318] sm:$0xff] }
  0xd6   :  { %3302 = vmatpush1.bf16.msra.mxu0 %v7685_v16  ;;  %3641 = vmatpush1.bf16.msra.mxu1 %v7687_v17  ;;  %v7743_v16 = vcombine.low %v162_v4, %v166_v5  ;;  %v7750_v17 = vcombine.high %v169_v11, %v173_v12  ;;  %v7791_v5 = vcombine.low %v210_v57, %v214_v58  ;;  %v226_v11 = vld [vmem:[%s12396_s2 + $0x4d8] sm:$0xff] }
  0xd7   :  { %3303 = vmatprep.subr.bf16.mxu0 %v7694_v18  ;;  %3642 = vmatprep.subr.bf16.mxu1 %v7696_v19  ;;  %v7752_v18 = vcombine.high %v170_v13, %v174_v14  ;;  %v177_v19 = vld [vmem:[%s12396_s2 + $0x350] sm:$0xff]  ;;  %v230_v12 = vld [vmem:[%s12396_s2 + $0x4f8] sm:$0xff] }
  0xd8   :  { %2903 = vmatprep.mubr.bf16.mxu0 %v8797_v20  ;;  %3242 = vmatprep.mubr.bf16.mxu1 %v8797_v20  ;;  %v181_v20 = vld [vmem:[%s12396_s2 + $0x370] sm:$0xff] }
  0xd9   :  { %v7757_v33 = vcombine.low %v177_v19, %v181_v20 }
  0xda   :  { %3304 = vmatpush1.bf16.msra.mxu0 %v7693_v25  ;;  %3643 = vmatpush1.bf16.msra.mxu1 %v7695_v26  ;;  %v7751_v25 = vcombine.low %v170_v13, %v174_v14  ;;  %v7758_v26 = vcombine.high %v177_v19, %v181_v20  ;;  %v9199_v19 = vld [vmem:[%s12397_s0 + $0x30] ss:$24 sps:$4 sm:$0xff]   ;;  %v234_v20 = vld [vmem:[%s12396_s2 + $0x518] sm:$0xff] }
  0xdb   :  { %3305 = vmatprep.subr.bf16.mxu0 %v7702_v27  ;;  %3644 = vmatprep.subr.bf16.mxu1 %v7704_v28  ;;  %v7760_v27 = vcombine.high %v178_v22, %v182_v23  ;;  %v8809_v28 = vld [vmem:[%s12397_s0 + $0x164] ss:$24 sps:$4 sm:$0xff]  }
  0xdd   :  { %2904 = vmatmul.mubr.bf16.gmra.mrb[12].mxu0 %v8799_v31  ;;  %3243 = vmatmul.mubr.bf16.gmra.mrb[12].mxu1 %v8799_v31  ;;  %v186_v31 = vld [vmem:[%s12396_s2 + $0x398] sm:$0xff] }
  0xde   :  { %3306 = vmatpush1.bf16.msra.mxu0 %v7701_v34  ;;  %3645 = vmatpush1.bf16.msra.mxu1 %v7703_v35  ;;  %v7759_v34 = vcombine.low %v178_v22, %v182_v23  ;;  %v7766_v35 = vcombine.high %v185_v29, %v189_v30  ;;  %v7807_v23 = vcombine.low %v226_v11, %v230_v12  ;;  %v246_v30 = vld [vmem:[%s12396_s2 + $0x578] sm:$0xff] }
  0xdf   :  { %3307 = vmatprep.subr.bf16.mxu0 %v7710_v36  ;;  %3646 = vmatprep.subr.bf16.mxu1 %v7712_v37  ;;  %v7768_v36 = vcombine.high %v186_v31, %v190_v32  ;;  %v193_v37 = vld [vmem:[%s12396_s2 + $0x3d0] sm:$0xff] }
  0xe0   :  { %2913 = vmatprep.mubr.bf16.mxu0 %v8800_v38  ;;  %3252 = vmatprep.mubr.bf16.mxu1 %v8800_v38  ;;  %v197_v38 = vld [vmem:[%s12396_s2 + $0x3f0] sm:$0xff] }
  0xe1   :  { %v7773_v50 = vcombine.low %v193_v37, %v197_v38 }
  0xe2   :  { %3308 = vmatpush1.bf16.msra.mxu0 %v7709_v43  ;;  %3647 = vmatpush1.bf16.msra.mxu1 %v7711_v44  ;;  %v7767_v43 = vcombine.low %v186_v31, %v190_v32  ;;  %v7774_v44 = vcombine.high %v193_v37, %v197_v38  ;;  %v9201_v37 = vld [vmem:[%s12397_s0 + $0x60] ss:$24 sps:$4 sm:$0xff]  }
  0xe3   :  { %3309 = vmatprep.subr.bf16.mxu0 %v7718_v45  ;;  %3648 = vmatprep.subr.bf16.mxu1 %v7720_v46  ;;  %v7776_v45 = vcombine.high %v194_v40, %v198_v41  ;;  %v201_v46 = vld [vmem:[%s12396_s2 + $0x410] sm:$0xff]  ;;  %v250_v38 = vld [vmem:[%s12396_s2 + $0x598] sm:$0xff] }
  0xe4   :  { %v7781_v59 = vcombine.low %v201_v46, %v205_v47 }
  0xe5   :  { %2914 = vmatmul.mubr.bf16.gmra.mrb[16].mxu0 %v8802_v49  ;;  %3253 = vmatmul.mubr.bf16.gmra.mrb[16].mxu1 %v8802_v49  ;;  %v206_v49 = vld [vmem:[%s12396_s2 + $0x438] sm:$0xff] }
  0xe6   :  { %3310 = vmatpush1.bf16.msra.mxu0 %v7717_v52  ;;  %3649 = vmatpush1.bf16.msra.mxu1 %v7719_v53  ;;  %v7782_v52 = vcombine.high %v201_v46, %v205_v47  ;;  %v9196_v53 = vld [vmem:[%s12397_s0 + $0x4] ss:$24 sps:$4 sm:$0xff]   ;;  %v7783_v60 = vcombine.low %v202_v48, %v206_v49  ;;  %v261_v46 = vld [vmem:[%s12396_s2 + $0x5f0] sm:$0xff] }
  0xe7   :  { %3311 = vmatprep.subr.bf16.mxu0 %v7726_v54  ;;  %3650 = vmatprep.subr.bf16.mxu1 %v7728_v55  ;;  %v7784_v54 = vcombine.high %v202_v48, %v206_v49  ;;  %v209_v55 = vld [vmem:[%s12396_s2 + $0x450] sm:$0xff]  ;;  %v258_v47 = vld [vmem:[%s12396_s2 + $0x5d8] sm:$0xff] }
  0xe8   :  { %2923 = vmatprep.mubr.bf16.mxu0 %v8803_v56  ;;  %3262 = vmatprep.mubr.bf16.mxu1 %v8803_v56  ;;  %v213_v56 = vld [vmem:[%s12396_s2 + $0x470] sm:$0xff]  ;;  %v262_v48 = vld [vmem:[%s12396_s2 + $0x5f8] sm:$0xff] }
  0xe9   :  { %v7789_v4 = vcombine.low %v209_v55, %v213_v56 }
  0xea   :  { %3312 = vmatpush1.bf16.msra.mxu0 %v7725_v61  ;;  %3651 = vmatpush1.bf16.msra.mxu1 %v7727_v62  ;;  %v7790_v61 = vcombine.high %v209_v55, %v213_v56  ;;  %v217_v62 = vld [vmem:[%s12396_s2 + $0x490] sm:$0xff]  ;;  %v266_v56 = vld [vmem:[%s12396_s2 + $0x618] sm:$0xff] }
  0xeb   :  { %3313 = vmatprep.subr.bf16.mxu0 %v7734_v63  ;;  %3652 = vmatprep.subr.bf16.mxu1 %v7736_v0  ;;  %v221_v63 = vld [vmem:[%s12396_s2 + $0x4b0] sm:$0xff]  ;;  %v7792_v0 = vcombine.high %v210_v57, %v214_v58  ;;  %v270_v57 = vld [vmem:[%s12396_s2 + $0x638] sm:$0xff] }
  0xec   :  { %v7797_v13 = vcombine.low %v217_v62, %v221_v63  ;;  %v9203_v55 = vld [vmem:[%s12397_s0 + $0x90] ss:$24 sps:$4 sm:$0xff]  }
  0xed   :  { %2924 = vmatmul.mubr.bf16.gmra.mrb[20].mxu0 %v8805_v3  ;;  %3263 = vmatmul.mubr.bf16.gmra.mrb[20].mxu1 %v8805_v3  ;;  %v222_v3 = vld [vmem:[%s12396_s2 + $0x4b8] sm:$0xff] }
  0xee   :  { %3314 = vmatpush1.bf16.msra.mxu0 %v7733_v6  ;;  %3653 = vmatpush1.bf16.msra.mxu1 %v7735_v7  ;;  %v7798_v6 = vcombine.high %v217_v62, %v221_v63  ;;  %v225_v7 = vld [vmem:[%s12396_s2 + $0x4d0] sm:$0xff]  ;;  %v7799_v14 = vcombine.low %v218_v1, %v222_v3  ;;  %v7848_v62 = vcombine.high %v266_v56, %v270_v57 }
  0xef   :  { %3315 = vmatprep.subr.bf16.mxu0 %v7742_v8  ;;  %3654 = vmatprep.subr.bf16.mxu1 %v7744_v9  ;;  %v229_v8 = vld [vmem:[%s12396_s2 + $0x4f0] sm:$0xff] }
  0xf0   :  { %2933 = vmatprep.mubr.bf16.mxu0 %v8806_v10  ;;  %3272 = vmatprep.mubr.bf16.mxu1 %v8806_v10  ;;  %v9198_v9 = vld [vmem:[%s12397_s0 + $0x34] ss:$24 sps:$4 sm:$0xff]   ;;  %v7800_v10 = vcombine.high %v218_v1, %v222_v3  ;;  %v7805_v22 = vcombine.low %v225_v7, %v229_v8  ;;  %v274_v1 = vld [vmem:[%s12396_s2 + $0x658] sm:$0xff] }
  0xf1   :  { %v273_v63 = vld [vmem:[%s12396_s2 + $0x650] sm:$0xff] }
  0xf2   :  { %3316 = vmatpush1.bf16.msra.mxu0 %v7741_v15  ;;  %3655 = vmatpush1.bf16.msra.mxu1 %v7743_v16  ;;  %v7806_v15 = vcombine.high %v225_v7, %v229_v8  ;;  %v7808_v16 = vcombine.high %v226_v11, %v230_v12  ;;  %v281_v7 = vld [vmem:[%s12396_s2 + $0x690] sm:$0xff]  ;;  %v286_v11 = vld [vmem:[%s12396_s2 + $0x6b8] sm:$0xff] }
  0xf3   :  { %3317 = vmatprep.subr.bf16.mxu0 %v7750_v17  ;;  %3656 = vmatprep.subr.bf16.mxu1 %v7752_v18  ;;  %v233_v17 = vld [vmem:[%s12396_s2 + $0x510] sm:$0xff] }
  0xf4   :  { %v237_v18 = vld [vmem:[%s12396_s2 + $0x530] sm:$0xff] }
  0xf5   :  { %2934 = vmatmul.mubr.bf16.gmra.mrb[24].mxu0 %v8808_v21  ;;  %3273 = vmatmul.mubr.bf16.gmra.mrb[24].mxu1 %v8808_v21  ;;  %v238_v21 = vld [vmem:[%s12396_s2 + $0x538] sm:$0xff]  ;;  %v7813_v31 = vcombine.low %v233_v17, %v237_v18  ;;  %v285_v8 = vld [vmem:[%s12396_s2 + $0x6b0] sm:$0xff] }
  0xf6   :  { %3318 = vmatpush1.bf16.msra.mxu0 %v7749_v24  ;;  %3657 = vmatpush1.bf16.msra.mxu1 %v7751_v25  ;;  %v7814_v24 = vcombine.high %v233_v17, %v237_v18  ;;  %v241_v25 = vld [vmem:[%s12396_s2 + $0x550] sm:$0xff]  ;;  %v7816_v29 = vcombine.high %v234_v20, %v238_v21  ;;  %v7815_v32 = vcombine.low %v234_v20, %v238_v21  ;;  %v294_v20 = vld [vmem:[%s12396_s2 + $0x6f8] sm:$0xff] }
  0xf7   :  { %3319 = vmatprep.subr.bf16.mxu0 %v7758_v26  ;;  %3658 = vmatprep.subr.bf16.mxu1 %v7760_v27  ;;  %v245_v26 = vld [vmem:[%s12396_s2 + $0x570] sm:$0xff]  ;;  %v242_v27 = vld [vmem:[%s12396_s2 + $0x558] sm:$0xff]  ;;  %v7861_v21 = vcombine.low %v281_v7, %v285_v8 }
  0xf8   :  { %2943 = vmatprep.mubr.bf16.mxu0 %v8809_v28  ;;  %3282 = vmatprep.mubr.bf16.mxu1 %v8809_v28  ;;  %v9200_v28 = vld [vmem:[%s12397_s0 + $0x64] ss:$24 sps:$4 sm:$0xff]   ;;  %v7821_v40 = vcombine.low %v241_v25, %v245_v26  ;;  %v7823_v41 = vcombine.low %v242_v27, %v246_v30  ;;  %v289_v17 = vld [vmem:[%s12396_s2 + $0x6d0] sm:$0xff] }
  0xf9   :  { %v293_v18 = vld [vmem:[%s12396_s2 + $0x6f0] sm:$0xff] }
  0xfa   :  { %3320 = vmatpush1.bf16.msra.mxu0 %v7757_v33  ;;  %3659 = vmatpush1.bf16.msra.mxu1 %v7759_v34  ;;  %v7822_v33 = vcombine.high %v241_v25, %v245_v26  ;;  %v7824_v34 = vcombine.high %v242_v27, %v246_v30  ;;  %v297_v25 = vld [vmem:[%s12396_s2 + $0x710] sm:$0xff]  ;;  %v7869_v30 = vcombine.low %v289_v17, %v293_v18 }
  0xfb   :  { %3321 = vmatprep.subr.bf16.mxu0 %v7766_v35  ;;  %3660 = vmatprep.subr.bf16.mxu1 %v7768_v36  ;;  %v249_v35 = vld [vmem:[%s12396_s2 + $0x590] sm:$0xff] }
  0xfc   :  { %v253_v36 = vld [vmem:[%s12396_s2 + $0x5b0] sm:$0xff] }
  0xfd   :  { %2944 = vmatmul.mubr.bf16.gmra.mrb[28].mxu0 %v8811_v39  ;;  %3283 = vmatmul.mubr.bf16.gmra.mrb[28].mxu1 %v8811_v39  ;;  %v254_v39 = vld [vmem:[%s12396_s2 + $0x5b8] sm:$0xff]  ;;  %v7829_v49 = vcombine.low %v249_v35, %v253_v36  ;;  %v301_v26 = vld [vmem:[%s12396_s2 + $0x730] sm:$0xff] }
  0xfe   :  { %3322 = vmatpush1.bf16.msra.mxu0 %v7765_v42  ;;  %3661 = vmatpush1.bf16.msra.mxu1 %v7767_v43  ;;  %v7830_v42 = vcombine.high %v249_v35, %v253_v36  ;;  %v9202_v43 = vld [vmem:[%s12397_s0 + $0x94] ss:$24 sps:$4 sm:$0xff]   ;;  %v9207_v27 = vld [vmem:[%s12397_s0 + $0xf0] ss:$24 sps:$4 sm:$0xff]  }
  0xff   :  { %3323 = vmatprep.subr.bf16.mxu0 %v7774_v44  ;;  %3662 = vmatprep.subr.bf16.mxu1 %v7776_v45  ;;  %v7832_v44 = vcombine.high %v250_v38, %v254_v39  ;;  %v257_v45 = vld [vmem:[%s12396_s2 + $0x5d0] sm:$0xff] }
 0x100   :  { %3325 = vmatprep.mubr.bf16.mxu0 %v9196_v53  ;;  %3664 = vmatprep.mubr.bf16.mxu1 %v9196_v53  ;;  %v265_v53 = vld [vmem:[%s12396_s2 + $0x610] sm:$0xff]  ;;  %v7837_v58 = vcombine.low %v257_v45, %v261_v46 }
 0x101   :  { %v305_v35 = vld [vmem:[%s12396_s2 + $0x750] sm:$0xff] }
 0x102   :  { %3324 = vmatpush1.bf16.msra.mxu0 %v7773_v50  ;;  %3663 = vmatpush1.bf16.msra.mxu1 %v7775_v51  ;;  %v7831_v50 = vcombine.low %v250_v38, %v254_v39  ;;  %v7838_v51 = vcombine.high %v257_v45, %v261_v46  ;;  %v309_v36 = vld [vmem:[%s12396_s2 + $0x770] sm:$0xff]  ;;  %v310_v38 = vld [vmem:[%s12396_s2 + $0x778] sm:$0xff]  ;;  %v7877_v39 = vcombine.low %v297_v25, %v301_v26 }
 0x103   :  { %3406 = vmatprep.subr.bf16.mxu0 %v7782_v52  ;;  %3745 = vmatprep.subr.bf16.mxu1 %v7784_v54  ;;  %v7840_v52 = vcombine.high %v258_v47, %v262_v48  ;;  %v269_v54 = vld [vmem:[%s12396_s2 + $0x630] sm:$0xff]  ;;  %v9209_v45 = vld [vmem:[%s12397_s0 + $0x120] ss:$24 sps:$4 sm:$0xff]  }
 0x104   :  { %v7845_v3 = vcombine.low %v265_v53, %v269_v54  ;;  %v314_v46 = vld [vmem:[%s12396_s2 + $0x798] sm:$0xff] }
 0x105   :  { %3326 = vmatmul.mubr.bf16.vlgmr.msra.gmra.mrb[32].mxu0 %v9197_v2  ;;  %3665 = vmatmul.mubr.bf16.vlgmr.msra.gmra.mrb[32].mxu1 %v9197_v2  ;;  %v278_v2 = vld [vmem:[%s12396_s2 + $0x678] sm:$0xff] }
 0x106   :  { %3407 = vmatpush1.bf16.msra.mxu0 %v7781_v59  ;;  %3746 = vmatpush1.bf16.msra.mxu1 %v7783_v60  ;;  %v7839_v59 = vcombine.low %v258_v47, %v262_v48  ;;  %v7846_v60 = vcombine.high %v265_v53, %v269_v54  ;;  %v318_v47 = vld [vmem:[%s12396_s2 + $0x7b8] sm:$0xff]  ;;  %v7885_v48 = vcombine.low %v305_v35, %v309_v36  ;;  %v321_v53 = vld [vmem:[%s12396_s2 + $0x7d0] sm:$0xff] }
 0x107   :  { %3408 = vmatprep.subr.bf16.mxu0 %v7790_v61  ;;  %3747 = vmatprep.subr.bf16.mxu1 %v7792_v0  ;;  %v9204_v61 = vld [vmem:[%s12397_s0 + $0xc4] ss:$24 sps:$4 sm:$0xff]   ;;  %v277_v0 = vld [vmem:[%s12396_s2 + $0x670] sm:$0xff] }
 0x108   :  { %3335 = vmatprep.mubr.bf16.mxu0 %v9198_v9  ;;  %3674 = vmatprep.mubr.bf16.mxu1 %v9198_v9  ;;  %v9205_v9 = vld [vmem:[%s12397_s0 + $0xc0] ss:$24 sps:$4 sm:$0xff]   ;;  %v7853_v12 = vcombine.low %v273_v63, %v277_v0  ;;  %v325_v54 = vld [vmem:[%s12396_s2 + $0x7f0] sm:$0xff] }
 0x10a   :  { %3409 = vmatpush1.bf16.msra.mxu0 %v7789_v4  ;;  %3748 = vmatpush1.bf16.msra.mxu1 %v7791_v5  ;;  %v7847_v4 = vcombine.low %v266_v56, %v270_v57  ;;  %v7854_v5 = vcombine.high %v273_v63, %v277_v0  ;;  %v326_v56 = vld [vmem:[%s12396_s2 + $0x7f8] sm:$0xff]  ;;  %v9211_v63 = vld [vmem:[%s12397_s0 + $0x150] ss:$24 sps:$4 sm:$0xff]  }
 0x10b   :  { %3410 = vmatprep.subr.bf16.mxu0 %v7798_v6  ;;  %3749 = vmatprep.subr.bf16.mxu1 %v7800_v10  ;;  %v7856_v6 = vcombine.high %v274_v1, %v278_v2  ;;  %v282_v10 = vld [vmem:[%s12396_s2 + $0x698] sm:$0xff] }
 0x10c   :  { %v330_v0 = vld [vmem:[%s12396_s2 + $0x818] sm:$0xff] }
 0x10d   :  { %3336 = vmatmul.mubr.bf16.gmra.mrb[36].mxu0 %v9199_v19  ;;  %3675 = vmatmul.mubr.bf16.gmra.mrb[36].mxu1 %v9199_v19  ;;  %v290_v19 = vld [vmem:[%s12396_s2 + $0x6d8] sm:$0xff] }
 0x10e   :  { %3411 = vmatpush1.bf16.msra.mxu0 %v7797_v13  ;;  %3750 = vmatpush1.bf16.msra.mxu1 %v7799_v14  ;;  %v7855_v13 = vcombine.low %v274_v1, %v278_v2  ;;  %v7862_v14 = vcombine.high %v281_v7, %v285_v8  ;;  %v334_v1 = vld [vmem:[%s12396_s2 + $0x838] sm:$0xff]  ;;  %v7901_v2 = vcombine.low %v321_v53, %v325_v54  ;;  %v9212_v7 = vld [vmem:[%s12397_s0 + $0xc] ss:$24 sps:$4 sm:$0xff]  }
 0x10f   :  { %3412 = vmatprep.subr.bf16.mxu0 %v7806_v15  ;;  %3751 = vmatprep.subr.bf16.mxu1 %v7808_v16  ;;  %v9206_v15 = vld [vmem:[%s12397_s0 + $0xf4] ss:$24 sps:$4 sm:$0xff]   ;;  %v7864_v16 = vcombine.high %v282_v10, %v286_v11  ;;  %v7912_v8 = vcombine.high %v330_v0, %v334_v1 }
 0x110   :  { %3345 = vmatprep.mubr.bf16.mxu0 %v9200_v28  ;;  %3684 = vmatprep.mubr.bf16.mxu1 %v9200_v28  ;;  %v298_v28 = vld [vmem:[%s12396_s2 + $0x718] sm:$0xff] }
 0x112   :  { %3413 = vmatpush1.bf16.msra.mxu0 %v7805_v22  ;;  %3752 = vmatpush1.bf16.msra.mxu1 %v7807_v23  ;;  %v7863_v22 = vcombine.low %v282_v10, %v286_v11  ;;  %v7870_v23 = vcombine.high %v289_v17, %v293_v18  ;;  %v342_v10 = vld [vmem:[%s12396_s2 + $0x878] sm:$0xff]  ;;  %v9213_v17 = vld [vmem:[%s12397_s0 + $0x8] ss:$24 sps:$4 sm:$0xff]  }
 0x113   :  { %3414 = vmatprep.subr.bf16.mxu0 %v7814_v24  ;;  %3753 = vmatprep.subr.bf16.mxu1 %v7816_v29  ;;  %v7872_v24 = vcombine.high %v290_v19, %v294_v20  ;;  %v302_v29 = vld [vmem:[%s12396_s2 + $0x738] sm:$0xff] }
 0x114   :  { %v346_v18 = vld [vmem:[%s12396_s2 + $0x898] sm:$0xff] }
 0x115   :  { %3346 = vmatmul.mubr.bf16.gmra.mrb[40].mxu0 %v9201_v37  ;;  %3685 = vmatmul.mubr.bf16.gmra.mrb[40].mxu1 %v9201_v37  ;;  %v306_v37 = vld [vmem:[%s12396_s2 + $0x758] sm:$0xff] }
 0x116   :  { %3415 = vmatpush1.bf16.msra.mxu0 %v7813_v31  ;;  %3754 = vmatpush1.bf16.msra.mxu1 %v7815_v32  ;;  %v7871_v31 = vcombine.low %v290_v19, %v294_v20  ;;  %v7878_v32 = vcombine.high %v297_v25, %v301_v26  ;;  %v350_v19 = vld [vmem:[%s12396_s2 + $0x8b8] sm:$0xff] }
 0x117   :  { %3416 = vmatprep.subr.bf16.mxu0 %v7822_v33  ;;  %3755 = vmatprep.subr.bf16.mxu1 %v7824_v34  ;;  %v9208_v33 = vld [vmem:[%s12397_s0 + $0x124] ss:$24 sps:$4 sm:$0xff]   ;;  %v7880_v34 = vcombine.high %v298_v28, %v302_v29  ;;  %v7928_v26 = vcombine.high %v346_v18, %v350_v19 }
 0x118   :  { %3355 = vmatprep.mubr.bf16.mxu0 %v9202_v43  ;;  %3694 = vmatprep.mubr.bf16.mxu1 %v9202_v43  ;;  %v313_v43 = vld [vmem:[%s12396_s2 + $0x790] sm:$0xff] }
 0x119   :  { %v9214_v25 = vld [vmem:[%s12397_s0 + $0x3c] ss:$24 sps:$4 sm:$0xff]  }
 0x11a   :  { %3417 = vmatpush1.bf16.msra.mxu0 %v7821_v40  ;;  %3756 = vmatpush1.bf16.msra.mxu1 %v7823_v41  ;;  %v7879_v40 = vcombine.low %v298_v28, %v302_v29  ;;  %v7886_v41 = vcombine.high %v305_v35, %v309_v36  ;;  %v358_v28 = vld [vmem:[%s12396_s2 + $0x8f8] sm:$0xff] }
 0x11b   :  { %3418 = vmatprep.subr.bf16.mxu0 %v7830_v42  ;;  %3757 = vmatprep.subr.bf16.mxu1 %v7832_v44  ;;  %v7888_v42 = vcombine.high %v306_v37, %v310_v38  ;;  %v317_v44 = vld [vmem:[%s12396_s2 + $0x7b0] sm:$0xff]  ;;  %v362_v36 = vld [vmem:[%s12396_s2 + $0x918] sm:$0xff] }
 0x11c   :  { %v7893_v57 = vcombine.low %v313_v43, %v317_v44  ;;  %v9215_v35 = vld [vmem:[%s12397_s0 + $0x38] ss:$24 sps:$4 sm:$0xff]  }
 0x11d   :  { %3356 = vmatmul.mubr.bf16.gmra.mrb[44].mxu0 %v9203_v55  ;;  %3695 = vmatmul.mubr.bf16.gmra.mrb[44].mxu1 %v9203_v55  ;;  %v322_v55 = vld [vmem:[%s12396_s2 + $0x7d8] sm:$0xff] }
 0x11e   :  { %3419 = vmatpush1.bf16.msra.mxu0 %v7829_v49  ;;  %3758 = vmatpush1.bf16.msra.mxu1 %v7831_v50  ;;  %v7887_v49 = vcombine.low %v306_v37, %v310_v38  ;;  %v7894_v50 = vcombine.high %v313_v43, %v317_v44  ;;  %v366_v37 = vld [vmem:[%s12396_s2 + $0x938] sm:$0xff]  ;;  %v9216_v43 = vld [vmem:[%s12397_s0 + $0x6c] ss:$24 sps:$4 sm:$0xff]  }
 0x11f   :  { %3420 = vmatprep.subr.bf16.mxu0 %v7838_v51  ;;  %3759 = vmatprep.subr.bf16.mxu1 %v7840_v52  ;;  %v9210_v51 = vld [vmem:[%s12397_s0 + $0x154] ss:$24 sps:$4 sm:$0xff]   ;;  %v7896_v52 = vcombine.high %v314_v46, %v318_v47  ;;  %v7944_v44 = vcombine.high %v362_v36, %v366_v37 }
 0x120   :  { %3365 = vmatprep.mubr.bf16.mxu0 %v9204_v61  ;;  %3704 = vmatprep.mubr.bf16.mxu1 %v9204_v61  ;;  %v329_v61 = vld [vmem:[%s12396_s2 + $0x810] sm:$0xff] }
 0x122   :  { %3421 = vmatpush1.bf16.msra.mxu0 %v7837_v58  ;;  %3760 = vmatpush1.bf16.msra.mxu1 %v7839_v59  ;;  %v7895_v58 = vcombine.low %v314_v46, %v318_v47  ;;  %v7902_v59 = vcombine.high %v321_v53, %v325_v54  ;;  %v374_v46 = vld [vmem:[%s12396_s2 + $0x978] sm:$0xff]  ;;  %v9217_v53 = vld [vmem:[%s12397_s0 + $0x68] ss:$24 sps:$4 sm:$0xff]  }
 0x123   :  { %3422 = vmatprep.subr.bf16.mxu0 %v7846_v60  ;;  %3761 = vmatprep.subr.bf16.mxu1 %v7848_v62  ;;  %v7904_v60 = vcombine.high %v322_v55, %v326_v56  ;;  %v333_v62 = vld [vmem:[%s12396_s2 + $0x830] sm:$0xff]  ;;  %v378_v54 = vld [vmem:[%s12396_s2 + $0x998] sm:$0xff] }
 0x124   :  { %v7909_v11 = vcombine.low %v329_v61, %v333_v62 }
 0x125   :  { %3366 = vmatmul.mubr.bf16.gmra.mrb[48].mxu0 %v9205_v9  ;;  %3705 = vmatmul.mubr.bf16.gmra.mrb[48].mxu1 %v9205_v9  ;;  %v338_v9 = vld [vmem:[%s12396_s2 + $0x858] sm:$0xff] }
 0x126   :  { %3423 = vmatpush1.bf16.msra.mxu0 %v7845_v3  ;;  %3762 = vmatpush1.bf16.msra.mxu1 %v7847_v4  ;;  %v337_v3 = vld [vmem:[%s12396_s2 + $0x850] sm:$0xff] }
 0x127   :  { %3424 = vmatprep.subr.bf16.mxu0 %v7854_v5  ;;  %3763 = vmatprep.subr.bf16.mxu1 %v7856_v6  ;;  %v341_v4 = vld [vmem:[%s12396_s2 + $0x870] sm:$0xff]  ;;  %v7903_v5 = vcombine.low %v322_v55, %v326_v56  ;;  %v7910_v6 = vcombine.high %v329_v61, %v333_v62  ;;  %v382_v55 = vld [vmem:[%s12396_s2 + $0x9b8] sm:$0xff] }
 0x128   :  { %3375 = vmatprep.mubr.bf16.mxu0 %v9206_v15  ;;  %3714 = vmatprep.mubr.bf16.mxu1 %v9206_v15  ;;  %v7920_v15 = vcombine.high %v338_v9, %v342_v10  ;;  %v7917_v20 = vcombine.low %v337_v3, %v341_v4  ;;  %v9218_v61 = vld [vmem:[%s12397_s0 + $0x9c] ss:$24 sps:$4 sm:$0xff]   ;;  %v7960_v62 = vcombine.high %v378_v54, %v382_v55 }
 0x12a   :  { %3425 = vmatpush1.bf16.msra.mxu0 %v7853_v12  ;;  %3764 = vmatpush1.bf16.msra.mxu1 %v7855_v13  ;;  %v7911_v12 = vcombine.low %v330_v0, %v334_v1  ;;  %v7918_v13 = vcombine.high %v337_v3, %v341_v4  ;;  %v390_v0 = vld [vmem:[%s12396_s2 + $0x9f8] sm:$0xff]  ;;  %v397_v3 = vld [vmem:[%s12396_s2 + $0xa30] sm:$0xff]  ;;  %v7959_v4 = vcombine.low %v378_v54, %v382_v55 }
 0x12b   :  { %3426 = vmatprep.subr.bf16.mxu0 %v7862_v14  ;;  %3765 = vmatprep.subr.bf16.mxu1 %v7864_v16  ;;  %v345_v14 = vld [vmem:[%s12396_s2 + $0x890] sm:$0xff]  ;;  %v438_v54 = vld [vmem:[%s12396_s2 + $0xb78] sm:$0xff] }
 0x12c   :  { %v349_v16 = vld [vmem:[%s12396_s2 + $0x8b0] sm:$0xff] }
 0x12d   :  { %3376 = vmatmul.mubr.bf16.gmra.mrb[52].mxu0 %v9207_v27  ;;  %3715 = vmatmul.mubr.bf16.gmra.mrb[52].mxu1 %v9207_v27  ;;  %v354_v27 = vld [vmem:[%s12396_s2 + $0x8d8] sm:$0xff]  ;;  %v7925_v29 = vcombine.low %v345_v14, %v349_v16 }
 0x12e   :  { %3427 = vmatpush1.bf16.msra.mxu0 %v7861_v21  ;;  %3766 = vmatpush1.bf16.msra.mxu1 %v7863_v22  ;;  %v353_v21 = vld [vmem:[%s12396_s2 + $0x8d0] sm:$0xff] }
 0x12f   :  { %3428 = vmatprep.subr.bf16.mxu0 %v7870_v23  ;;  %3767 = vmatprep.subr.bf16.mxu1 %v7872_v24  ;;  %v357_v22 = vld [vmem:[%s12396_s2 + $0x8f0] sm:$0xff]  ;;  %v7919_v23 = vcombine.low %v338_v9, %v342_v10  ;;  %v7926_v24 = vcombine.high %v345_v14, %v349_v16  ;;  %v398_v9 = vld [vmem:[%s12396_s2 + $0xa38] sm:$0xff] }
 0x130   :  { %3385 = vmatprep.mubr.bf16.mxu0 %v9208_v33  ;;  %3724 = vmatprep.mubr.bf16.mxu1 %v9208_v33  ;;  %v7936_v33 = vcombine.high %v354_v27, %v358_v28  ;;  %v7933_v38 = vcombine.low %v353_v21, %v357_v22  ;;  %v405_v16 = vld [vmem:[%s12396_s2 + $0xa70] sm:$0xff] }
 0x132   :  { %3429 = vmatpush1.bf16.msra.mxu0 %v7869_v30  ;;  %3768 = vmatpush1.bf16.msra.mxu1 %v7871_v31  ;;  %v7927_v30 = vcombine.low %v346_v18, %v350_v19  ;;  %v7934_v31 = vcombine.high %v353_v21, %v357_v22  ;;  %v406_v18 = vld [vmem:[%s12396_s2 + $0xa78] sm:$0xff]  ;;  %v413_v21 = vld [vmem:[%s12396_s2 + $0xab0] sm:$0xff] }
 0x133   :  { %3430 = vmatprep.subr.bf16.mxu0 %v7878_v32  ;;  %3769 = vmatprep.subr.bf16.mxu1 %v7880_v34  ;;  %v361_v32 = vld [vmem:[%s12396_s2 + $0x910] sm:$0xff] }
 0x134   :  { %v365_v34 = vld [vmem:[%s12396_s2 + $0x930] sm:$0xff] }
 0x135   :  { %3386 = vmatmul.mubr.bf16.gmra.mrb[56].mxu0 %v9209_v45  ;;  %3725 = vmatmul.mubr.bf16.gmra.mrb[56].mxu1 %v9209_v45  ;;  %v370_v45 = vld [vmem:[%s12396_s2 + $0x958] sm:$0xff]  ;;  %v7941_v47 = vcombine.low %v361_v32, %v365_v34 }
 0x136   :  { %3431 = vmatpush1.bf16.msra.mxu0 %v7877_v39  ;;  %3770 = vmatpush1.bf16.msra.mxu1 %v7879_v40  ;;  %v369_v39 = vld [vmem:[%s12396_s2 + $0x950] sm:$0xff] }
 0x137   :  { %3432 = vmatprep.subr.bf16.mxu0 %v7886_v41  ;;  %3771 = vmatprep.subr.bf16.mxu1 %v7888_v42  ;;  %v373_v40 = vld [vmem:[%s12396_s2 + $0x970] sm:$0xff]  ;;  %v7935_v41 = vcombine.low %v354_v27, %v358_v28  ;;  %v7942_v42 = vcombine.high %v361_v32, %v365_v34  ;;  %v414_v27 = vld [vmem:[%s12396_s2 + $0xab8] sm:$0xff] }
 0x138   :  { %3395 = vmatprep.mubr.bf16.mxu0 %v9210_v51  ;;  %3734 = vmatprep.mubr.bf16.mxu1 %v9210_v51  ;;  %v7952_v51 = vcombine.high %v370_v45, %v374_v46  ;;  %v7949_v56 = vcombine.low %v369_v39, %v373_v40  ;;  %v421_v34 = vld [vmem:[%s12396_s2 + $0xaf0] sm:$0xff] }
 0x13a   :  { %3433 = vmatpush1.bf16.msra.mxu0 %v7885_v48  ;;  %3772 = vmatpush1.bf16.msra.mxu1 %v7887_v49  ;;  %v7943_v48 = vcombine.low %v362_v36, %v366_v37  ;;  %v7950_v49 = vcombine.high %v369_v39, %v373_v40  ;;  %v422_v36 = vld [vmem:[%s12396_s2 + $0xaf8] sm:$0xff]  ;;  %v429_v39 = vld [vmem:[%s12396_s2 + $0xb30] sm:$0xff] }
 0x13b   :  { %3434 = vmatprep.subr.bf16.mxu0 %v7894_v50  ;;  %3773 = vmatprep.subr.bf16.mxu1 %v7896_v52  ;;  %v377_v50 = vld [vmem:[%s12396_s2 + $0x990] sm:$0xff] }
 0x13c   :  { %v381_v52 = vld [vmem:[%s12396_s2 + $0x9b0] sm:$0xff] }
 0x13d   :  { %3396 = vmatmul.mubr.bf16.gmra.mrb[60].mxu0 %v9211_v63  ;;  %3735 = vmatmul.mubr.bf16.gmra.mrb[60].mxu1 %v9211_v63  ;;  %v386_v63 = vld [vmem:[%s12396_s2 + $0x9d8] sm:$0xff]  ;;  %v7957_v1 = vcombine.low %v377_v50, %v381_v52 }
 0x13e   :  { %3435 = vmatpush1.bf16.msra.mxu0 %v7893_v57  ;;  %3774 = vmatpush1.bf16.msra.mxu1 %v7895_v58  ;;  %v385_v57 = vld [vmem:[%s12396_s2 + $0x9d0] sm:$0xff] }
 0x13f   :  { %3436 = vmatprep.subr.bf16.mxu0 %v7902_v59  ;;  %3775 = vmatprep.subr.bf16.mxu1 %v7904_v60  ;;  %v389_v58 = vld [vmem:[%s12396_s2 + $0x9f0] sm:$0xff]  ;;  %v7951_v59 = vcombine.low %v370_v45, %v374_v46  ;;  %v7958_v60 = vcombine.high %v377_v50, %v381_v52  ;;  %v430_v45 = vld [vmem:[%s12396_s2 + $0xb38] sm:$0xff] }
 0x140   :  { %3438 = vmatprep.mubr.bf16.mxu0 %v9212_v7  ;;  %3777 = vmatprep.mubr.bf16.mxu1 %v9212_v7  ;;  %v9219_v7 = vld [vmem:[%s12397_s0 + $0x98] ss:$24 sps:$4 sm:$0xff]   ;;  %v7965_v10 = vcombine.low %v385_v57, %v389_v58 }
 0x141   :  { %v437_v52 = vld [vmem:[%s12396_s2 + $0xb70] sm:$0xff] }
 0x142   :  { %3437 = vmatpush1.bf16.msra.mxu0 %v7901_v2  ;;  %3776 = vmatpush1.bf16.msra.mxu1 %v7903_v5  ;;  %v393_v2 = vld [vmem:[%s12396_s2 + $0xa10] sm:$0xff]  ;;  %v7966_v5 = vcombine.high %v385_v57, %v389_v58 }
 0x143   :  { %3519 = vmatprep.subr.bf16.mxu0 %v7910_v6  ;;  %3858 = vmatprep.subr.bf16.mxu1 %v7912_v8  ;;  %v7968_v6 = vcombine.high %v386_v63, %v390_v0  ;;  %v394_v8 = vld [vmem:[%s12396_s2 + $0xa18] sm:$0xff]  ;;  %v7973_v19 = vcombine.low %v393_v2, %v397_v3  ;;  %v445_v57 = vld [vmem:[%s12396_s2 + $0xbb0] sm:$0xff] }
 0x144   :  { %v7976_v14 = vcombine.high %v394_v8, %v398_v9  ;;  %v7975_v22 = vcombine.low %v394_v8, %v398_v9  ;;  %v454_v8 = vld [vmem:[%s12396_s2 + $0xbf8] sm:$0xff] }
 0x145   :  { %3439 = vmatmul.mubr.bf16.vlgmr.msra.gmra.mrb[32].mxu0 %v9213_v17  ;;  %3778 = vmatmul.mubr.bf16.vlgmr.msra.gmra.mrb[32].mxu1 %v9213_v17  ;;  %v402_v17 = vld [vmem:[%s12396_s2 + $0xa58] sm:$0xff] }
 0x146   :  { %3520 = vmatpush1.bf16.msra.mxu0 %v7909_v11  ;;  %3859 = vmatpush1.bf16.msra.mxu1 %v7911_v12  ;;  %v7967_v11 = vcombine.low %v386_v63, %v390_v0  ;;  %v7974_v12 = vcombine.high %v393_v2, %v397_v3  ;;  %v446_v63 = vld [vmem:[%s12396_s2 + $0xbb8] sm:$0xff] }
 0x147   :  { %3521 = vmatprep.subr.bf16.mxu0 %v7918_v13  ;;  %3860 = vmatprep.subr.bf16.mxu1 %v7920_v15  ;;  %v9220_v13 = vld [vmem:[%s12397_s0 + $0xcc] ss:$24 sps:$4 sm:$0xff]   ;;  %v401_v15 = vld [vmem:[%s12396_s2 + $0xa50] sm:$0xff] }
 0x148   :  { %3448 = vmatprep.mubr.bf16.mxu0 %v9214_v25  ;;  %3787 = vmatprep.mubr.bf16.mxu1 %v9214_v25  ;;  %v9221_v25 = vld [vmem:[%s12397_s0 + $0xc8] ss:$24 sps:$4 sm:$0xff]   ;;  %v7981_v28 = vcombine.low %v401_v15, %v405_v16  ;;  %v9226_v3 = vld [vmem:[%s12397_s0 + $0x15c] ss:$24 sps:$4 sm:$0xff]  }
 0x14a   :  { %3522 = vmatpush1.bf16.msra.mxu0 %v7917_v20  ;;  %3861 = vmatpush1.bf16.msra.mxu1 %v7919_v23  ;;  %v409_v20 = vld [vmem:[%s12396_s2 + $0xa90] sm:$0xff]  ;;  %v7982_v23 = vcombine.high %v401_v15, %v405_v16 }
 0x14b   :  { %3523 = vmatprep.subr.bf16.mxu0 %v7926_v24  ;;  %3862 = vmatprep.subr.bf16.mxu1 %v7928_v26  ;;  %v7984_v24 = vcombine.high %v402_v17, %v406_v18  ;;  %v410_v26 = vld [vmem:[%s12396_s2 + $0xa98] sm:$0xff]  ;;  %v7989_v37 = vcombine.low %v409_v20, %v413_v21  ;;  %v8814_v15 = vld [vmem:[%s12398_s3 + $0x4] ss:$16 sps:$4 sm:$0xff]  }
 0x14c   :  { %v7992_v32 = vcombine.high %v410_v26, %v414_v27  ;;  %v7991_v40 = vcombine.low %v410_v26, %v414_v27  ;;  %v8826_v26 = vld [vmem:[%s12398_s3 + $0x44] ss:$16 sps:$4 sm:$0xff]   ;;  %v8829_v27 = vld [vmem:[%s12398_s3 + $0x4c] ss:$16 sps:$4 sm:$0xff]  }
 0x14d   :  { %3449 = vmatmul.mubr.bf16.gmra.mrb[36].mxu0 %v9215_v35  ;;  %3788 = vmatmul.mubr.bf16.gmra.mrb[36].mxu1 %v9215_v35  ;;  %v418_v35 = vld [vmem:[%s12396_s2 + $0xad8] sm:$0xff] }
 0x14e   :  { %3524 = vmatpush1.bf16.msra.mxu0 %v7925_v29  ;;  %3863 = vmatpush1.bf16.msra.mxu1 %v7927_v30  ;;  %v7983_v29 = vcombine.low %v402_v17, %v406_v18  ;;  %v7990_v30 = vcombine.high %v409_v20, %v413_v21  ;;  %v9228_v17 = vld [vmem:[%s12397_s0 + $0x14] ss:$24 sps:$4 sm:$0xff]   ;;  %v8812_v18 = vld [vmem:[%s12398_s3] ss:$16 sps:$4 sm:$0xff]   ;;  %v8815_v20 = vld [vmem:[%s12398_s3 + $0x8] ss:$16 sps:$4 sm:$0xff]  }
 0x14f   :  { %3525 = vmatprep.subr.bf16.mxu0 %v7934_v31  ;;  %3864 = vmatprep.subr.bf16.mxu1 %v7936_v33  ;;  %v9222_v31 = vld [vmem:[%s12397_s0 + $0xfc] ss:$24 sps:$4 sm:$0xff]  }
 0x150   :  { %3458 = vmatprep.mubr.bf16.mxu0 %v9216_v43  ;;  %3797 = vmatprep.mubr.bf16.mxu1 %v9216_v43  ;;  %v417_v33 = vld [vmem:[%s12396_s2 + $0xad0] sm:$0xff] }
 0x151   :  { %v9223_v43 = vld [vmem:[%s12397_s0 + $0xf8] ss:$24 sps:$4 sm:$0xff]   ;;  %v7997_v46 = vcombine.low %v417_v33, %v421_v34  ;;  %v8820_v21 = vld [vmem:[%s12398_s3 + $0x24] ss:$16 sps:$4 sm:$0xff]  }
 0x152   :  { %3526 = vmatpush1.bf16.msra.mxu0 %v7933_v38  ;;  %3865 = vmatpush1.bf16.msra.mxu1 %v7935_v41  ;;  %v425_v38 = vld [vmem:[%s12396_s2 + $0xb10] sm:$0xff]  ;;  %v7998_v41 = vcombine.high %v417_v33, %v421_v34  ;;  %v9231_v33 = vld [vmem:[%s12397_s0 + $0x40] ss:$24 sps:$4 sm:$0xff]  }
 0x153   :  { %3527 = vmatprep.subr.bf16.mxu0 %v7942_v42  ;;  %3866 = vmatprep.subr.bf16.mxu1 %v7944_v44  ;;  %v8000_v42 = vcombine.high %v418_v35, %v422_v36  ;;  %v426_v44 = vld [vmem:[%s12396_s2 + $0xb18] sm:$0xff]  ;;  %v8005_v55 = vcombine.low %v425_v38, %v429_v39  ;;  %v8830_v34 = vld [vmem:[%s12398_s3 + $0x60] ss:$16 sps:$4 sm:$0xff]  }
 0x154   :  { %v8008_v50 = vcombine.high %v426_v44, %v430_v45  ;;  %v8007_v58 = vcombine.low %v426_v44, %v430_v45  ;;  %v3971_v44 = vld [vmem:[%s12399_s1] sm:$0xff] }
 0x155   :  { %3459 = vmatmul.mubr.bf16.gmra.mrb[40].mxu0 %v9217_v53  ;;  %3798 = vmatmul.mubr.bf16.gmra.mrb[40].mxu1 %v9217_v53  ;;  %v434_v53 = vld [vmem:[%s12396_s2 + $0xb58] sm:$0xff]  ;;  %v8842_v45 = vld [vmem:[%s12398_s3 + $0xa0] ss:$16 sps:$4 sm:$0xff]  }
 0x156   :  { %3528 = vmatpush1.bf16.msra.mxu0 %v7941_v47  ;;  %3867 = vmatpush1.bf16.msra.mxu1 %v7943_v48  ;;  %v7999_v47 = vcombine.low %v418_v35, %v422_v36  ;;  %v8006_v48 = vcombine.high %v425_v38, %v429_v39  ;;  %v8833_v35 = vld [vmem:[%s12398_s3 + $0x68] ss:$16 sps:$4 sm:$0xff]   ;;  %v8838_v36 = vld [vmem:[%s12398_s3 + $0x84] ss:$16 sps:$4 sm:$0xff]   ;;  %v8841_v38 = vld [vmem:[%s12398_s3 + $0x8c] ss:$16 sps:$4 sm:$0xff]  }
 0x157   :  { %3529 = vmatprep.subr.bf16.mxu0 %v7950_v49  ;;  %3868 = vmatprep.subr.bf16.mxu1 %v7952_v51  ;;  %v9224_v49 = vld [vmem:[%s12397_s0 + $0x12c] ss:$24 sps:$4 sm:$0xff]   ;;  %v433_v51 = vld [vmem:[%s12396_s2 + $0xb50] sm:$0xff] }
 0x158   :  { %3468 = vmatprep.mubr.bf16.mxu0 %v9218_v61  ;;  %3807 = vmatprep.mubr.bf16.mxu1 %v9218_v61  ;;  %v9225_v61 = vld [vmem:[%s12397_s0 + $0x128] ss:$24 sps:$4 sm:$0xff]   ;;  %v8013_v0 = vcombine.low %v433_v51, %v437_v52 }
 0x159   :  { %v8836_v39 = vld [vmem:[%s12398_s3 + $0x80] ss:$16 sps:$4 sm:$0xff]  }
 0x15a   :  { %3530 = vmatpush1.bf16.msra.mxu0 %v7949_v56  ;;  %3869 = vmatpush1.bf16.msra.mxu1 %v7951_v59  ;;  %v441_v56 = vld [vmem:[%s12396_s2 + $0xb90] sm:$0xff]  ;;  %v8014_v59 = vcombine.high %v433_v51, %v437_v52  ;;  %v9234_v51 = vld [vmem:[%s12397_s0 + $0xa4] ss:$24 sps:$4 sm:$0xff]  }
 0x15b   :  { %3531 = vmatprep.subr.bf16.mxu0 %v7958_v60  ;;  %3870 = vmatprep.subr.bf16.mxu1 %v7960_v62  ;;  %v8016_v60 = vcombine.high %v434_v53, %v438_v54  ;;  %v442_v62 = vld [vmem:[%s12396_s2 + $0xb98] sm:$0xff]  ;;  %v8022_v2 = vcombine.high %v441_v56, %v445_v57  ;;  %v8021_v9 = vcombine.low %v441_v56, %v445_v57 }
 0x15c   :  { %v8853_v52 = vld [vmem:[%s12398_s3 + $0xcc] ss:$16 sps:$4 sm:$0xff]  }
 0x15d   :  { %3469 = vmatmul.mubr.bf16.gmra.mrb[44].mxu0 %v9219_v7  ;;  %3808 = vmatmul.mubr.bf16.gmra.mrb[44].mxu1 %v9219_v7  ;;  %v450_v7 = vld [vmem:[%s12396_s2 + $0xbd8] sm:$0xff] }
 0x15e   :  { %3532 = vmatpush1.bf16.msra.mxu0 %v7957_v1  ;;  %3871 = vmatpush1.bf16.msra.mxu1 %v7959_v4  ;;  %v8015_v1 = vcombine.low %v434_v53, %v438_v54  ;;  %v8024_v4 = vcombine.high %v442_v62, %v446_v63  ;;  %v8031_v16 = vcombine.low %v450_v7, %v454_v8  ;;  %v3974_v56 = vld [vmem:[%s12399_s1 + $0x18] sm:$0xff] }
 0x15f   :  { %3533 = vmatprep.subr.bf16.mxu0 %v7966_v5  ;;  %3872 = vmatprep.subr.bf16.mxu1 %v7968_v6  ;;  %v449_v5 = vld [vmem:[%s12396_s2 + $0xbd0] sm:$0xff] }
 0x160   :  { %3478 = vmatprep.mubr.bf16.mxu0 %v9220_v13  ;;  %3817 = vmatprep.mubr.bf16.mxu1 %v9220_v13  ;;  %v453_v6 = vld [vmem:[%s12396_s2 + $0xbf0] sm:$0xff] }
 0x161   :  { %v9227_v13 = vld [vmem:[%s12397_s0 + $0x158] ss:$24 sps:$4 sm:$0xff]  }
 0x162   :  { %3534 = vmatpush1.bf16.msra.mxu0 %v7965_v10  ;;  %3873 = vmatpush1.bf16.msra.mxu1 %v7967_v11  ;;  %v8023_v10 = vcombine.low %v442_v62, %v446_v63  ;;  %v8030_v11 = vcombine.high %v449_v5, %v453_v6 }
 0x163   :  { %3535 = vmatprep.subr.bf16.mxu0 %v7974_v12  ;;  %3874 = vmatprep.subr.bf16.mxu1 %v7976_v14  ;;  %v8032_v12 = vcombine.high %v450_v7, %v454_v8  ;;  %v8029_v14 = vcombine.low %v449_v5, %v453_v6  ;;  %v8859_v7 = vld [vmem:[%s12398_s3 + $0xec] ss:$16 sps:$4 sm:$0xff]  }
 0x165   :  { %3479 = vmatmul.mubr.bf16.gmra.mrb[48].mxu0 %v9221_v25  ;;  %3818 = vmatmul.mubr.bf16.gmra.mrb[48].mxu1 %v9221_v25  ;;  %v8821_v25 = vld [vmem:[%s12398_s3 + $0x28] ss:$16 sps:$4 sm:$0xff]  }
 0x166   :  { %3536 = vmatpush1.bf16.msra.mxu0 %v7973_v19  ;;  %3875 = vmatpush1.bf16.msra.mxu1 %v7975_v22  ;;  %v8817_v19 = vld [vmem:[%s12398_s3 + $0xc] ss:$16 sps:$4 sm:$0xff]  }
 0x167   :  { %3537 = vmatprep.subr.bf16.mxu0 %v7982_v23  ;;  %3876 = vmatprep.subr.bf16.mxu1 %v7984_v24  ;;  %v8823_v22 = vld [vmem:[%s12398_s3 + $0x2c] ss:$16 sps:$4 sm:$0xff]   ;;  %v8818_v23 = vld [vmem:[%s12398_s3 + $0x20] ss:$16 sps:$4 sm:$0xff]  }
 0x168   :  { %3488 = vmatprep.mubr.bf16.mxu0 %v9222_v31  ;;  %3827 = vmatprep.mubr.bf16.mxu1 %v9222_v31  ;;  %v9229_v24 = vld [vmem:[%s12397_s0 + $0x10] ss:$24 sps:$4 sm:$0xff]   ;;  %v8832_v31 = vld [vmem:[%s12398_s3 + $0x64] ss:$16 sps:$4 sm:$0xff]  }
 0x16a   :  { %3538 = vmatpush1.bf16.msra.mxu0 %v7981_v28  ;;  %3877 = vmatpush1.bf16.msra.mxu1 %v7983_v29  ;;  %v9230_v28 = vld [vmem:[%s12397_s0 + $0x44] ss:$24 sps:$4 sm:$0xff]   ;;  %v8824_v29 = vld [vmem:[%s12398_s3 + $0x40] ss:$16 sps:$4 sm:$0xff]  }
 0x16b   :  { %3539 = vmatprep.subr.bf16.mxu0 %v7990_v30  ;;  %3878 = vmatprep.subr.bf16.mxu1 %v7992_v32  ;;  %v8827_v30 = vld [vmem:[%s12398_s3 + $0x48] ss:$16 sps:$4 sm:$0xff]   ;;  %v8835_v32 = vld [vmem:[%s12398_s3 + $0x6c] ss:$16 sps:$4 sm:$0xff]  }
 0x16d   :  { %3489 = vmatmul.mubr.bf16.gmra.mrb[52].mxu0 %v9223_v43  ;;  %3828 = vmatmul.mubr.bf16.gmra.mrb[52].mxu1 %v9223_v43  ;;  %v9233_v43 = vld [vmem:[%s12397_s0 + $0x70] ss:$24 sps:$4 sm:$0xff]  }
 0x16e   :  { %3540 = vmatpush1.bf16.msra.mxu0 %v7989_v37  ;;  %3879 = vmatpush1.bf16.msra.mxu1 %v7991_v40  ;;  %v9232_v37 = vld [vmem:[%s12397_s0 + $0x74] ss:$24 sps:$4 sm:$0xff]   ;;  %v8839_v40 = vld [vmem:[%s12398_s3 + $0x88] ss:$16 sps:$4 sm:$0xff]  }
 0x16f   :  { %3541 = vmatprep.subr.bf16.mxu0 %v7998_v41  ;;  %3880 = vmatprep.subr.bf16.mxu1 %v8000_v42  ;;  %v8844_v41 = vld [vmem:[%s12398_s3 + $0xa4] ss:$16 sps:$4 sm:$0xff]   ;;  %v8847_v42 = vld [vmem:[%s12398_s3 + $0xac] ss:$16 sps:$4 sm:$0xff]  }
 0x170   :  { %3498 = vmatprep.mubr.bf16.mxu0 %v9224_v49  ;;  %3837 = vmatprep.mubr.bf16.mxu1 %v9224_v49 }
 0x172   :  { %3542 = vmatpush1.bf16.msra.mxu0 %v7997_v46  ;;  %3881 = vmatpush1.bf16.msra.mxu1 %v7999_v47  ;;  %v3972_v46 = vld [vmem:[%s12399_s1 + $0x8] sm:$0xff] }
 0x173   :  { %3543 = vmatprep.subr.bf16.mxu0 %v8006_v48  ;;  %3882 = vmatprep.subr.bf16.mxu1 %v8008_v50  ;;  %v8845_v47 = vld [vmem:[%s12398_s3 + $0xa8] ss:$16 sps:$4 sm:$0xff]   ;;  %v8850_v48 = vld [vmem:[%s12398_s3 + $0xc4] ss:$16 sps:$4 sm:$0xff]  }
 0x174   :  { %v3973_v50 = vld [vmem:[%s12399_s1 + $0x10] sm:$0xff] }
 0x175   :  { %3499 = vmatmul.mubr.bf16.gmra.mrb[56].mxu0 %v9225_v61  ;;  %3838 = vmatmul.mubr.bf16.gmra.mrb[56].mxu1 %v9225_v61  ;;  %v8848_v61 = vld [vmem:[%s12398_s3 + $0xc0] ss:$16 sps:$4 sm:$0xff]  }
 0x176   :  { %3544 = vmatpush1.bf16.msra.mxu0 %v8005_v55  ;;  %3883 = vmatpush1.bf16.msra.mxu1 %v8007_v58 }
 0x177   :  { %3545 = vmatprep.subr.bf16.mxu0 %v8014_v59  ;;  %3884 = vmatprep.subr.bf16.mxu1 %v8016_v60 }
 0x178   :  { %3508 = vmatprep.mubr.bf16.mxu0 %v9226_v3  ;;  %3847 = vmatprep.mubr.bf16.mxu1 %v9226_v3  ;;  %v8856_v3 = vld [vmem:[%s12398_s3 + $0xe4] ss:$16 sps:$4 sm:$0xff]  }
 0x17a   :  { %3546 = vmatpush1.bf16.msra.mxu0 %v8013_v0  ;;  %3885 = vmatpush1.bf16.msra.mxu1 %v8015_v1 }
 0x17b   :  { %3547 = vmatprep.subr.bf16.mxu0 %v8022_v2  ;;  %3886 = vmatprep.subr.bf16.mxu1 %v8024_v4  ;;  %v8851_v2 = vld [vmem:[%s12398_s3 + $0xc8] ss:$16 sps:$4 sm:$0xff]  }
 0x17d   :  { %3509 = vmatmul.mubr.bf16.gmra.mrb[60].mxu0 %v9227_v13  ;;  %3848 = vmatmul.mubr.bf16.gmra.mrb[60].mxu1 %v9227_v13  ;;  %v8854_v13 = vld [vmem:[%s12398_s3 + $0xe0] ss:$16 sps:$4 sm:$0xff]  }
 0x17e   :  { %3548 = vmatpush1.bf16.msra.mxu0 %v8021_v9  ;;  %3887 = vmatpush1.bf16.msra.mxu1 %v8023_v10 }
 0x17f   :  { %3549 = vmatprep.subr.bf16.mxu0 %v8030_v11  ;;  %3888 = vmatprep.subr.bf16.mxu1 %v8032_v12  ;;  %v9235_v11 = vld [vmem:[%s12397_s0 + $0xa0] ss:$24 sps:$4 sm:$0xff]  }
 0x180   :  { %3551 = vmatprep.mubr.bf16.mxu0 %v9228_v17  ;;  %3890 = vmatprep.mubr.bf16.mxu1 %v9228_v17  ;;  %v3975_v12 = vld [vmem:[%s12399_s1 + $0x20] sm:$0xff] }
 0x182   :  { %3550 = vmatpush1.bf16.msra.mxu0 %v8029_v14  ;;  %3889 = vmatpush1.bf16.msra.mxu1 %v8031_v16 }
 0x183   :  { %5859 = vmatprep.subr.bf16.mxu0 %v8814_v15  ;;  %6311 = vmatprep.subr.bf16.mxu1 %v8817_v19 }
 0x185   :  { %3552 = vmatmul.mubr.bf16.vlgmr.msra.gmra.mrb[32].mxu0 %v9229_v24  ;;  %3891 = vmatmul.mubr.bf16.vlgmr.msra.gmra.mrb[32].mxu1 %v9229_v24 }
 0x186   :  { %5860 = vmatpush1.bf16.msra.mxu0 %v8812_v18  ;;  %6312 = vmatpush1.bf16.msra.mxu1 %v8815_v20  ;;  %v8857_v18 = vld [vmem:[%s12398_s3 + $0xe8] ss:$16 sps:$4 sm:$0xff]  }
 0x187   :  { %5861 = vmatprep.subr.bf16.mxu0 %v8820_v21  ;;  %6313 = vmatprep.subr.bf16.mxu1 %v8823_v22  ;;  %v3976_v22 = vld [vmem:[%s12399_s1 + $0x28] sm:$0xff] }
 0x188   :  { %3561 = vmatprep.mubr.bf16.mxu0 %v9230_v28  ;;  %3900 = vmatprep.mubr.bf16.mxu1 %v9230_v28  ;;  %v9236_v28 = vld [vmem:[%s12397_s0 + $0xd4] ss:$24 sps:$4 sm:$0xff]  }
 0x18a   :  { %5862 = vmatpush1.bf16.msra.mxu0 %v8818_v23  ;;  %6314 = vmatpush1.bf16.msra.mxu1 %v8821_v25  ;;  %v8862_v23 = vld [vmem:[%s12398_s3 + $0x104] ss:$16 sps:$4 sm:$0xff]  }
 0x18b   :  { %5863 = vmatprep.subr.bf16.mxu0 %v8826_v26  ;;  %6315 = vmatprep.subr.bf16.mxu1 %v8829_v27  ;;  %v3977_v27 = vld [vmem:[%s12399_s1 + $0x30] sm:$0xff] }
 0x18d   :  { %3562 = vmatmul.mubr.bf16.gmra.mrb[36].mxu0 %v9231_v33  ;;  %3901 = vmatmul.mubr.bf16.gmra.mrb[36].mxu1 %v9231_v33 }
 0x18e   :  { %5864 = vmatpush1.bf16.msra.mxu0 %v8824_v29  ;;  %6316 = vmatpush1.bf16.msra.mxu1 %v8827_v30  ;;  %v8865_v29 = vld [vmem:[%s12398_s3 + $0x10c] ss:$16 sps:$4 sm:$0xff]  }
 0x18f   :  { %5865 = vmatprep.subr.bf16.mxu0 %v8832_v31  ;;  %6317 = vmatprep.subr.bf16.mxu1 %v8835_v32 }
 0x190   :  { %3571 = vmatprep.mubr.bf16.mxu0 %v9232_v37  ;;  %3910 = vmatprep.mubr.bf16.mxu1 %v9232_v37 }
 0x192   :  { %5866 = vmatpush1.bf16.msra.mxu0 %v8830_v34  ;;  %6318 = vmatpush1.bf16.msra.mxu1 %v8833_v35  ;;  %v3978_v34 = vld [vmem:[%s12399_s1 + $0x38] sm:$0xff] }
 0x193   :  { %5867 = vmatprep.subr.bf16.mxu0 %v8838_v36  ;;  %6319 = vmatprep.subr.bf16.mxu1 %v8841_v38 }
 0x195   :  { %3572 = vmatmul.mubr.bf16.gmra.mrb[40].mxu0 %v9233_v43  ;;  %3911 = vmatmul.mubr.bf16.gmra.mrb[40].mxu1 %v9233_v43 }
 0x196   :  { %5868 = vmatpush1.bf16.msra.mxu0 %v8836_v39  ;;  %6320 = vmatpush1.bf16.msra.mxu1 %v8839_v40  ;;  %v8860_v39 = vld [vmem:[%s12398_s3 + $0x100] ss:$16 sps:$4 sm:$0xff]  }
 0x197   :  { %5869 = vmatprep.subr.bf16.mxu0 %v8844_v41  ;;  %6321 = vmatprep.subr.bf16.mxu1 %v8847_v42 }
 0x198   :  { %v2875_v49 = vpop.f32.mrb[0].mxu0  ;;  %3581 = vmatprep.mubr.bf16.mxu0 %v9234_v51  ;;  %v3214_v54 = vpop.f32.mrb[0].mxu1  ;;  %3920 = vmatprep.mubr.bf16.mxu1 %v9234_v51 }
 0x199   :  { %v4003_v53 = vmul.f32 %v3971_v44, %v2875_v49  ;;  %v2877_v55 = vpop.f32.mrb[1].mxu0  ;;  %v4005_v57 = vmul.f32 %v3971_v44, %v3214_v54  ;;  %v3216_v59 = vpop.f32.mrb[1].mxu1  ;;  %v8863_v44 = vld [vmem:[%s12398_s3 + $0x108] ss:$16 sps:$4 sm:$0xff]   ;;  %v8871_v49 = vld [vmem:[%s12398_s3 + $0x12c] ss:$16 sps:$4 sm:$0xff]  }
 0x19a   :  { %v4004_v58 = vmul.f32 %v3972_v46, %v2877_v55  ;;  %v2879_v60 = vpop.f32.mrb[2].mxu0  ;;  %5870 = vmatpush1.bf16.msra.mxu0 %v8842_v45  ;;  %v4006_v62 = vmul.f32 %v3972_v46, %v3216_v59  ;;  %v3218_v0 = vpop.f32.mrb[2].mxu1  ;;  %6322 = vmatpush1.bf16.msra.mxu1 %v8845_v47  ;;  %v8868_v45 = vld [vmem:[%s12398_s3 + $0x124] ss:$16 sps:$4 sm:$0xff]   ;;  %v8866_v55 = vld [vmem:[%s12398_s3 + $0x120] ss:$16 sps:$4 sm:$0xff]  }
 0x19b   :  { %v4011_v63 = vmul.f32 %v3973_v50, %v2879_v60  ;;  %v2881_v1 = vpop.f32.mrb[3].mxu0  ;;  %5871 = vmatprep.subr.bf16.mxu0 %v8850_v48  ;;  %v4013_v4 = vmul.f32 %v3973_v50, %v3218_v0  ;;  %v3220_v6 = vpop.f32.mrb[3].mxu1  ;;  %6323 = vmatprep.subr.bf16.mxu1 %v8853_v52  ;;  %v4131_v8 = vmax.f32 %v4003_v53, 0.0  ;;  %v4133_v14 = vmax.f32 %v4005_v57, 0.0  ;;  %v9237_v53 = vld [vmem:[%s12397_s0 + $0xd0] ss:$24 sps:$4 sm:$0xff]  }
 0x19c   :  { %v4012_v5 = vmul.f32 %v3974_v56, %v2881_v1  ;;  %v4014_v10 = vmul.f32 %v3974_v56, %v3220_v6  ;;  %v4132_v15 = vmax.f32 %v4004_v58, 0.0  ;;  %v4134_v19 = vmax.f32 %v4006_v62, 0.0  ;;  %v3979_v54 = vld [vmem:[%s12399_s1 + $0x40] sm:$0xff]  ;;  %v8869_v60 = vld [vmem:[%s12398_s3 + $0x128] ss:$16 sps:$4 sm:$0xff]  }
 0x19d   :  { %v4139_v9 = vmax.f32 %v4011_v63, 0.0  ;;  %3582 = vmatmul.mubr.bf16.gmra.mrb[44].mxu0 %v9235_v11  ;;  %v4141_v16 = vmax.f32 %v4013_v4, 0.0  ;;  %3921 = vmatmul.mubr.bf16.gmra.mrb[44].mxu1 %v9235_v11  ;;  %v3980_v0 = vld [vmem:[%s12399_s1 + $0x48] sm:$0xff]  ;;  %v8874_v1 = vld [vmem:[%s12398_s3 + $0x144] ss:$16 sps:$4 sm:$0xff]  }
 0x19e   :  { %v4140_v17 = vmax.f32 %v4012_v5, 0.0  ;;  %5872 = vmatpush1.bf16.msra.mxu0 %v8848_v61  ;;  %v4142_v21 = vmax.f32 %v4014_v10, 0.0  ;;  %6324 = vmatpush1.bf16.msra.mxu1 %v8851_v2  ;;  %v3981_v5 = vld [vmem:[%s12399_s1 + $0x50] sm:$0xff]  ;;  %v9238_v6 = vld [vmem:[%s12397_s0 + $0x104] ss:$24 sps:$4 sm:$0xff]  }
 0x19f   :  { %v10840_v20 = vpack.c.bf16 %v4139_v9, %v4131_v8  ;;  %5873 = vmatprep.subr.bf16.mxu0 %v8856_v3  ;;  %v10848_v24 = vpack.c.bf16 %v4141_v16, %v4133_v14  ;;  %6325 = vmatprep.subr.bf16.mxu1 %v8859_v7  ;;  %v8877_v7 = vld [vmem:[%s12398_s3 + $0x14c] ss:$16 sps:$4 sm:$0xff]  }
 0x1a0   :  { %v10850_v25 = vpack.c.bf16 %v4140_v17, %v4132_v15  ;;  %v2885_v26 = vpop.f32.mrb[4].mxu0  ;;  %3591 = vmatprep.mubr.bf16.mxu0 %v9236_v28  ;;  %v10861_v30 = vpack.c.bf16 %v4142_v21, %v4134_v19  ;;  %v3224_v32 = vpop.f32.mrb[4].mxu1  ;;  %3930 = vmatprep.mubr.bf16.mxu1 %v9236_v28  ;;  %v8872_v17 = vld [vmem:[%s12398_s3 + $0x140] ss:$16 sps:$4 sm:$0xff]  }
 0x1a1   :  { %v4019_v31 = vmul.f32 %v3975_v12, %v2885_v26  ;;  %v2887_v33 = vpop.f32.mrb[5].mxu0  ;;  %v4021_v35 = vmul.f32 %v3975_v12, %v3224_v32  ;;  %v3226_v37 = vpop.f32.mrb[5].mxu1  ;;  %v3982_v12 = vld [vmem:[%s12399_s1 + $0x58] sm:$0xff]  ;;  %v8880_v26 = vld [vmem:[%s12398_s3 + $0x164] ss:$16 sps:$4 sm:$0xff]  }
 0x1a2   :  { %v4020_v36 = vmul.f32 %v3976_v22, %v2887_v33  ;;  %v2889_v38 = vpop.f32.mrb[6].mxu0  ;;  %5874 = vmatpush1.bf16.msra.mxu0 %v8854_v13  ;;  %v4022_v40 = vmul.f32 %v3976_v22, %v3226_v37  ;;  %v3228_v42 = vpop.f32.mrb[6].mxu1  ;;  %6326 = vmatpush1.bf16.msra.mxu1 %v8857_v18  ;;  %v8878_v37 = vld [vmem:[%s12398_s3 + $0x160] ss:$16 sps:$4 sm:$0xff]  }
 0x1a3   :  { %v4027_v41 = vmul.f32 %v3977_v27, %v2889_v38  ;;  %v2891_v43 = vpop.f32.mrb[7].mxu0  ;;  %5875 = vmatprep.subr.bf16.mxu0 %v8862_v23  ;;  %v4029_v46 = vmul.f32 %v3977_v27, %v3228_v42  ;;  %v3230_v48 = vpop.f32.mrb[7].mxu1  ;;  %6327 = vmatprep.subr.bf16.mxu1 %v8865_v29  ;;  %v4147_v50 = vmax.f32 %v4019_v31, 0.0  ;;  %v4149_v56 = vmax.f32 %v4021_v35, 0.0  ;;  %v8875_v23 = vld [vmem:[%s12398_s3 + $0x148] ss:$16 sps:$4 sm:$0xff]  }
 0x1a4   :  { %v4028_v47 = vmul.f32 %v3978_v34, %v2891_v43  ;;  %v4030_v52 = vmul.f32 %v3978_v34, %v3230_v48  ;;  %v4148_v57 = vmax.f32 %v4020_v36, 0.0  ;;  %v4150_v61 = vmax.f32 %v4022_v40, 0.0  ;;  %v8883_v31 = vld [vmem:[%s12398_s3 + $0x16c] ss:$16 sps:$4 sm:$0xff]   ;;  %v9239_v35 = vld [vmem:[%s12397_s0 + $0x100] ss:$24 sps:$4 sm:$0xff]  }
 0x1a5   :  { %v4155_v51 = vmax.f32 %v4027_v41, 0.0  ;;  %3592 = vmatmul.mubr.bf16.gmra.mrb[48].mxu0 %v9237_v53  ;;  %v4157_v58 = vmax.f32 %v4029_v46, 0.0  ;;  %3931 = vmatmul.mubr.bf16.gmra.mrb[48].mxu1 %v9237_v53  ;;  %v3983_v36 = vld [vmem:[%s12399_s1 + $0x60] sm:$0xff]  ;;  %v8881_v42 = vld [vmem:[%s12398_s3 + $0x168] ss:$16 sps:$4 sm:$0xff]  }
 0x1a6   :  { %v4156_v59 = vmax.f32 %v4028_v47, 0.0  ;;  %5876 = vmatpush1.bf16.msra.mxu0 %v8860_v39  ;;  %v4158_v63 = vmax.f32 %v4030_v52, 0.0  ;;  %6328 = vmatpush1.bf16.msra.mxu1 %v8863_v44  ;;  %v3984_v46 = vld [vmem:[%s12399_s1 + $0x68] sm:$0xff]  ;;  %v8886_v47 = vld [vmem:[%s12398_s3 + $0x184] ss:$16 sps:$4 sm:$0xff]  }
 0x1a7   :  { %v10890_v62 = vpack.c.bf16 %v4155_v51, %v4147_v50  ;;  %5877 = vmatprep.subr.bf16.mxu0 %v8868_v45  ;;  %v10898_v2 = vpack.c.bf16 %v4157_v58, %v4149_v56  ;;  %6329 = vmatprep.subr.bf16.mxu1 %v8871_v49  ;;  %v3985_v51 = vld [vmem:[%s12399_s1 + $0x70] sm:$0xff]  ;;  %v8889_v53 = vld [vmem:[%s12398_s3 + $0x18c] ss:$16 sps:$4 sm:$0xff]  }
 0x1a8   :  { %v10900_v3 = vpack.c.bf16 %v4156_v59, %v4148_v57  ;;  %v2895_v4 = vpop.f32.mrb[8].mxu0  ;;  %3601 = vmatprep.mubr.bf16.mxu0 %v9238_v6  ;;  %v10911_v8 = vpack.c.bf16 %v4158_v63, %v4150_v61  ;;  %v3234_v10 = vpop.f32.mrb[8].mxu1  ;;  %3940 = vmatprep.mubr.bf16.mxu1 %v9238_v6  ;;  %v9240_v52 = vld [vmem:[%s12397_s0 + $0x134] ss:$24 sps:$4 sm:$0xff]   ;;  %v3986_v58 = vld [vmem:[%s12399_s1 + $0x78] sm:$0xff] }
 0x1a9   :  { %v4035_v9 = vmul.f32 %v3979_v54, %v2895_v4  ;;  %v2897_v11 = vpop.f32.mrb[9].mxu0  ;;  %v4037_v13 = vmul.f32 %v3979_v54, %v3234_v10  ;;  %v3236_v15 = vpop.f32.mrb[9].mxu1 }
 0x1aa   :  { %v4036_v14 = vmul.f32 %v3980_v0, %v2897_v11  ;;  %v2899_v16 = vpop.f32.mrb[10].mxu0  ;;  %5878 = vmatpush1.bf16.msra.mxu0 %v8866_v55  ;;  %v4038_v18 = vmul.f32 %v3980_v0, %v3236_v15  ;;  %v3238_v21 = vpop.f32.mrb[10].mxu1  ;;  %6330 = vmatpush1.bf16.msra.mxu1 %v8869_v60  ;;  %v8884_v0 = vld [vmem:[%s12398_s3 + $0x180] ss:$16 sps:$4 sm:$0xff]  }
 0x1ab   :  { %v4043_v19 = vmul.f32 %v3981_v5, %v2899_v16  ;;  %v2901_v22 = vpop.f32.mrb[11].mxu0  ;;  %5879 = vmatprep.subr.bf16.mxu0 %v8874_v1  ;;  %v4045_v27 = vmul.f32 %v3981_v5, %v3238_v21  ;;  %v3240_v29 = vpop.f32.mrb[11].mxu1  ;;  %6331 = vmatprep.subr.bf16.mxu1 %v8877_v7  ;;  %v4163_v32 = vmax.f32 %v4035_v9, 0.0  ;;  %v4165_v38 = vmax.f32 %v4037_v13, 0.0  ;;  %v8887_v7 = vld [vmem:[%s12398_s3 + $0x188] ss:$16 sps:$4 sm:$0xff]  }
 0x1ac   :  { %v4044_v28 = vmul.f32 %v3982_v12, %v2901_v22  ;;  %v4046_v34 = vmul.f32 %v3982_v12, %v3240_v29  ;;  %v4164_v39 = vmax.f32 %v4036_v14, 0.0  ;;  %v4166_v43 = vmax.f32 %v4038_v18, 0.0  ;;  %v8892_v9 = vld [vmem:[%s12398_s3 + $0x1a4] ss:$16 sps:$4 sm:$0xff]   ;;  %v8895_v13 = vld [vmem:[%s12398_s3 + $0x1ac] ss:$16 sps:$4 sm:$0xff]  }
 0x1ad   :  { %v4171_v33 = vmax.f32 %v4043_v19, 0.0  ;;  %3602 = vmatmul.mubr.bf16.gmra.mrb[52].mxu0 %v9239_v35  ;;  %v4173_v40 = vmax.f32 %v4045_v27, 0.0  ;;  %3941 = vmatmul.mubr.bf16.gmra.mrb[52].mxu1 %v9239_v35  ;;  %v3987_v18 = vld [vmem:[%s12399_s1 + $0x80] sm:$0xff]  ;;  %v8893_v27 = vld [vmem:[%s12398_s3 + $0x1a8] ss:$16 sps:$4 sm:$0xff]  }
 0x1ae   :  { %v4172_v41 = vmax.f32 %v4044_v28, 0.0  ;;  %5880 = vmatpush1.bf16.msra.mxu0 %v8872_v17  ;;  %v4174_v45 = vmax.f32 %v4046_v34, 0.0  ;;  %6332 = vmatpush1.bf16.msra.mxu1 %v8875_v23  ;;  %v9241_v17 = vld [vmem:[%s12397_s0 + $0x130] ss:$24 sps:$4 sm:$0xff]  }
 0x1af   :  { %v10940_v44 = vpack.c.bf16 %v4171_v33, %v4163_v32  ;;  %5881 = vmatprep.subr.bf16.mxu0 %v8880_v26  ;;  %v10948_v48 = vpack.c.bf16 %v4173_v40, %v4165_v38  ;;  %6333 = vmatprep.subr.bf16.mxu1 %v8883_v31  ;;  %v8890_v19 = vld [vmem:[%s12398_s3 + $0x1a0] ss:$16 sps:$4 sm:$0xff]   ;;  %v3988_v32 = vld [vmem:[%s12399_s1 + $0x88] sm:$0xff]  ;;  %v8898_v33 = vld [vmem:[%s12398_s3 + $0x1c4] ss:$16 sps:$4 sm:$0xff]  }
 0x1b0   :  { %v10950_v49 = vpack.c.bf16 %v4172_v41, %v4164_v39  ;;  %v2905_v50 = vpop.f32.mrb[12].mxu0  ;;  %3611 = vmatprep.mubr.bf16.mxu0 %v9240_v52  ;;  %v10961_v54 = vpack.c.bf16 %v4174_v45, %v4166_v43  ;;  %v3244_v56 = vpop.f32.mrb[12].mxu1  ;;  %3950 = vmatprep.mubr.bf16.mxu1 %v9240_v52  ;;  %v9242_v38 = vld [vmem:[%s12397_s0 + $0x164] ss:$24 sps:$4 sm:$0xff]   ;;  %v8896_v52 = vld [vmem:[%s12398_s3 + $0x1c0] ss:$16 sps:$4 sm:$0xff]  }
 0x1b1   :  { %v4051_v55 = vmul.f32 %v3983_v36, %v2905_v50  ;;  %v2907_v57 = vpop.f32.mrb[13].mxu0  ;;  %v4053_v59 = vmul.f32 %v3983_v36, %v3244_v56  ;;  %v3246_v61 = vpop.f32.mrb[13].mxu1  ;;  %v8901_v39 = vld [vmem:[%s12398_s3 + $0x1cc] ss:$16 sps:$4 sm:$0xff]  }
 0x1b2   :  { %v4052_v60 = vmul.f32 %v3984_v46, %v2907_v57  ;;  %v2909_v63 = vpop.f32.mrb[14].mxu0  ;;  %5882 = vmatpush1.bf16.msra.mxu0 %v8878_v37  ;;  %v4054_v1 = vmul.f32 %v3984_v46, %v3246_v61  ;;  %v3248_v5 = vpop.f32.mrb[14].mxu1  ;;  %6334 = vmatpush1.bf16.msra.mxu1 %v8881_v42  ;;  %v3989_v37 = vld [vmem:[%s12399_s1 + $0x90] sm:$0xff]  ;;  %v3990_v45 = vld [vmem:[%s12399_s1 + $0x98] sm:$0xff] }
 0x1b3   :  { %v4059_v4 = vmul.f32 %v3985_v51, %v2909_v63  ;;  %v2911_v6 = vpop.f32.mrb[15].mxu0  ;;  %5883 = vmatprep.subr.bf16.mxu0 %v8886_v47  ;;  %v4061_v10 = vmul.f32 %v3985_v51, %v3248_v5  ;;  %v3250_v12 = vpop.f32.mrb[15].mxu1  ;;  %6335 = vmatprep.subr.bf16.mxu1 %v8889_v53  ;;  %v4179_v14 = vmax.f32 %v4051_v55, 0.0  ;;  %v4181_v21 = vmax.f32 %v4053_v59, 0.0  ;;  %v3991_v63 = vld [vmem:[%s12399_s1 + $0xa0] sm:$0xff] }
 0x1b4   :  { %v4060_v11 = vmul.f32 %v3986_v58, %v2911_v6  ;;  %v4062_v16 = vmul.f32 %v3986_v58, %v3250_v12  ;;  %v4180_v22 = vmax.f32 %v4052_v60, 0.0  ;;  %v4182_v28 = vmax.f32 %v4054_v1, 0.0  ;;  %v8899_v58 = vld [vmem:[%s12398_s3 + $0x1c8] ss:$16 sps:$4 sm:$0xff]  }
 0x1b5   :  { %v4187_v15 = vmax.f32 %v4059_v4, 0.0  ;;  %3612 = vmatmul.mubr.bf16.gmra.mrb[56].mxu0 %v9241_v17  ;;  %v4189_v23 = vmax.f32 %v4061_v10, 0.0  ;;  %3951 = vmatmul.mubr.bf16.gmra.mrb[56].mxu1 %v9241_v17  ;;  %v9243_v6 = vld [vmem:[%s12397_s0 + $0x160] ss:$24 sps:$4 sm:$0xff]  }
 0x1b6   :  { %v4188_v26 = vmax.f32 %v4060_v11, 0.0  ;;  %5884 = vmatpush1.bf16.msra.mxu0 %v8884_v0  ;;  %v4190_v31 = vmax.f32 %v4062_v16, 0.0  ;;  %6336 = vmatpush1.bf16.msra.mxu1 %v8887_v7  ;;  %v8904_v0 = vld [vmem:[%s12398_s3 + $0x1e4] ss:$16 sps:$4 sm:$0xff]   ;;  %v8902_v7 = vld [vmem:[%s12398_s3 + $0x1e0] ss:$16 sps:$4 sm:$0xff]  }
 0x1b7   :  { %v10990_v29 = vpack.c.bf16 %v4187_v15, %v4179_v14  ;;  %5885 = vmatprep.subr.bf16.mxu0 %v8892_v9  ;;  %v10998_v34 = vpack.c.bf16 %v4189_v23, %v4181_v21  ;;  %6337 = vmatprep.subr.bf16.mxu1 %v8895_v13  ;;  %v8907_v9 = vld [vmem:[%s12398_s3 + $0x1ec] ss:$16 sps:$4 sm:$0xff]   ;;  %v8905_v14 = vld [vmem:[%s12398_s3 + $0x1e8] ss:$16 sps:$4 sm:$0xff]  }
 0x1b8   :  { %v11000_v35 = vpack.c.bf16 %v4188_v26, %v4180_v22  ;;  %v2915_v36 = vpop.f32.mrb[16].mxu0  ;;  %3621 = vmatprep.mubr.bf16.mxu0 %v9242_v38  ;;  %v11011_v40 = vpack.c.bf16 %v4190_v31, %v4182_v28  ;;  %v3254_v42 = vpop.f32.mrb[16].mxu1  ;;  %3960 = vmatprep.mubr.bf16.mxu1 %v9242_v38  ;;  %v3993_v26 = vld [vmem:[%s12399_s1 + $0xb0] sm:$0xff] }
 0x1b9   :  { %v4067_v41 = vmul.f32 %v3987_v18, %v2915_v36  ;;  %v2917_v43 = vpop.f32.mrb[17].mxu0  ;;  %v4069_v46 = vmul.f32 %v3987_v18, %v3254_v42  ;;  %v3256_v50 = vpop.f32.mrb[17].mxu1  ;;  %v3992_v18 = vld [vmem:[%s12399_s1 + $0xa8] sm:$0xff] }
 0x1ba   :  { %v4068_v47 = vmul.f32 %v3988_v32, %v2917_v43  ;;  %v2919_v51 = vpop.f32.mrb[18].mxu0  ;;  %5886 = vmatpush1.bf16.msra.mxu0 %v8890_v19  ;;  %v4070_v53 = vmul.f32 %v3988_v32, %v3256_v50  ;;  %v3258_v56 = vpop.f32.mrb[18].mxu1  ;;  %6338 = vmatpush1.bf16.msra.mxu1 %v8893_v27  ;;  %v8910_v19 = vld [vmem:[%s12398_s3 + $0x204] ss:$16 sps:$4 sm:$0xff]   ;;  %v8913_v27 = vld [vmem:[%s12398_s3 + $0x20c] ss:$16 sps:$4 sm:$0xff]  }
 0x1bb   :  { %v4075_v55 = vmul.f32 %v3989_v37, %v2919_v51  ;;  %v2921_v57 = vpop.f32.mrb[19].mxu0  ;;  %5887 = vmatprep.subr.bf16.mxu0 %v8898_v33  ;;  %v4077_v59 = vmul.f32 %v3989_v37, %v3258_v56  ;;  %v3260_v61 = vpop.f32.mrb[19].mxu1  ;;  %6339 = vmatprep.subr.bf16.mxu1 %v8901_v39  ;;  %v4195_v1 = vmax.f32 %v4067_v41, 0.0  ;;  %v4197_v10 = vmax.f32 %v4069_v46, 0.0  ;;  %v8908_v46 = vld [vmem:[%s12398_s3 + $0x200] ss:$16 sps:$4 sm:$0xff]  }
 0x1bc   :  { %v4076_v60 = vmul.f32 %v3990_v45, %v2921_v57  ;;  %v4078_v5 = vmul.f32 %v3990_v45, %v3260_v61  ;;  %v4196_v11 = vmax.f32 %v4068_v47, 0.0  ;;  %v4198_v15 = vmax.f32 %v4070_v53, 0.0  ;;  %v8916_v53 = vld [vmem:[%s12398_s3 + $0x224] ss:$16 sps:$4 sm:$0xff]  }
 0x1bd   :  { %v4203_v4 = vmax.f32 %v4075_v55, 0.0  ;;  %3622 = vmatmul.mubr.bf16.gmra.mrb[60].mxu0 %v9243_v6  ;;  %v4205_v12 = vmax.f32 %v4077_v59, 0.0  ;;  %3961 = vmatmul.mubr.bf16.gmra.mrb[60].mxu1 %v9243_v6  ;;  %v3996_v6 = vld [vmem:[%s12399_s1 + $0xc8] sm:$0xff] }
 0x1be   :  { %v4204_v13 = vmax.f32 %v4076_v60, 0.0  ;;  %5888 = vmatpush1.bf16.msra.mxu0 %v8896_v52  ;;  %v4206_v17 = vmax.f32 %v4078_v5, 0.0  ;;  %5891 = vmatprep.mubr.bf16.mxu0 %v10850_v25  ;;  %v8911_v52 = vld [vmem:[%s12398_s3 + $0x208] ss:$16 sps:$4 sm:$0xff]  }
 0x1bf   :  { %v11040_v16 = vpack.c.bf16 %v4203_v4, %v4195_v1  ;;  %6340 = vmatpush1.bf16.msra.mxu1 %v8899_v58  ;;  %v11049_v21 = vpack.c.bf16 %v4205_v12, %v4197_v10  ;;  %6343 = vmatprep.mubr.bf16.mxu1 %v10850_v25  ;;  %v3994_v25 = vld [vmem:[%s12399_s1 + $0xb8] sm:$0xff]  ;;  %v8922_v12 = vld [vmem:[%s12398_s3 + $0x244] ss:$16 sps:$4 sm:$0xff]  }
 0x1c0   :  { %v11051_v22 = vpack.c.bf16 %v4204_v13, %v4196_v11  ;;  %v2925_v23 = vpop.f32.mrb[20].mxu0  ;;  %5889 = vmatprep.subr.bf16.mxu0 %v8904_v0  ;;  %v11060_v28 = vpack.c.bf16 %v4206_v17, %v4198_v15  ;;  %v3264_v32 = vpop.f32.mrb[20].mxu1  ;;  %6341 = vmatprep.subr.bf16.mxu1 %v8907_v9  ;;  %v8919_v58 = vld [vmem:[%s12398_s3 + $0x22c] ss:$16 sps:$4 sm:$0xff]   ;;  %v3995_v0 = vld [vmem:[%s12399_s1 + $0xc0] sm:$0xff] }
 0x1c1   :  { %v4083_v31 = vmul.f32 %v3991_v63, %v2925_v23  ;;  %v2927_v33 = vpop.f32.mrb[21].mxu0  ;;  %v4085_v36 = vmul.f32 %v3991_v63, %v3264_v32  ;;  %v3266_v38 = vpop.f32.mrb[21].mxu1  ;;  %v8917_v11 = vld [vmem:[%s12398_s3 + $0x228] ss:$16 sps:$4 sm:$0xff]  }
 0x1c2   :  { %v4084_v37 = vmul.f32 %v3992_v18, %v2927_v33  ;;  %v2929_v39 = vpop.f32.mrb[22].mxu0  ;;  %5890 = vmatpush1.bf16.msra.mxu0 %v8902_v7  ;;  %v4086_v41 = vmul.f32 %v3992_v18, %v3266_v38  ;;  %v3268_v43 = vpop.f32.mrb[22].mxu1  ;;  %v3998_v18 = vld [vmem:[%s12399_s1 + $0xd8] sm:$0xff] }
 0x1c3   :  { %v4091_v42 = vmul.f32 %v3993_v26, %v2929_v39  ;;  %6342 = vmatpush1.bf16.msra.mxu1 %v8905_v14  ;;  %v2931_v45 = vpop.f32.mrb[23].mxu0  ;;  %5972 = vmatprep.subr.bf16.mxu0 %v8910_v19  ;;  %v4093_v47 = vmul.f32 %v3993_v26, %v3268_v43  ;;  %v3270_v51 = vpop.f32.mrb[23].mxu1  ;;  %v4211_v55 = vmax.f32 %v4083_v31, 0.0  ;;  %v4213_v59 = vmax.f32 %v4085_v36, 0.0  ;;  %v8925_v19 = vld [vmem:[%s12398_s3 + $0x24c] ss:$16 sps:$4 sm:$0xff]  }
 0x1c4   :  { %v4092_v50 = vmul.f32 %v3994_v25, %v2931_v45  ;;  %6424 = vmatprep.subr.bf16.mxu1 %v8913_v27  ;;  %v4094_v57 = vmul.f32 %v3994_v25, %v3270_v51  ;;  %v4212_v60 = vmax.f32 %v4084_v37, 0.0  ;;  %v4214_v1 = vmax.f32 %v4086_v41, 0.0  ;;  %v8920_v37 = vld [vmem:[%s12398_s3 + $0x240] ss:$16 sps:$4 sm:$0xff]   ;;  %v8928_v43 = vld [vmem:[%s12398_s3 + $0x264] ss:$16 sps:$4 sm:$0xff]  }
 0x1c5   :  { %v4219_v56 = vmax.f32 %v4091_v42, 0.0  ;;  %5892 = vmatmul.mubr.bf16.vlgmr.msra.gmra.mrb[64].mxu0 %v10840_v20  ;;  %v4221_v61 = vmax.f32 %v4093_v47, 0.0  ;;  %v8923_v42 = vld [vmem:[%s12398_s3 + $0x248] ss:$16 sps:$4 sm:$0xff]  }
 0x1c6   :  { %v4220_v63 = vmax.f32 %v4092_v50, 0.0  ;;  %6344 = vmatmul.mubr.bf16.vlgmr.msra.gmra.mrb[64].mxu1 %v10840_v20  ;;  %5901 = vmatprep.mubr.bf16.mxu0 %v10900_v3  ;;  %v4222_v5 = vmax.f32 %v4094_v57, 0.0  ;;  %v8914_v20 = vld [vmem:[%s12398_s3 + $0x220] ss:$16 sps:$4 sm:$0xff]   ;;  %v8931_v50 = vld [vmem:[%s12398_s3 + $0x26c] ss:$16 sps:$4 sm:$0xff]  }
 0x1c7   :  { %v11083_v4 = vpack.c.bf16 %v4219_v56, %v4211_v55  ;;  %5973 = vmatpush1.bf16.msra.mxu0 %v8908_v46  ;;  %6353 = vmatprep.mubr.bf16.mxu1 %v10900_v3  ;;  %v11092_v7 = vpack.c.bf16 %v4221_v61, %v4213_v59  ;;  %v3997_v3 = vld [vmem:[%s12399_s1 + $0xd0] sm:$0xff]  ;;  %v3999_v56 = vld [vmem:[%s12399_s1 + $0xe0] sm:$0xff] }
 0x1c8   :  { %v11094_v9 = vpack.c.bf16 %v4220_v63, %v4212_v60  ;;  %6425 = vmatpush1.bf16.msra.mxu1 %v8911_v52  ;;  %v2935_v10 = vpop.f32.mrb[24].mxu0  ;;  %5974 = vmatprep.subr.bf16.mxu0 %v8916_v53  ;;  %v11105_v13 = vpack.c.bf16 %v4222_v5, %v4214_v1  ;;  %v3274_v15 = vpop.f32.mrb[24].mxu1  ;;  %v4000_v60 = vld [vmem:[%s12399_s1 + $0xe8] sm:$0xff]  ;;  %v8934_v5 = vld [vmem:[%s12398_s3 + $0x284] ss:$16 sps:$4 sm:$0xff]  }
 0x1c9   :  { %v4099_v14 = vmul.f32 %v3995_v0, %v2935_v10  ;;  %v2937_v17 = vpop.f32.mrb[25].mxu0  ;;  %6426 = vmatprep.subr.bf16.mxu1 %v8919_v58  ;;  %v4101_v23 = vmul.f32 %v3995_v0, %v3274_v15  ;;  %v3276_v27 = vpop.f32.mrb[25].mxu1  ;;  %v8929_v1 = vld [vmem:[%s12398_s3 + $0x268] ss:$16 sps:$4 sm:$0xff]  }
 0x1ca   :  { %v4100_v26 = vmul.f32 %v3996_v6, %v2937_v17  ;;  %v2939_v31 = vpop.f32.mrb[26].mxu0  ;;  %v4102_v32 = vmul.f32 %v3996_v6, %v3276_v27  ;;  %v3278_v25 = vpop.f32.mrb[26].mxu1 }
 0x1cb   :  { %v4107_v33 = vmul.f32 %v3997_v3, %v2939_v31  ;;  %5975 = vmatpush1.bf16.msra.mxu0 %v8914_v20  ;;  %v2941_v36 = vpop.f32.mrb[27].mxu0  ;;  %v4109_v38 = vmul.f32 %v3997_v3, %v3278_v25  ;;  %v3280_v41 = vpop.f32.mrb[27].mxu1  ;;  %v4227_v45 = vmax.f32 %v4099_v14, 0.0  ;;  %v4229_v51 = vmax.f32 %v4101_v23, 0.0  ;;  %v4002_v3 = vld [vmem:[%s12399_s1 + $0xf8] sm:$0xff] }
 0x1cc   :  { %6427 = vmatpush1.bf16.msra.mxu1 %v8917_v11  ;;  %v4108_v39 = vmul.f32 %v3998_v18, %v2941_v36  ;;  %5976 = vmatprep.subr.bf16.mxu0 %v8922_v12  ;;  %v4110_v47 = vmul.f32 %v3998_v18, %v3280_v41  ;;  %v4228_v52 = vmax.f32 %v4100_v26, 0.0  ;;  %v4230_v57 = vmax.f32 %v4102_v32, 0.0  ;;  %v8937_v12 = vld [vmem:[%s12398_s3 + $0x28c] ss:$16 sps:$4 sm:$0xff]   ;;  %v8932_v31 = vld [vmem:[%s12398_s3 + $0x280] ss:$16 sps:$4 sm:$0xff]  }
 0x1cd   :  { %v4235_v46 = vmax.f32 %v4107_v33, 0.0  ;;  %5902 = vmatmul.mubr.bf16.gmra.mrb[68].mxu0 %v10890_v62  ;;  %6428 = vmatprep.subr.bf16.mxu1 %v8925_v19  ;;  %v4237_v53 = vmax.f32 %v4109_v38, 0.0  ;;  %v8935_v36 = vld [vmem:[%s12398_s3 + $0x288] ss:$16 sps:$4 sm:$0xff]  }
 0x1ce   :  { %v4236_v55 = vmax.f32 %v4108_v39, 0.0  ;;  %6354 = vmatmul.mubr.bf16.gmra.mrb[68].mxu1 %v10890_v62  ;;  %5911 = vmatprep.mubr.bf16.mxu0 %v10950_v49  ;;  %v4238_v59 = vmax.f32 %v4110_v47, 0.0  ;;  %v8926_v62 = vld [vmem:[%s12398_s3 + $0x260] ss:$16 sps:$4 sm:$0xff]  }
 0x1cf   :  { %v11131_v58 = vpack.c.bf16 %v4235_v46, %v4227_v45  ;;  %5977 = vmatpush1.bf16.msra.mxu0 %v8920_v37  ;;  %6363 = vmatprep.mubr.bf16.mxu1 %v10950_v49  ;;  %v11140_v61 = vpack.c.bf16 %v4237_v53, %v4229_v51  ;;  %v4001_v49 = vld [vmem:[%s12399_s1 + $0xf0] sm:$0xff] }
 0x1d0   :  { %v11142_v63 = vpack.c.bf16 %v4236_v55, %v4228_v52  ;;  %6429 = vmatpush1.bf16.msra.mxu1 %v8923_v42  ;;  %v2945_v0 = vpop.f32.mrb[28].mxu0  ;;  %5978 = vmatprep.subr.bf16.mxu0 %v8928_v43  ;;  %v11153_v6 = vpack.c.bf16 %v4238_v59, %v4230_v57  ;;  %v3284_v10 = vpop.f32.mrb[28].mxu1  ;;  %v8940_v37 = vld [vmem:[%s12398_s3 + $0x2a4] ss:$16 sps:$4 sm:$0xff]   ;;  %v8943_v42 = vld [vmem:[%s12398_s3 + $0x2ac] ss:$16 sps:$4 sm:$0xff]  }
 0x1d1   :  { %v4115_v20 = vmul.f32 %v3999_v56, %v2945_v0  ;;  %v2947_v11 = vpop.f32.mrb[29].mxu0  ;;  %6430 = vmatprep.subr.bf16.mxu1 %v8931_v50  ;;  %v4117_v14 = vmul.f32 %v3999_v56, %v3284_v10  ;;  %v3286_v17 = vpop.f32.mrb[29].mxu1  ;;  %v8938_v53 = vld [vmem:[%s12398_s3 + $0x2a0] ss:$16 sps:$4 sm:$0xff]   ;;  %v8946_v57 = vld [vmem:[%s12398_s3 + $0x2c4] ss:$16 sps:$4 sm:$0xff]  }
 0x1d2   :  { %v4116_v15 = vmul.f32 %v4000_v60, %v2947_v11  ;;  %v2949_v18 = vpop.f32.mrb[30].mxu0  ;;  %v4118_v19 = vmul.f32 %v4000_v60, %v3286_v17  ;;  %v3288_v26 = vpop.f32.mrb[30].mxu1  ;;  %v8944_v60 = vld [vmem:[%s12398_s3 + $0x2c0] ss:$16 sps:$4 sm:$0xff]   ;;  %v8952_v0 = vld [vmem:[%s12398_s3 + $0x2e4] ss:$16 sps:$4 sm:$0xff]  }
 0x1d3   :  { %v4123_v23 = vmul.f32 %v4001_v49, %v2949_v18  ;;  %5979 = vmatpush1.bf16.msra.mxu0 %v8926_v62  ;;  %v2951_v27 = vpop.f32.mrb[31].mxu0  ;;  %v4125_v32 = vmul.f32 %v4001_v49, %v3288_v26  ;;  %v3290_v25 = vpop.f32.mrb[31].mxu1  ;;  %v4243_v38 = vmax.f32 %v4115_v20, 0.0  ;;  %v4245_v43 = vmax.f32 %v4117_v14, 0.0  ;;  %v8947_v62 = vld [vmem:[%s12398_s3 + $0x2c8] ss:$16 sps:$4 sm:$0xff]  }
 0x1d4   :  { %6431 = vmatpush1.bf16.msra.mxu1 %v8929_v1  ;;  %v4124_v33 = vmul.f32 %v4002_v3, %v2951_v27  ;;  %5980 = vmatprep.subr.bf16.mxu0 %v8934_v5  ;;  %v4126_v41 = vmul.f32 %v4002_v3, %v3290_v25  ;;  %v4244_v45 = vmax.f32 %v4116_v15, 0.0  ;;  %v4246_v50 = vmax.f32 %v4118_v19, 0.0  ;;  %v8955_v1 = vld [vmem:[%s12398_s3 + $0x2ec] ss:$16 sps:$4 sm:$0xff]   ;;  %v8950_v49 = vld [vmem:[%s12398_s3 + $0x2e0] ss:$16 sps:$4 sm:$0xff]  }
 0x1d5   :  { %v4251_v39 = vmax.f32 %v4123_v23, 0.0  ;;  %5912 = vmatmul.mubr.bf16.gmra.mrb[72].mxu0 %v10940_v44  ;;  %6432 = vmatprep.subr.bf16.mxu1 %v8937_v12  ;;  %v4253_v46 = vmax.f32 %v4125_v32, 0.0  ;;  %v8953_v5 = vld [vmem:[%s12398_s3 + $0x2e8] ss:$16 sps:$4 sm:$0xff]   ;;  %v8958_v20 = vld [vmem:[%s12398_s3 + $0x304] ss:$16 sps:$4 sm:$0xff]  }
 0x1d6   :  { %v4252_v47 = vmax.f32 %v4124_v33, 0.0  ;;  %6364 = vmatmul.mubr.bf16.gmra.mrb[72].mxu1 %v10940_v44  ;;  %5921 = vmatprep.mubr.bf16.mxu0 %v11000_v35  ;;  %v4254_v52 = vmax.f32 %v4126_v41, 0.0  ;;  %v8941_v44 = vld [vmem:[%s12398_s3 + $0x2a8] ss:$16 sps:$4 sm:$0xff]   ;;  %v8964_v11 = vld [vmem:[%s12398_s3 + $0x324] ss:$16 sps:$4 sm:$0xff]  }
 0x1d7   :  { %v11176_v51 = vpack.c.bf16 %v4251_v39, %v4243_v38  ;;  %5981 = vmatpush1.bf16.msra.mxu0 %v8932_v31  ;;  %6373 = vmatprep.mubr.bf16.mxu1 %v11000_v35  ;;  %v11182_v55 = vpack.c.bf16 %v4253_v46, %v4245_v43  ;;  %v8949_v35 = vld [vmem:[%s12398_s3 + $0x2cc] ss:$16 sps:$4 sm:$0xff]   ;;  %v8959_v10 = vld [vmem:[%s12398_s3 + $0x308] ss:$16 sps:$4 sm:$0xff]   ;;  %v8962_v12 = vld [vmem:[%s12398_s3 + $0x320] ss:$16 sps:$4 sm:$0xff]  }
 0x1d8   :  { %v11184_v56 = vpack.c.bf16 %v4252_v47, %v4244_v45  ;;  %6433 = vmatpush1.bf16.msra.mxu1 %v8935_v36  ;;  %5982 = vmatprep.subr.bf16.mxu0 %v8940_v37  ;;  %v11192_v59 = vpack.c.bf16 %v4254_v52, %v4246_v50  ;;  %v8967_v3 = vld [vmem:[%s12398_s3 + $0x32c] ss:$16 sps:$4 sm:$0xff]   ;;  %v8965_v14 = vld [vmem:[%s12398_s3 + $0x328] ss:$16 sps:$4 sm:$0xff]   ;;  %v8970_v15 = vld [vmem:[%s12398_s3 + $0x344] ss:$16 sps:$4 sm:$0xff]  }
 0x1d9   :  { %6434 = vmatprep.subr.bf16.mxu1 %v8943_v42  ;;  %v8971_v17 = vld [vmem:[%s12398_s3 + $0x348] ss:$16 sps:$4 sm:$0xff]   ;;  %v8976_v18 = vld [vmem:[%s12398_s3 + $0x364] ss:$16 sps:$4 sm:$0xff]   ;;  %v8979_v19 = vld [vmem:[%s12398_s3 + $0x36c] ss:$16 sps:$4 sm:$0xff]  }
 0x1da   :  { %v8974_v23 = vld [vmem:[%s12398_s3 + $0x360] ss:$16 sps:$4 sm:$0xff]   ;;  %v8977_v26 = vld [vmem:[%s12398_s3 + $0x368] ss:$16 sps:$4 sm:$0xff]   ;;  %v8982_v27 = vld [vmem:[%s12398_s3 + $0x384] ss:$16 sps:$4 sm:$0xff]  }
 0x1db   :  { %5983 = vmatpush1.bf16.msra.mxu0 %v8938_v53  ;;  %v8983_v31 = vld [vmem:[%s12398_s3 + $0x388] ss:$16 sps:$4 sm:$0xff]   ;;  %v8988_v32 = vld [vmem:[%s12398_s3 + $0x3a4] ss:$16 sps:$4 sm:$0xff]   ;;  %v8991_v33 = vld [vmem:[%s12398_s3 + $0x3ac] ss:$16 sps:$4 sm:$0xff]  }
 0x1dc   :  { %6435 = vmatpush1.bf16.msra.mxu1 %v8941_v44  ;;  %5984 = vmatprep.subr.bf16.mxu0 %v8946_v57  ;;  %v8986_v25 = vld [vmem:[%s12398_s3 + $0x3a0] ss:$16 sps:$4 sm:$0xff]   ;;  %v8989_v36 = vld [vmem:[%s12398_s3 + $0x3a8] ss:$16 sps:$4 sm:$0xff]   ;;  %v8994_v37 = vld [vmem:[%s12398_s3 + $0x3c4] ss:$16 sps:$4 sm:$0xff]  }
 0x1dd   :  { %5922 = vmatmul.mubr.bf16.gmra.mrb[76].mxu0 %v10990_v29  ;;  %6436 = vmatprep.subr.bf16.mxu1 %v8949_v35  ;;  %v8992_v38 = vld [vmem:[%s12398_s3 + $0x3c0] ss:$16 sps:$4 sm:$0xff]   ;;  %v8995_v39 = vld [vmem:[%s12398_s3 + $0x3c8] ss:$16 sps:$4 sm:$0xff]   ;;  %v9000_v41 = vld [vmem:[%s12398_s3 + $0x3e4] ss:$16 sps:$4 sm:$0xff]  }
 0x1de   :  { %6374 = vmatmul.mubr.bf16.gmra.mrb[76].mxu1 %v10990_v29  ;;  %5931 = vmatprep.mubr.bf16.mxu0 %v11051_v22  ;;  %v8961_v29 = vld [vmem:[%s12398_s3 + $0x30c] ss:$16 sps:$4 sm:$0xff]   ;;  %v8998_v43 = vld [vmem:[%s12398_s3 + $0x3e0] ss:$16 sps:$4 sm:$0xff]   ;;  %v9001_v45 = vld [vmem:[%s12398_s3 + $0x3e8] ss:$16 sps:$4 sm:$0xff]  }
 0x1df   :  { %5985 = vmatpush1.bf16.msra.mxu0 %v8944_v60  ;;  %6383 = vmatprep.mubr.bf16.mxu1 %v11051_v22  ;;  %v8956_v22 = vld [vmem:[%s12398_s3 + $0x300] ss:$16 sps:$4 sm:$0xff]   ;;  %v9003_v42 = vld [vmem:[%s12398_s3 + $0x3ec] ss:$16 sps:$4 sm:$0xff]   ;;  %v9006_v46 = vld [vmem:[%s12398_s3 + $0x404] ss:$16 sps:$4 sm:$0xff]  }
 0x1e0   :  { %6437 = vmatpush1.bf16.msra.mxu1 %v8947_v62  ;;  %5986 = vmatprep.subr.bf16.mxu0 %v8952_v0  ;;  %v9009_v47 = vld [vmem:[%s12398_s3 + $0x40c] ss:$16 sps:$4 sm:$0xff]   ;;  %v9007_v50 = vld [vmem:[%s12398_s3 + $0x408] ss:$16 sps:$4 sm:$0xff]   ;;  %v9010_v53 = vld [vmem:[%s12398_s3 + $0x420] ss:$16 sps:$4 sm:$0xff]  }
 0x1e1   :  { %6438 = vmatprep.subr.bf16.mxu1 %v8955_v1  ;;  %v9015_v52 = vld [vmem:[%s12398_s3 + $0x42c] ss:$16 sps:$4 sm:$0xff]   ;;  %v9018_v44 = vld [vmem:[%s12398_s3 + $0x444] ss:$16 sps:$4 sm:$0xff]   ;;  %v9019_v57 = vld [vmem:[%s12398_s3 + $0x448] ss:$16 sps:$4 sm:$0xff]  }
 0x1e2   :  { %v9024_v35 = vld [vmem:[%s12398_s3 + $0x464] ss:$16 sps:$4 sm:$0xff]   ;;  %v9027_v60 = vld [vmem:[%s12398_s3 + $0x46c] ss:$16 sps:$4 sm:$0xff]   ;;  %v9022_v62 = vld [vmem:[%s12398_s3 + $0x460] ss:$16 sps:$4 sm:$0xff]  }
 0x1e3   :  { %5987 = vmatpush1.bf16.msra.mxu0 %v8950_v49  ;;  %v9025_v0 = vld [vmem:[%s12398_s3 + $0x468] ss:$16 sps:$4 sm:$0xff]   ;;  %v9030_v1 = vld [vmem:[%s12398_s3 + $0x484] ss:$16 sps:$4 sm:$0xff]  }
 0x1e4   :  { %6439 = vmatpush1.bf16.msra.mxu1 %v8953_v5  ;;  %5988 = vmatprep.subr.bf16.mxu0 %v8958_v20  ;;  %v9031_v49 = vld [vmem:[%s12398_s3 + $0x488] ss:$16 sps:$4 sm:$0xff]   ;;  %v9036_v5 = vld [vmem:[%s12398_s3 + $0x4a4] ss:$16 sps:$4 sm:$0xff]   ;;  %v9039_v20 = vld [vmem:[%s12398_s3 + $0x4ac] ss:$16 sps:$4 sm:$0xff]  }
 0x1e5   :  { %5932 = vmatmul.mubr.bf16.gmra.mrb[80].mxu0 %v11040_v16  ;;  %6440 = vmatprep.subr.bf16.mxu1 %v8961_v29  ;;  %v9034_v29 = vld [vmem:[%s12398_s3 + $0x4a0] ss:$16 sps:$4 sm:$0xff]  }
 0x1e6   :  { %6384 = vmatmul.mubr.bf16.gmra.mrb[80].mxu1 %v11040_v16  ;;  %5941 = vmatprep.mubr.bf16.mxu0 %v11094_v9  ;;  %v8973_v16 = vld [vmem:[%s12398_s3 + $0x34c] ss:$16 sps:$4 sm:$0xff]  }
 0x1e7   :  { %5989 = vmatpush1.bf16.msra.mxu0 %v8956_v22  ;;  %6393 = vmatprep.mubr.bf16.mxu1 %v11094_v9  ;;  %v8968_v9 = vld [vmem:[%s12398_s3 + $0x340] ss:$16 sps:$4 sm:$0xff]   ;;  %v9037_v22 = vld [vmem:[%s12398_s3 + $0x4a8] ss:$16 sps:$4 sm:$0xff]  }
 0x1e8   :  { %6441 = vmatpush1.bf16.msra.mxu1 %v8959_v10  ;;  %5990 = vmatprep.subr.bf16.mxu0 %v8964_v11  ;;  %v9042_v10 = vld [vmem:[%s12398_s3 + $0x4c4] ss:$16 sps:$4 sm:$0xff]   ;;  %v9043_v11 = vld [vmem:[%s12398_s3 + $0x4c8] ss:$16 sps:$4 sm:$0xff]  }
 0x1e9   :  { %6442 = vmatprep.subr.bf16.mxu1 %v8967_v3  ;;  %v9048_v3 = vld [vmem:[%s12398_s3 + $0x4e4] ss:$16 sps:$4 sm:$0xff]  }
 0x1eb   :  { %5991 = vmatpush1.bf16.msra.mxu0 %v8962_v12  ;;  %v9051_v12 = vld [vmem:[%s12398_s3 + $0x4ec] ss:$16 sps:$4 sm:$0xff]  }
 0x1ec   :  { %6443 = vmatpush1.bf16.msra.mxu1 %v8965_v14  ;;  %5992 = vmatprep.subr.bf16.mxu0 %v8970_v15  ;;  %v9046_v14 = vld [vmem:[%s12398_s3 + $0x4e0] ss:$16 sps:$4 sm:$0xff]   ;;  %v9049_v15 = vld [vmem:[%s12398_s3 + $0x4e8] ss:$16 sps:$4 sm:$0xff]  }
 0x1ed   :  { %5942 = vmatmul.mubr.bf16.gmra.mrb[84].mxu0 %v11083_v4  ;;  %6444 = vmatprep.subr.bf16.mxu1 %v8973_v16  ;;  %v9054_v16 = vld [vmem:[%s12398_s3 + $0x504] ss:$16 sps:$4 sm:$0xff]  }
 0x1ee   :  { %6394 = vmatmul.mubr.bf16.gmra.mrb[84].mxu1 %v11083_v4  ;;  %5951 = vmatprep.mubr.bf16.mxu0 %v11142_v63  ;;  %v8985_v4 = vld [vmem:[%s12398_s3 + $0x38c] ss:$16 sps:$4 sm:$0xff]  }
 0x1ef   :  { %5993 = vmatpush1.bf16.msra.mxu0 %v8968_v9  ;;  %6403 = vmatprep.mubr.bf16.mxu1 %v11142_v63  ;;  %v8980_v63 = vld [vmem:[%s12398_s3 + $0x380] ss:$16 sps:$4 sm:$0xff]   ;;  %v9055_v9 = vld [vmem:[%s12398_s3 + $0x508] ss:$16 sps:$4 sm:$0xff]  }
 0x1f0   :  { %6445 = vmatpush1.bf16.msra.mxu1 %v8971_v17  ;;  %5994 = vmatprep.subr.bf16.mxu0 %v8976_v18  ;;  %v9060_v17 = vld [vmem:[%s12398_s3 + $0x524] ss:$16 sps:$4 sm:$0xff]   ;;  %v9063_v18 = vld [vmem:[%s12398_s3 + $0x52c] ss:$16 sps:$4 sm:$0xff]  }
 0x1f1   :  { %6446 = vmatprep.subr.bf16.mxu1 %v8979_v19  ;;  %v9058_v19 = vld [vmem:[%s12398_s3 + $0x520] ss:$16 sps:$4 sm:$0xff]  }
 0x1f3   :  { %5995 = vmatpush1.bf16.msra.mxu0 %v8974_v23  ;;  %v9061_v23 = vld [vmem:[%s12398_s3 + $0x528] ss:$16 sps:$4 sm:$0xff]  }
 0x1f4   :  { %6447 = vmatpush1.bf16.msra.mxu1 %v8977_v26  ;;  %5996 = vmatprep.subr.bf16.mxu0 %v8982_v27  ;;  %v9066_v26 = vld [vmem:[%s12398_s3 + $0x544] ss:$16 sps:$4 sm:$0xff]   ;;  %v9067_v27 = vld [vmem:[%s12398_s3 + $0x548] ss:$16 sps:$4 sm:$0xff]  }
 0x1f5   :  { %5952 = vmatmul.mubr.bf16.gmra.mrb[88].mxu0 %v11131_v58  ;;  %6448 = vmatprep.subr.bf16.mxu1 %v8985_v4  ;;  %v9072_v4 = vld [vmem:[%s12398_s3 + $0x564] ss:$16 sps:$4 sm:$0xff]  }
 0x1f6   :  { %6404 = vmatmul.mubr.bf16.gmra.mrb[88].mxu1 %v11131_v58  ;;  %5961 = vmatprep.mubr.bf16.mxu0 %v11184_v56  ;;  %v8997_v58 = vld [vmem:[%s12398_s3 + $0x3cc] ss:$16 sps:$4 sm:$0xff]  }
 0x1f7   :  { %5997 = vmatpush1.bf16.msra.mxu0 %v8980_v63  ;;  %6413 = vmatprep.mubr.bf16.mxu1 %v11184_v56  ;;  %v9013_v56 = vld [vmem:[%s12398_s3 + $0x428] ss:$16 sps:$4 sm:$0xff]   ;;  %v9075_v63 = vld [vmem:[%s12398_s3 + $0x56c] ss:$16 sps:$4 sm:$0xff]  }
 0x1f8   :  { %6449 = vmatpush1.bf16.msra.mxu1 %v8983_v31  ;;  %5998 = vmatprep.subr.bf16.mxu0 %v8988_v32  ;;  %v9070_v31 = vld [vmem:[%s12398_s3 + $0x560] ss:$16 sps:$4 sm:$0xff]   ;;  %v9073_v32 = vld [vmem:[%s12398_s3 + $0x568] ss:$16 sps:$4 sm:$0xff]  }
 0x1f9   :  { %6450 = vmatprep.subr.bf16.mxu1 %v8991_v33  ;;  %v9078_v33 = vld [vmem:[%s12398_s3 + $0x584] ss:$16 sps:$4 sm:$0xff]  }
 0x1fb   :  { %5999 = vmatpush1.bf16.msra.mxu0 %v8986_v25  ;;  %v9079_v25 = vld [vmem:[%s12398_s3 + $0x588] ss:$16 sps:$4 sm:$0xff]  }
 0x1fc   :  { %6451 = vmatpush1.bf16.msra.mxu1 %v8989_v36  ;;  %6000 = vmatprep.subr.bf16.mxu0 %v8994_v37  ;;  %v9084_v36 = vld [vmem:[%s12398_s3 + $0x5a4] ss:$16 sps:$4 sm:$0xff]   ;;  %v9087_v37 = vld [vmem:[%s12398_s3 + $0x5ac] ss:$16 sps:$4 sm:$0xff]  }
 0x1fd   :  { %5962 = vmatmul.mubr.bf16.gmra.mrb[92].mxu0 %v11176_v51  ;;  %6452 = vmatprep.subr.bf16.mxu1 %v8997_v58  ;;  %v9082_v58 = vld [vmem:[%s12398_s3 + $0x5a0] ss:$16 sps:$4 sm:$0xff]  }
 0x1fe   :  { %6414 = vmatmul.mubr.bf16.gmra.mrb[92].mxu1 %v11176_v51  ;;  %6004 = vmatprep.mubr.bf16.mxu0 %v10861_v30  ;;  %v9012_v51 = vld [vmem:[%s12398_s3 + $0x424] ss:$16 sps:$4 sm:$0xff]  }
 0x1ff   :  { %6001 = vmatpush1.bf16.msra.mxu0 %v8992_v38  ;;  %6456 = vmatprep.mubr.bf16.mxu1 %v10861_v30  ;;  %v9004_v30 = vld [vmem:[%s12398_s3 + $0x400] ss:$16 sps:$4 sm:$0xff]   ;;  %v9085_v38 = vld [vmem:[%s12398_s3 + $0x5a8] ss:$16 sps:$4 sm:$0xff]  }
 0x200   :  { %6453 = vmatpush1.bf16.msra.mxu1 %v8995_v39  ;;  %6002 = vmatprep.subr.bf16.mxu0 %v9000_v41  ;;  %v9090_v39 = vld [vmem:[%s12398_s3 + $0x5c4] ss:$16 sps:$4 sm:$0xff]   ;;  %v9091_v41 = vld [vmem:[%s12398_s3 + $0x5c8] ss:$16 sps:$4 sm:$0xff]  }
 0x201   :  { %6454 = vmatprep.subr.bf16.mxu1 %v9003_v42  ;;  %v9096_v42 = vld [vmem:[%s12398_s3 + $0x5e4] ss:$16 sps:$4 sm:$0xff]  }
 0x203   :  { %6003 = vmatpush1.bf16.msra.mxu0 %v8998_v43  ;;  %v9099_v43 = vld [vmem:[%s12398_s3 + $0x5ec] ss:$16 sps:$4 sm:$0xff]  }
 0x204   :  { %6455 = vmatpush1.bf16.msra.mxu1 %v9001_v45  ;;  %6085 = vmatprep.subr.bf16.mxu0 %v9006_v46  ;;  %v9094_v45 = vld [vmem:[%s12398_s3 + $0x5e0] ss:$16 sps:$4 sm:$0xff]   ;;  %v9097_v46 = vld [vmem:[%s12398_s3 + $0x5e8] ss:$16 sps:$4 sm:$0xff]  }
 0x205   :  { %6537 = vmatprep.subr.bf16.mxu1 %v9009_v47  ;;  %v9102_v47 = vld [vmem:[%s12398_s3 + $0x604] ss:$16 sps:$4 sm:$0xff]  }
 0x206   :  { %6005 = vmatmul.mubr.bf16.vlgmr.msra.gmra.mrb[64].mxu0 %v10848_v24 }
 0x207   :  { %6457 = vmatmul.mubr.bf16.vlgmr.msra.gmra.mrb[64].mxu1 %v10848_v24  ;;  %6014 = vmatprep.mubr.bf16.mxu0 %v10911_v8  ;;  %v9021_v24 = vld [vmem:[%s12398_s3 + $0x44c] ss:$16 sps:$4 sm:$0xff]  }
 0x208   :  { %6466 = vmatprep.mubr.bf16.mxu1 %v10911_v8  ;;  %6086 = vmatpush1.bf16.msra.mxu0 %v9004_v30  ;;  %v9016_v8 = vld [vmem:[%s12398_s3 + $0x440] ss:$16 sps:$4 sm:$0xff]  }
 0x209   :  { %6538 = vmatpush1.bf16.msra.mxu1 %v9007_v50  ;;  %6087 = vmatprep.subr.bf16.mxu0 %v9012_v51  ;;  %v9244_v50 = vld [vmem:[%s12399_s1] sm:$0xff] }
 0x20a   :  { %6539 = vmatprep.subr.bf16.mxu1 %v9015_v52 }
 0x20c   :  { %6088 = vmatpush1.bf16.msra.mxu0 %v9010_v53 }
 0x20d   :  { %6540 = vmatpush1.bf16.msra.mxu1 %v9013_v56  ;;  %6089 = vmatprep.subr.bf16.mxu0 %v9018_v44  ;;  %v9245_v44 = vld [vmem:[%s12399_s1 + $0x8] sm:$0xff] }
 0x20e   :  { %6015 = vmatmul.mubr.bf16.gmra.mrb[68].mxu0 %v10898_v2  ;;  %6541 = vmatprep.subr.bf16.mxu1 %v9021_v24 }
 0x20f   :  { %6467 = vmatmul.mubr.bf16.gmra.mrb[68].mxu1 %v10898_v2  ;;  %6024 = vmatprep.mubr.bf16.mxu0 %v10961_v54  ;;  %v9033_v2 = vld [vmem:[%s12398_s3 + $0x48c] ss:$16 sps:$4 sm:$0xff]  }
 0x210   :  { %6476 = vmatprep.mubr.bf16.mxu1 %v10961_v54  ;;  %6090 = vmatpush1.bf16.msra.mxu0 %v9016_v8  ;;  %v9028_v54 = vld [vmem:[%s12398_s3 + $0x480] ss:$16 sps:$4 sm:$0xff]  }
 0x211   :  { %6542 = vmatpush1.bf16.msra.mxu1 %v9019_v57  ;;  %6091 = vmatprep.subr.bf16.mxu0 %v9024_v35 }
 0x212   :  { %6543 = vmatprep.subr.bf16.mxu1 %v9027_v60  ;;  %v9246_v60 = vld [vmem:[%s12399_s1 + $0x10] sm:$0xff] }
 0x214   :  { %6092 = vmatpush1.bf16.msra.mxu0 %v9022_v62 }
 0x215   :  { %6544 = vmatpush1.bf16.msra.mxu1 %v9025_v0  ;;  %6093 = vmatprep.subr.bf16.mxu0 %v9030_v1 }
 0x216   :  { %6025 = vmatmul.mubr.bf16.gmra.mrb[72].mxu0 %v10948_v48  ;;  %6545 = vmatprep.subr.bf16.mxu1 %v9033_v2 }
 0x217   :  { %6477 = vmatmul.mubr.bf16.gmra.mrb[72].mxu1 %v10948_v48  ;;  %6034 = vmatprep.mubr.bf16.mxu0 %v11011_v40  ;;  %v9045_v48 = vld [vmem:[%s12398_s3 + $0x4cc] ss:$16 sps:$4 sm:$0xff]  }
 0x218   :  { %6486 = vmatprep.mubr.bf16.mxu1 %v11011_v40  ;;  %6094 = vmatpush1.bf16.msra.mxu0 %v9028_v54  ;;  %v9040_v40 = vld [vmem:[%s12398_s3 + $0x4c0] ss:$16 sps:$4 sm:$0xff]   ;;  %v9247_v54 = vld [vmem:[%s12399_s1 + $0x18] sm:$0xff] }
 0x219   :  { %6546 = vmatpush1.bf16.msra.mxu1 %v9031_v49  ;;  %6095 = vmatprep.subr.bf16.mxu0 %v9036_v5 }
 0x21a   :  { %6547 = vmatprep.subr.bf16.mxu1 %v9039_v20 }
 0x21c   :  { %6096 = vmatpush1.bf16.msra.mxu0 %v9034_v29 }
 0x21d   :  { %6548 = vmatpush1.bf16.msra.mxu1 %v9037_v22  ;;  %6097 = vmatprep.subr.bf16.mxu0 %v9042_v10 }
 0x21e   :  { %6035 = vmatmul.mubr.bf16.gmra.mrb[76].mxu0 %v10998_v34  ;;  %6549 = vmatprep.subr.bf16.mxu1 %v9045_v48 }
 0x21f   :  { %6487 = vmatmul.mubr.bf16.gmra.mrb[76].mxu1 %v10998_v34  ;;  %6044 = vmatprep.mubr.bf16.mxu0 %v11060_v28  ;;  %v9057_v34 = vld [vmem:[%s12398_s3 + $0x50c] ss:$16 sps:$4 sm:$0xff]  }
 0x220   :  { %6496 = vmatprep.mubr.bf16.mxu1 %v11060_v28  ;;  %6098 = vmatpush1.bf16.msra.mxu0 %v9040_v40  ;;  %v9052_v28 = vld [vmem:[%s12398_s3 + $0x500] ss:$16 sps:$4 sm:$0xff]  }
 0x221   :  { %6550 = vmatpush1.bf16.msra.mxu1 %v9043_v11  ;;  %6099 = vmatprep.subr.bf16.mxu0 %v9048_v3 }
 0x222   :  { %6551 = vmatprep.subr.bf16.mxu1 %v9051_v12 }
 0x224   :  { %6100 = vmatpush1.bf16.msra.mxu0 %v9046_v14 }
 0x225   :  { %6552 = vmatpush1.bf16.msra.mxu1 %v9049_v15  ;;  %6101 = vmatprep.subr.bf16.mxu0 %v9054_v16 }
 0x226   :  { %6045 = vmatmul.mubr.bf16.gmra.mrb[80].mxu0 %v11049_v21  ;;  %6553 = vmatprep.subr.bf16.mxu1 %v9057_v34 }
 0x227   :  { %6497 = vmatmul.mubr.bf16.gmra.mrb[80].mxu1 %v11049_v21  ;;  %6054 = vmatprep.mubr.bf16.mxu0 %v11105_v13  ;;  %v9069_v21 = vld [vmem:[%s12398_s3 + $0x54c] ss:$16 sps:$4 sm:$0xff]  }
 0x228   :  { %6506 = vmatprep.mubr.bf16.mxu1 %v11105_v13  ;;  %6102 = vmatpush1.bf16.msra.mxu0 %v9052_v28  ;;  %v9064_v13 = vld [vmem:[%s12398_s3 + $0x540] ss:$16 sps:$4 sm:$0xff]  }
 0x229   :  { %6554 = vmatpush1.bf16.msra.mxu1 %v9055_v9  ;;  %6103 = vmatprep.subr.bf16.mxu0 %v9060_v17  ;;  %v9100_v28 = vld [vmem:[%s12398_s3 + $0x600] ss:$16 sps:$4 sm:$0xff]   ;;  %v9103_v9 = vld [vmem:[%s12398_s3 + $0x608] ss:$16 sps:$4 sm:$0xff]  }
 0x22a   :  { %6555 = vmatprep.subr.bf16.mxu1 %v9063_v18  ;;  %v9248_v18 = vld [vmem:[%s12399_s1 + $0x20] sm:$0xff] }
 0x22c   :  { %6104 = vmatpush1.bf16.msra.mxu0 %v9058_v19 }
 0x22d   :  { %6556 = vmatpush1.bf16.msra.mxu1 %v9061_v23  ;;  %6105 = vmatprep.subr.bf16.mxu0 %v9066_v26 }
 0x22e   :  { %6055 = vmatmul.mubr.bf16.gmra.mrb[84].mxu0 %v11092_v7  ;;  %6557 = vmatprep.subr.bf16.mxu1 %v9069_v21  ;;  %v9108_v21 = vld [vmem:[%s12398_s3 + $0x624] ss:$16 sps:$4 sm:$0xff]  }
 0x22f   :  { %6507 = vmatmul.mubr.bf16.gmra.mrb[84].mxu1 %v11092_v7  ;;  %6064 = vmatprep.mubr.bf16.mxu0 %v11153_v6  ;;  %v9081_v7 = vld [vmem:[%s12398_s3 + $0x58c] ss:$16 sps:$4 sm:$0xff]  }
 0x230   :  { %6516 = vmatprep.mubr.bf16.mxu1 %v11153_v6  ;;  %6106 = vmatpush1.bf16.msra.mxu0 %v9064_v13  ;;  %v9076_v6 = vld [vmem:[%s12398_s3 + $0x580] ss:$16 sps:$4 sm:$0xff]   ;;  %v9111_v13 = vld [vmem:[%s12398_s3 + $0x62c] ss:$16 sps:$4 sm:$0xff]  }
 0x231   :  { %6558 = vmatpush1.bf16.msra.mxu1 %v9067_v27  ;;  %6107 = vmatprep.subr.bf16.mxu0 %v9072_v4  ;;  %v9249_v4 = vld [vmem:[%s12399_s1 + $0x28] sm:$0xff] }
 0x232   :  { %6559 = vmatprep.subr.bf16.mxu1 %v9075_v63 }
 0x234   :  { %6108 = vmatpush1.bf16.msra.mxu0 %v9070_v31 }
 0x235   :  { %6560 = vmatpush1.bf16.msra.mxu1 %v9073_v32  ;;  %6109 = vmatprep.subr.bf16.mxu0 %v9078_v33 }
 0x236   :  { %6065 = vmatmul.mubr.bf16.gmra.mrb[88].mxu0 %v11140_v61  ;;  %6561 = vmatprep.subr.bf16.mxu1 %v9081_v7  ;;  %v9250_v7 = vld [vmem:[%s12399_s1 + $0x30] sm:$0xff] }
 0x237   :  { %6517 = vmatmul.mubr.bf16.gmra.mrb[88].mxu1 %v11140_v61  ;;  %6074 = vmatprep.mubr.bf16.mxu0 %v11192_v59  ;;  %v9093_v61 = vld [vmem:[%s12398_s3 + $0x5cc] ss:$16 sps:$4 sm:$0xff]  }
 0x238   :  { %6526 = vmatprep.mubr.bf16.mxu1 %v11192_v59  ;;  %6110 = vmatpush1.bf16.msra.mxu0 %v9076_v6  ;;  %v9088_v59 = vld [vmem:[%s12398_s3 + $0x5c0] ss:$16 sps:$4 sm:$0xff]  }
 0x239   :  { %6562 = vmatpush1.bf16.msra.mxu1 %v9079_v25  ;;  %6111 = vmatprep.subr.bf16.mxu0 %v9084_v36 }
 0x23a   :  { %6563 = vmatprep.subr.bf16.mxu1 %v9087_v37 }
 0x23c   :  { %6112 = vmatpush1.bf16.msra.mxu0 %v9082_v58  ;;  %v9251_v58 = vld [vmem:[%s12399_s1 + $0x38] sm:$0xff] }
 0x23d   :  { %6564 = vmatpush1.bf16.msra.mxu1 %v9085_v38  ;;  %6113 = vmatprep.subr.bf16.mxu0 %v9090_v39 }
 0x23e   :  { %6075 = vmatmul.mubr.bf16.gmra.mrb[92].mxu0 %v11182_v55  ;;  %6565 = vmatprep.subr.bf16.mxu1 %v9093_v61  ;;  %v9106_v61 = vld [vmem:[%s12398_s3 + $0x620] ss:$16 sps:$4 sm:$0xff]  }
 0x23f   :  { %6527 = vmatmul.mubr.bf16.gmra.mrb[92].mxu1 %v11182_v55  ;;  %v9105_v55 = vld [vmem:[%s12398_s3 + $0x60c] ss:$16 sps:$4 sm:$0xff]  }
 0x240   :  { %6114 = vmatpush1.bf16.msra.mxu0 %v9088_v59  ;;  %v9109_v59 = vld [vmem:[%s12398_s3 + $0x628] ss:$16 sps:$4 sm:$0xff]  }
 0x241   :  { %6566 = vmatpush1.bf16.msra.mxu1 %v9091_v41  ;;  %6115 = vmatprep.subr.bf16.mxu0 %v9096_v42 }
 0x242   :  { %6567 = vmatprep.subr.bf16.mxu1 %v9099_v43 }
 0x244   :  { %6116 = vmatpush1.bf16.msra.mxu0 %v9094_v45  ;;  %v9114_v45 = vld [vmem:[%s12398_s3 + $0x644] ss:$16 sps:$4 sm:$0xff]  }
 0x245   :  { %6568 = vmatpush1.bf16.msra.mxu1 %v9097_v46  ;;  %6198 = vmatprep.subr.bf16.mxu0 %v9102_v47  ;;  %v9117_v46 = vld [vmem:[%s12398_s3 + $0x64c] ss:$16 sps:$4 sm:$0xff]  }
 0x246   :  { %6650 = vmatprep.subr.bf16.mxu1 %v9105_v55 }
 0x258   :  { %v3553_v30 = vpop.f32.mrb[32].mxu0  ;;  %v3892_v52 = vpop.f32.mrb[32].mxu1 }
 0x259   :  { %v4007_v51 = vmul.f32 %v9244_v50, %v3553_v30  ;;  %v3555_v53 = vpop.f32.mrb[33].mxu0  ;;  %v4009_v56 = vmul.f32 %v9244_v50, %v3892_v52  ;;  %v3894_v8 = vpop.f32.mrb[33].mxu1 }
 0x25a   :  { %v4008_v24 = vmul.f32 %v9245_v44, %v3555_v53  ;;  %v3557_v57 = vpop.f32.mrb[34].mxu0  ;;  %v4010_v35 = vmul.f32 %v9245_v44, %v3894_v8  ;;  %v3896_v0 = vpop.f32.mrb[34].mxu1  ;;  %v9112_v8 = vld [vmem:[%s12398_s3 + $0x640] ss:$16 sps:$4 sm:$0xff]  }
 0x25b   :  { %v4015_v62 = vmul.f32 %v9246_v60, %v3557_v57  ;;  %v3559_v1 = vpop.f32.mrb[35].mxu0  ;;  %v4017_v2 = vmul.f32 %v9246_v60, %v3896_v0  ;;  %v3898_v5 = vpop.f32.mrb[35].mxu1  ;;  %v4135_v20 = vmax.f32 %v4007_v51, 0.0  ;;  %v4137_v10 = vmax.f32 %v4009_v56, 0.0  ;;  %v9115_v57 = vld [vmem:[%s12398_s3 + $0x648] ss:$16 sps:$4 sm:$0xff]  }
 0x25c   :  { %v4016_v49 = vmul.f32 %v9247_v54, %v3559_v1  ;;  %v4018_v22 = vmul.f32 %v9247_v54, %v3898_v5  ;;  %v4136_v48 = vmax.f32 %v4008_v24, 0.0  ;;  %v4138_v3 = vmax.f32 %v4010_v35, 0.0  ;;  %v9252_v60 = vld [vmem:[%s12399_s1 + $0x40] sm:$0xff]  ;;  %v9123_v54 = vld [vmem:[%s12398_s3 + $0x66c] ss:$16 sps:$4 sm:$0xff]  }
 0x25d   :  { %v4143_v29 = vmax.f32 %v4015_v62, 0.0  ;;  %v4145_v40 = vmax.f32 %v4017_v2, 0.0  ;;  %v9120_v2 = vld [vmem:[%s12398_s3 + $0x664] ss:$16 sps:$4 sm:$0xff]   ;;  %v9253_v5 = vld [vmem:[%s12399_s1 + $0x48] sm:$0xff] }
 0x25e   :  { %v4144_v11 = vmax.f32 %v4016_v49, 0.0  ;;  %v4146_v14 = vmax.f32 %v4018_v22, 0.0 }
 0x25f   :  { %v4263_v12 = vpack.c.bf16 %v4143_v29, %v4135_v20  ;;  %v11571_v15 = vpack.c.bf16 %v4145_v40, %v4137_v10 }
 0x260   :  { %v4264_v16 = vpack.c.bf16 %v4144_v11, %v4136_v48  ;;  %v3563_v34 = vpop.f32.mrb[36].mxu0  ;;  %v11579_v17 = vpack.c.bf16 %v4146_v14, %v4138_v3  ;;  %v3902_v23 = vpop.f32.mrb[36].mxu1  ;;  %v9254_v48 = vld [vmem:[%s12399_s1 + $0x50] sm:$0xff]  ;;  %v9255_v14 = vld [vmem:[%s12399_s1 + $0x58] sm:$0xff] }
 0x261   :  { %v4023_v19 = vmul.f32 %v9248_v18, %v3563_v34  ;;  %v3565_v26 = vpop.f32.mrb[37].mxu0  ;;  %v4025_v27 = vmul.f32 %v9248_v18, %v3902_v23  ;;  %v3904_v31 = vpop.f32.mrb[37].mxu1 }
 0x262   :  { %v4024_v63 = vmul.f32 %v9249_v4, %v3565_v26  ;;  %v3567_v32 = vpop.f32.mrb[38].mxu0  ;;  %6117 = vmatprep.mubr.bf16.mxu0 %v4264_v16  ;;  %6569 = vmatprep.mubr.bf16.mxu1 %v4264_v16  ;;  %v4026_v33 = vmul.f32 %v9249_v4, %v3904_v31  ;;  %v3906_v25 = vpop.f32.mrb[38].mxu1  ;;  %v9126_v26 = vld [vmem:[%s12398_s3 + $0x684] ss:$16 sps:$4 sm:$0xff]  }
 0x263   :  { %v4031_v6 = vmul.f32 %v9250_v7, %v3567_v32  ;;  %v3569_v36 = vpop.f32.mrb[39].mxu0  ;;  %6118 = vmatmul.mubr.bf16.vlgmr.msra.gmra.mrb[64].mxu0 %v4263_v12  ;;  %6570 = vmatmul.mubr.bf16.vlgmr.msra.gmra.mrb[64].mxu1 %v4263_v12  ;;  %v4033_v37 = vmul.f32 %v9250_v7, %v3906_v25  ;;  %v3908_v39 = vpop.f32.mrb[39].mxu1  ;;  %v4151_v41 = vmax.f32 %v4023_v19, 0.0  ;;  %v4153_v47 = vmax.f32 %v4025_v27, 0.0 }
 0x264   :  { %v4032_v38 = vmul.f32 %v9251_v58, %v3569_v36  ;;  %6199 = vmatpush1.bf16.msra.mxu0 %v9100_v28  ;;  %6651 = vmatpush1.bf16.msra.mxu1 %v9103_v9  ;;  %v4034_v43 = vmul.f32 %v9251_v58, %v3908_v39  ;;  %v4152_v55 = vmax.f32 %v4024_v63, 0.0  ;;  %v4154_v51 = vmax.f32 %v4026_v33, 0.0  ;;  %v9118_v28 = vld [vmem:[%s12398_s3 + $0x660] ss:$16 sps:$4 sm:$0xff]   ;;  %v9121_v9 = vld [vmem:[%s12398_s3 + $0x668] ss:$16 sps:$4 sm:$0xff]  }
 0x265   :  { %v4159_v42 = vmax.f32 %v4031_v6, 0.0  ;;  %6200 = vmatprep.subr.bf16.mxu0 %v9108_v21  ;;  %6652 = vmatprep.subr.bf16.mxu1 %v9111_v13  ;;  %v4161_v30 = vmax.f32 %v4033_v37, 0.0  ;;  %v9129_v21 = vld [vmem:[%s12398_s3 + $0x68c] ss:$16 sps:$4 sm:$0xff]   ;;  %v9124_v36 = vld [vmem:[%s12398_s3 + $0x680] ss:$16 sps:$4 sm:$0xff]  }
 0x266   :  { %v4160_v50 = vmax.f32 %v4032_v38, 0.0  ;;  %v4162_v53 = vmax.f32 %v4034_v43, 0.0  ;;  %v9127_v37 = vld [vmem:[%s12398_s3 + $0x688] ss:$16 sps:$4 sm:$0xff]   ;;  %v9256_v38 = vld [vmem:[%s12399_s1 + $0x60] sm:$0xff] }
 0x267   :  { %v4271_v52 = vpack.c.bf16 %v4159_v42, %v4151_v41  ;;  %v11611_v56 = vpack.c.bf16 %v4161_v30, %v4153_v47  ;;  %v9132_v41 = vld [vmem:[%s12398_s3 + $0x6a4] ss:$16 sps:$4 sm:$0xff]   ;;  %v9135_v42 = vld [vmem:[%s12398_s3 + $0x6ac] ss:$16 sps:$4 sm:$0xff]  }
 0x268   :  { %v4272_v44 = vpack.c.bf16 %v4160_v50, %v4152_v55  ;;  %v3573_v24 = vpop.f32.mrb[40].mxu0  ;;  %6201 = vmatpush1.bf16.msra.mxu0 %v9106_v61  ;;  %6653 = vmatpush1.bf16.msra.mxu1 %v9109_v59  ;;  %v11619_v35 = vpack.c.bf16 %v4162_v53, %v4154_v51  ;;  %v3912_v0 = vpop.f32.mrb[40].mxu1  ;;  %v9258_v50 = vld [vmem:[%s12399_s1 + $0x70] sm:$0xff] }
 0x269   :  { %v4039_v62 = vmul.f32 %v9252_v60, %v3573_v24  ;;  %v3575_v1 = vpop.f32.mrb[41].mxu0  ;;  %6202 = vmatprep.subr.bf16.mxu0 %v9114_v45  ;;  %6654 = vmatprep.subr.bf16.mxu1 %v9117_v46  ;;  %v4041_v49 = vmul.f32 %v9252_v60, %v3912_v0  ;;  %v3914_v29 = vpop.f32.mrb[41].mxu1  ;;  %v9257_v45 = vld [vmem:[%s12399_s1 + $0x68] sm:$0xff]  ;;  %v9259_v24 = vld [vmem:[%s12399_s1 + $0x78] sm:$0xff]  ;;  %v9130_v60 = vld [vmem:[%s12398_s3 + $0x6a0] ss:$16 sps:$4 sm:$0xff]  }
 0x26a   :  { %v4040_v20 = vmul.f32 %v9253_v5, %v3575_v1  ;;  %v3577_v22 = vpop.f32.mrb[42].mxu0  ;;  %6127 = vmatprep.mubr.bf16.mxu0 %v4272_v44  ;;  %6579 = vmatprep.mubr.bf16.mxu1 %v4272_v44  ;;  %v4042_v10 = vmul.f32 %v9253_v5, %v3914_v29  ;;  %v3916_v11 = vpop.f32.mrb[42].mxu1 }
 0x26b   :  { %v4047_v40 = vmul.f32 %v9254_v48, %v3577_v22  ;;  %v3579_v3 = vpop.f32.mrb[43].mxu0  ;;  %6128 = vmatmul.mubr.bf16.gmra.mrb[68].mxu0 %v4271_v52  ;;  %6580 = vmatmul.mubr.bf16.gmra.mrb[68].mxu1 %v4271_v52  ;;  %v4049_v12 = vmul.f32 %v9254_v48, %v3916_v11  ;;  %v3918_v34 = vpop.f32.mrb[43].mxu1  ;;  %v4167_v18 = vmax.f32 %v4039_v62, 0.0  ;;  %v4169_v13 = vmax.f32 %v4041_v49, 0.0  ;;  %v9133_v62 = vld [vmem:[%s12398_s3 + $0x6a8] ss:$16 sps:$4 sm:$0xff]  }
 0x26c   :  { %v4048_v16 = vmul.f32 %v9255_v14, %v3579_v3  ;;  %6203 = vmatpush1.bf16.msra.mxu0 %v9112_v8  ;;  %6655 = vmatpush1.bf16.msra.mxu1 %v9115_v57  ;;  %v4050_v23 = vmul.f32 %v9255_v14, %v3918_v34  ;;  %v4168_v27 = vmax.f32 %v4040_v20, 0.0  ;;  %v4170_v31 = vmax.f32 %v4042_v10, 0.0  ;;  %v9141_v49 = vld [vmem:[%s12398_s3 + $0x6cc] ss:$16 sps:$4 sm:$0xff]   ;;  %v9136_v14 = vld [vmem:[%s12398_s3 + $0x6c0] ss:$16 sps:$4 sm:$0xff]  }
 0x26d   :  { %v4175_v19 = vmax.f32 %v4047_v40, 0.0  ;;  %6204 = vmatprep.subr.bf16.mxu0 %v9120_v2  ;;  %6656 = vmatprep.subr.bf16.mxu1 %v9123_v54  ;;  %v4177_v4 = vmax.f32 %v4049_v12, 0.0  ;;  %v9138_v54 = vld [vmem:[%s12398_s3 + $0x6c4] ss:$16 sps:$4 sm:$0xff]  }
 0x26e   :  { %v4176_v63 = vmax.f32 %v4048_v16, 0.0  ;;  %v4178_v33 = vmax.f32 %v4050_v23, 0.0  ;;  %v9139_v16 = vld [vmem:[%s12398_s3 + $0x6c8] ss:$16 sps:$4 sm:$0xff]   ;;  %v9144_v23 = vld [vmem:[%s12398_s3 + $0x6e4] ss:$16 sps:$4 sm:$0xff]  }
 0x26f   :  { %v4279_v32 = vpack.c.bf16 %v4175_v19, %v4167_v18  ;;  %v11651_v7 = vpack.c.bf16 %v4177_v4, %v4169_v13  ;;  %v9261_v13 = vld [vmem:[%s12399_s1 + $0x88] sm:$0xff] }
 0x270   :  { %v4280_v6 = vpack.c.bf16 %v4176_v63, %v4168_v27  ;;  %v3583_v25 = vpop.f32.mrb[44].mxu0  ;;  %6205 = vmatpush1.bf16.msra.mxu0 %v9118_v28  ;;  %6657 = vmatpush1.bf16.msra.mxu1 %v9121_v9  ;;  %v11659_v58 = vpack.c.bf16 %v4178_v33, %v4170_v31  ;;  %v3922_v61 = vpop.f32.mrb[44].mxu1  ;;  %v9260_v28 = vld [vmem:[%s12399_s1 + $0x80] sm:$0xff] }
 0x271   :  { %v4055_v39 = vmul.f32 %v9256_v38, %v3583_v25  ;;  %v3585_v59 = vpop.f32.mrb[45].mxu0  ;;  %6206 = vmatprep.subr.bf16.mxu0 %v9126_v26  ;;  %6658 = vmatprep.subr.bf16.mxu1 %v9129_v21  ;;  %v4057_v43 = vmul.f32 %v9256_v38, %v3922_v61  ;;  %v3924_v47 = vpop.f32.mrb[45].mxu1  ;;  %v9147_v26 = vld [vmem:[%s12398_s3 + $0x6ec] ss:$16 sps:$4 sm:$0xff]   ;;  %v9142_v61 = vld [vmem:[%s12398_s3 + $0x6e0] ss:$16 sps:$4 sm:$0xff]  }
 0x272   :  { %v4056_v46 = vmul.f32 %v9257_v45, %v3585_v59  ;;  %v3587_v55 = vpop.f32.mrb[46].mxu0  ;;  %6137 = vmatprep.mubr.bf16.mxu0 %v4280_v6  ;;  %6589 = vmatprep.mubr.bf16.mxu1 %v4280_v6  ;;  %v4058_v30 = vmul.f32 %v9257_v45, %v3924_v47  ;;  %v3926_v52 = vpop.f32.mrb[46].mxu1  ;;  %v9145_v59 = vld [vmem:[%s12398_s3 + $0x6e8] ss:$16 sps:$4 sm:$0xff]   ;;  %v9150_v45 = vld [vmem:[%s12398_s3 + $0x704] ss:$16 sps:$4 sm:$0xff]  }
 0x273   :  { %v4063_v51 = vmul.f32 %v9258_v50, %v3587_v55  ;;  %v3589_v53 = vpop.f32.mrb[47].mxu0  ;;  %6138 = vmatmul.mubr.bf16.gmra.mrb[72].mxu0 %v4279_v32  ;;  %6590 = vmatmul.mubr.bf16.gmra.mrb[72].mxu1 %v4279_v32  ;;  %v4065_v44 = vmul.f32 %v9258_v50, %v3926_v52  ;;  %v3928_v57 = vpop.f32.mrb[47].mxu1  ;;  %v4183_v0 = vmax.f32 %v4055_v39, 0.0  ;;  %v4185_v5 = vmax.f32 %v4057_v43, 0.0  ;;  %v9262_v32 = vld [vmem:[%s12399_s1 + $0x90] sm:$0xff] }
 0x274   :  { %v4064_v8 = vmul.f32 %v9259_v24, %v3589_v53  ;;  %6207 = vmatpush1.bf16.msra.mxu0 %v9124_v36  ;;  %6659 = vmatpush1.bf16.msra.mxu1 %v9127_v37  ;;  %v4066_v2 = vmul.f32 %v9259_v24, %v3928_v57  ;;  %v4184_v20 = vmax.f32 %v4056_v46, 0.0  ;;  %v4186_v10 = vmax.f32 %v4058_v30, 0.0  ;;  %v9263_v37 = vld [vmem:[%s12399_s1 + $0x98] sm:$0xff]  ;;  %v9148_v57 = vld [vmem:[%s12398_s3 + $0x700] ss:$16 sps:$4 sm:$0xff]  }
 0x275   :  { %v4191_v1 = vmax.f32 %v4063_v51, 0.0  ;;  %6208 = vmatprep.subr.bf16.mxu0 %v9132_v41  ;;  %6660 = vmatprep.subr.bf16.mxu1 %v9135_v42  ;;  %v4193_v29 = vmax.f32 %v4065_v44, 0.0  ;;  %v9153_v46 = vld [vmem:[%s12398_s3 + $0x70c] ss:$16 sps:$4 sm:$0xff]  }
 0x276   :  { %v4192_v22 = vmax.f32 %v4064_v8, 0.0  ;;  %v4194_v40 = vmax.f32 %v4066_v2, 0.0 }
 0x277   :  { %v4287_v48 = vpack.c.bf16 %v4191_v1, %v4183_v0  ;;  %v11691_v11 = vpack.c.bf16 %v4193_v29, %v4185_v5  ;;  %v9264_v0 = vld [vmem:[%s12399_s1 + $0xa0] sm:$0xff]  ;;  %v9159_v5 = vld [vmem:[%s12398_s3 + $0x72c] ss:$16 sps:$4 sm:$0xff]  }
 0x278   :  { %v4288_v3 = vpack.c.bf16 %v4192_v22, %v4184_v20  ;;  %v3593_v12 = vpop.f32.mrb[48].mxu0  ;;  %6209 = vmatpush1.bf16.msra.mxu0 %v9130_v60  ;;  %6661 = vmatpush1.bf16.msra.mxu1 %v9133_v62  ;;  %v11699_v34 = vpack.c.bf16 %v4194_v40, %v4186_v10  ;;  %v3932_v18 = vpop.f32.mrb[48].mxu1  ;;  %v9151_v60 = vld [vmem:[%s12398_s3 + $0x708] ss:$16 sps:$4 sm:$0xff]  }
 0x279   :  { %v4071_v9 = vmul.f32 %v9260_v28, %v3593_v12  ;;  %v3595_v19 = vpop.f32.mrb[49].mxu0  ;;  %6210 = vmatprep.subr.bf16.mxu0 %v9138_v54  ;;  %6662 = vmatprep.subr.bf16.mxu1 %v9141_v49  ;;  %v4073_v21 = vmul.f32 %v9260_v28, %v3932_v18  ;;  %v3934_v4 = vpop.f32.mrb[49].mxu1  ;;  %v9156_v49 = vld [vmem:[%s12398_s3 + $0x724] ss:$16 sps:$4 sm:$0xff]   ;;  %v9265_v29 = vld [vmem:[%s12399_s1 + $0xa8] sm:$0xff] }
 0x27a   :  { %v4072_v27 = vmul.f32 %v9261_v13, %v3595_v19  ;;  %v3597_v63 = vpop.f32.mrb[50].mxu0  ;;  %6147 = vmatprep.mubr.bf16.mxu0 %v4288_v3  ;;  %6599 = vmatprep.mubr.bf16.mxu1 %v4288_v3  ;;  %v4074_v31 = vmul.f32 %v9261_v13, %v3934_v4  ;;  %v3936_v6 = vpop.f32.mrb[50].mxu1  ;;  %v9266_v3 = vld [vmem:[%s12399_s1 + $0xb0] sm:$0xff] }
 0x27b   :  { %v4079_v33 = vmul.f32 %v9262_v32, %v3597_v63  ;;  %v3599_v25 = vpop.f32.mrb[51].mxu0  ;;  %6148 = vmatmul.mubr.bf16.gmra.mrb[76].mxu0 %v4287_v48  ;;  %6600 = vmatmul.mubr.bf16.gmra.mrb[76].mxu1 %v4287_v48  ;;  %v4081_v36 = vmul.f32 %v9262_v32, %v3936_v6  ;;  %v3938_v39 = vpop.f32.mrb[51].mxu1  ;;  %v4199_v41 = vmax.f32 %v4071_v9, 0.0  ;;  %v4201_v47 = vmax.f32 %v4073_v21, 0.0  ;;  %v9267_v9 = vld [vmem:[%s12399_s1 + $0xb8] sm:$0xff] }
 0x27c   :  { %v4080_v38 = vmul.f32 %v9263_v37, %v3599_v25  ;;  %6211 = vmatpush1.bf16.msra.mxu0 %v9136_v14  ;;  %6663 = vmatpush1.bf16.msra.mxu1 %v9139_v16  ;;  %v4082_v43 = vmul.f32 %v9263_v37, %v3938_v39  ;;  %v4200_v55 = vmax.f32 %v4072_v27, 0.0  ;;  %v4202_v51 = vmax.f32 %v4074_v31, 0.0  ;;  %v9162_v4 = vld [vmem:[%s12398_s3 + $0x744] ss:$16 sps:$4 sm:$0xff]   ;;  %v9165_v63 = vld [vmem:[%s12398_s3 + $0x74c] ss:$16 sps:$4 sm:$0xff]  }
 0x27d   :  { %v4207_v42 = vmax.f32 %v4079_v33, 0.0  ;;  %6212 = vmatprep.subr.bf16.mxu0 %v9144_v23  ;;  %6664 = vmatprep.subr.bf16.mxu1 %v9147_v26  ;;  %v4209_v30 = vmax.f32 %v4081_v36, 0.0  ;;  %v9154_v23 = vld [vmem:[%s12398_s3 + $0x720] ss:$16 sps:$4 sm:$0xff]   ;;  %v9157_v26 = vld [vmem:[%s12398_s3 + $0x728] ss:$16 sps:$4 sm:$0xff]  }
 0x27e   :  { %v4208_v50 = vmax.f32 %v4080_v38, 0.0  ;;  %v4210_v53 = vmax.f32 %v4082_v43, 0.0  ;;  %v9268_v43 = vld [vmem:[%s12399_s1 + $0xc0] sm:$0xff] }
 0x27f   :  { %v4295_v52 = vpack.c.bf16 %v4207_v42, %v4199_v41  ;;  %v11731_v44 = vpack.c.bf16 %v4209_v30, %v4201_v47  ;;  %v9163_v41 = vld [vmem:[%s12398_s3 + $0x748] ss:$16 sps:$4 sm:$0xff]   ;;  %v9171_v30 = vld [vmem:[%s12398_s3 + $0x76c] ss:$16 sps:$4 sm:$0xff]  }
 0x280   :  { %v4296_v24 = vpack.c.bf16 %v4208_v50, %v4200_v55  ;;  %v3603_v8 = vpop.f32.mrb[52].mxu0  ;;  %6213 = vmatpush1.bf16.msra.mxu0 %v9142_v61  ;;  %6665 = vmatpush1.bf16.msra.mxu1 %v9145_v59  ;;  %v11739_v62 = vpack.c.bf16 %v4210_v53, %v4202_v51  ;;  %v3942_v2 = vpop.f32.mrb[52].mxu1  ;;  %v9160_v59 = vld [vmem:[%s12398_s3 + $0x740] ss:$16 sps:$4 sm:$0xff]   ;;  %v9168_v55 = vld [vmem:[%s12398_s3 + $0x764] ss:$16 sps:$4 sm:$0xff]  }
 0x281   :  { %v4087_v1 = vmul.f32 %v9264_v0, %v3603_v8  ;;  %v3605_v54 = vpop.f32.mrb[53].mxu0  ;;  %6214 = vmatprep.subr.bf16.mxu0 %v9150_v45  ;;  %6666 = vmatprep.subr.bf16.mxu1 %v9153_v46  ;;  %v4089_v20 = vmul.f32 %v9264_v0, %v3942_v2  ;;  %v3944_v10 = vpop.f32.mrb[53].mxu1  ;;  %v9269_v51 = vld [vmem:[%s12399_s1 + $0xc8] sm:$0xff] }
 0x282   :  { %v4088_v22 = vmul.f32 %v9265_v29, %v3605_v54  ;;  %v3607_v48 = vpop.f32.mrb[54].mxu0  ;;  %6157 = vmatprep.mubr.bf16.mxu0 %v4296_v24  ;;  %6609 = vmatprep.mubr.bf16.mxu1 %v4296_v24  ;;  %v4090_v40 = vmul.f32 %v9265_v29, %v3944_v10  ;;  %v3946_v14 = vpop.f32.mrb[54].mxu1  ;;  %v9271_v54 = vld [vmem:[%s12399_s1 + $0xd8] sm:$0xff] }
 0x283   :  { %v4095_v12 = vmul.f32 %v9266_v3, %v3607_v48  ;;  %v3609_v16 = vpop.f32.mrb[55].mxu0  ;;  %6158 = vmatmul.mubr.bf16.gmra.mrb[80].mxu0 %v4295_v52  ;;  %6610 = vmatmul.mubr.bf16.gmra.mrb[80].mxu1 %v4295_v52  ;;  %v4097_v28 = vmul.f32 %v9266_v3, %v3946_v14  ;;  %v3948_v19 = vpop.f32.mrb[55].mxu1  ;;  %v4215_v21 = vmax.f32 %v4087_v1, 0.0  ;;  %v4217_v31 = vmax.f32 %v4089_v20, 0.0  ;;  %v9166_v20 = vld [vmem:[%s12398_s3 + $0x760] ss:$16 sps:$4 sm:$0xff]  }
 0x284   :  { %v4096_v18 = vmul.f32 %v9267_v9, %v3609_v16  ;;  %6215 = vmatpush1.bf16.msra.mxu0 %v9148_v57  ;;  %6667 = vmatpush1.bf16.msra.mxu1 %v9151_v60  ;;  %v4098_v27 = vmul.f32 %v9267_v9, %v3948_v19  ;;  %v4216_v32 = vmax.f32 %v4088_v22, 0.0  ;;  %v4218_v25 = vmax.f32 %v4090_v40, 0.0  ;;  %v9270_v57 = vld [vmem:[%s12399_s1 + $0xd0] sm:$0xff]  ;;  %v9169_v29 = vld [vmem:[%s12398_s3 + $0x768] ss:$16 sps:$4 sm:$0xff]  }
 0x285   :  { %v4223_v13 = vmax.f32 %v4095_v12, 0.0  ;;  %6216 = vmatprep.subr.bf16.mxu0 %v9156_v49  ;;  %6668 = vmatprep.subr.bf16.mxu1 %v9159_v5  ;;  %v4225_v33 = vmax.f32 %v4097_v28, 0.0  ;;  %v9174_v40 = vld [vmem:[%s12398_s3 + $0x784] ss:$16 sps:$4 sm:$0xff]   ;;  %v9177_v3 = vld [vmem:[%s12398_s3 + $0x78c] ss:$16 sps:$4 sm:$0xff]  }
 0x286   :  { %v4224_v6 = vmax.f32 %v4096_v18, 0.0  ;;  %v4226_v37 = vmax.f32 %v4098_v27, 0.0  ;;  %v9175_v27 = vld [vmem:[%s12398_s3 + $0x788] ss:$16 sps:$4 sm:$0xff]  }
 0x287   :  { %v4303_v36 = vpack.c.bf16 %v4223_v13, %v4215_v21  ;;  %v11771_v38 = vpack.c.bf16 %v4225_v33, %v4217_v31  ;;  %v9172_v13 = vld [vmem:[%s12398_s3 + $0x780] ss:$16 sps:$4 sm:$0xff]  }
 0x288   :  { %v4304_v39 = vpack.c.bf16 %v4224_v6, %v4216_v32  ;;  %v3613_v61 = vpop.f32.mrb[56].mxu0  ;;  %6217 = vmatpush1.bf16.msra.mxu0 %v9154_v23  ;;  %6669 = vmatpush1.bf16.msra.mxu1 %v9157_v26  ;;  %v11779_v42 = vpack.c.bf16 %v4226_v37, %v4218_v25  ;;  %v3952_v46 = vpop.f32.mrb[56].mxu1  ;;  %v9180_v6 = vld [vmem:[%s12398_s3 + $0x7a4] ss:$16 sps:$4 sm:$0xff]   ;;  %v9183_v25 = vld [vmem:[%s12398_s3 + $0x7ac] ss:$16 sps:$4 sm:$0xff]  }
 0x289   :  { %v4103_v45 = vmul.f32 %v9268_v43, %v3613_v61  ;;  %v3615_v47 = vpop.f32.mrb[57].mxu0  ;;  %6218 = vmatprep.subr.bf16.mxu0 %v9162_v4  ;;  %6670 = vmatprep.subr.bf16.mxu1 %v9165_v63  ;;  %v4105_v50 = vmul.f32 %v9268_v43, %v3952_v46  ;;  %v3954_v53 = vpop.f32.mrb[57].mxu1  ;;  %v9272_v63 = vld [vmem:[%s12399_s1 + $0xe0] sm:$0xff]  ;;  %v9273_v37 = vld [vmem:[%s12399_s1 + $0xe8] sm:$0xff]  ;;  %v9274_v43 = vld [vmem:[%s12399_s1 + $0xf0] sm:$0xff] }
 0x28a   :  { %v4104_v52 = vmul.f32 %v9269_v51, %v3615_v47  ;;  %v3617_v24 = vpop.f32.mrb[58].mxu0  ;;  %6167 = vmatprep.mubr.bf16.mxu0 %v4304_v39  ;;  %6619 = vmatprep.mubr.bf16.mxu1 %v4304_v39  ;;  %v4106_v8 = vmul.f32 %v9269_v51, %v3954_v53  ;;  %v3956_v0 = vpop.f32.mrb[58].mxu1  ;;  %v9181_v53 = vld [vmem:[%s12398_s3 + $0x7a8] ss:$16 sps:$4 sm:$0xff]  }
 0x28b   :  { %v4111_v60 = vmul.f32 %v9270_v57, %v3617_v24  ;;  %v3619_v1 = vpop.f32.mrb[59].mxu0  ;;  %6168 = vmatmul.mubr.bf16.gmra.mrb[84].mxu0 %v4303_v36  ;;  %6620 = vmatmul.mubr.bf16.gmra.mrb[84].mxu1 %v4303_v36  ;;  %v4113_v2 = vmul.f32 %v9270_v57, %v3956_v0  ;;  %v3958_v5 = vpop.f32.mrb[59].mxu1  ;;  %v4231_v22 = vmax.f32 %v4103_v45, 0.0  ;;  %v4233_v12 = vmax.f32 %v4105_v50, 0.0  ;;  %v9189_v0 = vld [vmem:[%s12398_s3 + $0x7cc] ss:$16 sps:$4 sm:$0xff]  }
 0x28c   :  { %v4112_v49 = vmul.f32 %v9271_v54, %v3619_v1  ;;  %6219 = vmatpush1.bf16.msra.mxu0 %v9160_v59  ;;  %6671 = vmatpush1.bf16.msra.mxu1 %v9163_v41  ;;  %v4114_v48 = vmul.f32 %v9271_v54, %v3958_v5  ;;  %v4232_v14 = vmax.f32 %v4104_v52, 0.0  ;;  %v4234_v9 = vmax.f32 %v4106_v8, 0.0  ;;  %v9178_v52 = vld [vmem:[%s12398_s3 + $0x7a0] ss:$16 sps:$4 sm:$0xff]  }
 0x28d   :  { %v4239_v10 = vmax.f32 %v4111_v60, 0.0  ;;  %6220 = vmatprep.subr.bf16.mxu0 %v9168_v55  ;;  %6672 = vmatprep.subr.bf16.mxu1 %v9171_v30  ;;  %v4241_v16 = vmax.f32 %v4113_v2, 0.0  ;;  %v9275_v30 = vld [vmem:[%s12399_s1 + $0xf8] sm:$0xff]  ;;  %v9186_v60 = vld [vmem:[%s12398_s3 + $0x7c4] ss:$16 sps:$4 sm:$0xff]  }
 0x28e   :  { %v4240_v28 = vmax.f32 %v4112_v49, 0.0  ;;  %v4242_v19 = vmax.f32 %v4114_v48, 0.0  ;;  %v9184_v48 = vld [vmem:[%s12398_s3 + $0x7c0] ss:$16 sps:$4 sm:$0xff]  }
 0x28f   :  { %v4311_v18 = vpack.c.bf16 %v4239_v10, %v4231_v22  ;;  %v11811_v23 = vpack.c.bf16 %v4241_v16, %v4233_v12  ;;  %v9192_v12 = vld [vmem:[%s12398_s3 + $0x7e4] ss:$16 sps:$4 sm:$0xff]   ;;  %v9190_v16 = vld [vmem:[%s12398_s3 + $0x7e0] ss:$16 sps:$4 sm:$0xff]  }
 0x290   :  { %v4312_v26 = vpack.c.bf16 %v4240_v28, %v4232_v14  ;;  %v3623_v21 = vpop.f32.mrb[60].mxu0  ;;  %6221 = vmatpush1.bf16.msra.mxu0 %v9166_v20  ;;  %6673 = vmatpush1.bf16.msra.mxu1 %v9169_v29  ;;  %v11819_v4 = vpack.c.bf16 %v4242_v19, %v4234_v9  ;;  %v3962_v32 = vpop.f32.mrb[60].mxu1  ;;  %v9195_v14 = vld [vmem:[%s12398_s3 + $0x7ec] ss:$16 sps:$4 sm:$0xff]   ;;  %v9193_v28 = vld [vmem:[%s12398_s3 + $0x7e8] ss:$16 sps:$4 sm:$0xff]  }
 0x291   :  { %v4119_v31 = vmul.f32 %v9272_v63, %v3623_v21  ;;  %v3625_v33 = vpop.f32.mrb[61].mxu0  ;;  %6222 = vmatprep.subr.bf16.mxu0 %v9174_v40  ;;  %6674 = vmatprep.subr.bf16.mxu1 %v9177_v3  ;;  %v4121_v36 = vmul.f32 %v9272_v63, %v3962_v32  ;;  %v3964_v61 = vpop.f32.mrb[61].mxu1  ;;  %v9187_v3 = vld [vmem:[%s12398_s3 + $0x7c8] ss:$16 sps:$4 sm:$0xff]  }
 0x292   :  { %v4120_v39 = vmul.f32 %v9273_v37, %v3625_v33  ;;  %v3627_v59 = vpop.f32.mrb[62].mxu0  ;;  %6177 = vmatprep.mubr.bf16.mxu0 %v4312_v26  ;;  %6629 = vmatprep.mubr.bf16.mxu1 %v4312_v26  ;;  %v4122_v41 = vmul.f32 %v9273_v37, %v3964_v61  ;;  %v3966_v46 = vpop.f32.mrb[62].mxu1  ;;  %v11935_v9 = vld [vmem:[%s12400_s4 + $0x38] sm:$0xff] }
 0x293   :  { %v4127_v45 = vmul.f32 %v9274_v43, %v3627_v59  ;;  %v3629_v47 = vpop.f32.mrb[63].mxu0  ;;  %6178 = vmatmul.mubr.bf16.gmra.mrb[88].mxu0 %v4311_v18  ;;  %6630 = vmatmul.mubr.bf16.gmra.mrb[88].mxu1 %v4311_v18  ;;  %v4129_v55 = vmul.f32 %v9274_v43, %v3966_v46  ;;  %v3968_v51 = vpop.f32.mrb[63].mxu1  ;;  %v4247_v24 = vmax.f32 %v4119_v31, 0.0  ;;  %v4249_v1 = vmax.f32 %v4121_v36, 0.0 }
 0x294   :  { %v4128_v50 = vmul.f32 %v9275_v30, %v3629_v47  ;;  %6223 = vmatpush1.bf16.msra.mxu0 %v9172_v13  ;;  %6675 = vmatpush1.bf16.msra.mxu1 %v9175_v27  ;;  %v4130_v57 = vmul.f32 %v9275_v30, %v3968_v51  ;;  %v4248_v2 = vmax.f32 %v4120_v39, 0.0  ;;  %v4250_v5 = vmax.f32 %v4122_v41, 0.0 }
 0x295   :  { %v4255_v8 = vmax.f32 %v4127_v45, 0.0  ;;  %6224 = vmatprep.subr.bf16.mxu0 %v9180_v6  ;;  %6676 = vmatprep.subr.bf16.mxu1 %v9183_v25  ;;  %v4257_v54 = vmax.f32 %v4129_v55, 0.0 }
 0x296   :  { %v4256_v49 = vmax.f32 %v4128_v50, 0.0  ;;  %v4258_v29 = vmax.f32 %v4130_v57, 0.0 }
 0x297   :  { %v4319_v20 = vpack.c.bf16 %v4255_v8, %v4247_v24  ;;  %v4321_v22 = vpack.c.bf16 %v4257_v54, %v4249_v1 }
 0x298   :  { %v4320_v10 = vpack.c.bf16 %v4256_v49, %v4248_v2  ;;  %6225 = vmatpush1.bf16.msra.mxu0 %v9178_v52  ;;  %6677 = vmatpush1.bf16.msra.mxu1 %v9181_v53  ;;  %v4322_v40 = vpack.c.bf16 %v4258_v29, %v4250_v5 }
 0x299   :  { %6226 = vmatprep.subr.bf16.mxu0 %v9186_v60  ;;  %6678 = vmatprep.subr.bf16.mxu1 %v9189_v0 }
 0x29a   :  { %6187 = vmatprep.mubr.bf16.mxu0 %v4320_v10  ;;  %6639 = vmatprep.mubr.bf16.mxu1 %v4320_v10 }
 0x29b   :  { %6188 = vmatmul.mubr.bf16.gmra.mrb[92].mxu0 %v4319_v20  ;;  %6640 = vmatmul.mubr.bf16.gmra.mrb[92].mxu1 %v4319_v20 }
 0x29c   :  { %6227 = vmatpush1.bf16.msra.mxu0 %v9184_v48  ;;  %6230 = vmatprep.mubr.bf16.mxu0 %v11579_v17 }
 0x29d   :  { %6679 = vmatpush1.bf16.msra.mxu1 %v9187_v3  ;;  %6682 = vmatprep.mubr.bf16.mxu1 %v11579_v17  ;;  %v11900_v17 = vld [vmem:[%s12400_s4] sm:$0xff] }
 0x29e   :  { %6228 = vmatprep.subr.bf16.mxu0 %v9192_v12  ;;  %6680 = vmatprep.subr.bf16.mxu1 %v9195_v14 }
 0x2a0   :  { %6229 = vmatpush1.bf16.msra.mxu0 %v9190_v16 }
 0x2a1   :  { %6681 = vmatpush1.bf16.msra.mxu1 %v9193_v28 }
 0x2a3   :  { %6231 = vmatmul.mubr.bf16.vlgmr.msra.gmra.mrb[64].mxu0 %v11571_v15 }
 0x2a4   :  { %6683 = vmatmul.mubr.bf16.vlgmr.msra.gmra.mrb[64].mxu1 %v11571_v15  ;;  %6240 = vmatprep.mubr.bf16.mxu0 %v11619_v35 }
 0x2a5   :  { %6692 = vmatprep.mubr.bf16.mxu1 %v11619_v35  ;;  %v11910_v35 = vld [vmem:[%s12400_s4 + $0x20] sm:$0xff] }
 0x2ab   :  { %6241 = vmatmul.mubr.bf16.gmra.mrb[68].mxu0 %v11611_v56 }
 0x2ac   :  { %6693 = vmatmul.mubr.bf16.gmra.mrb[68].mxu1 %v11611_v56  ;;  %6250 = vmatprep.mubr.bf16.mxu0 %v11659_v58  ;;  %v11905_v56 = vld [vmem:[%s12400_s4 + $0x10] sm:$0xff] }
 0x2ad   :  { %6702 = vmatprep.mubr.bf16.mxu1 %v11659_v58 }
 0x2b3   :  { %6251 = vmatmul.mubr.bf16.gmra.mrb[72].mxu0 %v11651_v7 }
 0x2b4   :  { %6703 = vmatmul.mubr.bf16.gmra.mrb[72].mxu1 %v11651_v7  ;;  %6260 = vmatprep.mubr.bf16.mxu0 %v11699_v34 }
 0x2b5   :  { %6712 = vmatprep.mubr.bf16.mxu1 %v11699_v34  ;;  %v11920_v34 = vld [vmem:[%s12400_s4 + $0x30] sm:$0xff] }
 0x2bb   :  { %6261 = vmatmul.mubr.bf16.gmra.mrb[76].mxu0 %v11691_v11 }
 0x2bc   :  { %6713 = vmatmul.mubr.bf16.gmra.mrb[76].mxu1 %v11691_v11  ;;  %6270 = vmatprep.mubr.bf16.mxu0 %v11739_v62  ;;  %v11915_v11 = vld [vmem:[%s12400_s4 + $0x8] sm:$0xff] }
 0x2bd   :  { %6722 = vmatprep.mubr.bf16.mxu1 %v11739_v62 }
 0x2c3   :  { %6271 = vmatmul.mubr.bf16.gmra.mrb[80].mxu0 %v11731_v44 }
 0x2c4   :  { %6723 = vmatmul.mubr.bf16.gmra.mrb[80].mxu1 %v11731_v44  ;;  %6280 = vmatprep.mubr.bf16.mxu0 %v11779_v42  ;;  %v11925_v44 = vld [vmem:[%s12400_s4 + $0x28] sm:$0xff] }
 0x2c5   :  { %6732 = vmatprep.mubr.bf16.mxu1 %v11779_v42 }
 0x2cb   :  { %6281 = vmatmul.mubr.bf16.gmra.mrb[84].mxu0 %v11771_v38 }
 0x2cc   :  { %6733 = vmatmul.mubr.bf16.gmra.mrb[84].mxu1 %v11771_v38  ;;  %6290 = vmatprep.mubr.bf16.mxu0 %v11819_v4  ;;  %v11930_v38 = vld [vmem:[%s12400_s4 + $0x18] sm:$0xff]  ;;  %s9276_s4 = smov 64  }
 0x2cd   :  { %6742 = vmatprep.mubr.bf16.mxu1 %v11819_v4 }
 0x2d3   :  { %6291 = vmatmul.mubr.bf16.gmra.mrb[88].mxu0 %v11811_v23 }
 0x2d4   :  { %6743 = vmatmul.mubr.bf16.gmra.mrb[88].mxu1 %v11811_v23  ;;  %6300 = vmatprep.mubr.bf16.mxu0 %v4322_v40 }
 0x2d5   :  { %6752 = vmatprep.mubr.bf16.mxu1 %v4322_v40 }
 0x2db   :  { %6301 = vmatmul.mubr.bf16.gmra.mrb[92].mxu0 %v4321_v22 }
 0x2dc   :  { %6753 = vmatmul.mubr.bf16.gmra.mrb[92].mxu1 %v4321_v22 }
 0x376   :  { %v6232_v15 = vpop.f32.mrb[64].mxu0 }
 0x377   :  { %v6684_v7 = vpop.f32.mrb[64].mxu1  ;;  %v6234_v58 = vpop.f32.mrb[65].mxu0  ;;  %v6771_v18 = vmul.f32 %v11900_v17, %v6232_v15 }
 0x378   :  { %v6686_v62 = vpop.f32.mrb[65].mxu1  ;;  %v6236_v42 = vpop.f32.mrb[66].mxu0  ;;  %v6773_v21 = vmul.f32 %v11905_v56, %v6684_v7  ;;  %v6772_v13 = vmul.f32 %v11915_v11, %v6234_v58 }
 0x379   :  { %v6775_v19 = vmul.f32 %v11910_v35, %v6236_v42  ;;  %v6688_v23 = vpop.f32.mrb[66].mxu1  ;;  %v6238_v26 = vpop.f32.mrb[67].mxu0  ;;  %v6774_v31 = vmul.f32 %v11930_v38, %v6686_v62 }
 0x37a   :  { %v6777_v27 = vmul.f32 %v11920_v34, %v6688_v23  ;;  %v6776_v4 = vmul.f32 %v11925_v44, %v6238_v26  ;;  %v6690_v63 = vpop.f32.mrb[67].mxu1 }
 0x37b   :  { %v6835_v32 = vadd.f32 %v6775_v19, %v6771_v18  ;;  %v6778_v33 = vmul.f32 %v11935_v9, %v6690_v63 }
 0x37c   :  { %v6849_v6 = vadd.f32 %v6777_v27, %v6773_v21  ;;  %v6842_v25 = vadd.f32 %v6776_v4, %v6772_v13 }
 0x37d   :  { %v6836_v36 = vrot.slane %v6835_v32, 4  ;;  %v6856_v37 = vadd.f32 %v6778_v33, %v6774_v31 }
 0x37e   :  { %v6850_v39 = vrot.slane %v6849_v6, 4  ;;  %v6843_v61 = vrot.slane %v6842_v25, 4  ;;  %v6242_v59 = vpop.f32.mrb[68].mxu0 }
 0x37f   :  { %v6837_v41 = vadd.f32 %v6836_v36, %v6835_v32  ;;  %v6857_v43 = vrot.slane %v6856_v37, 4  ;;  %v6779_v45 = vmul.f32 %v11900_v17, %v6242_v59  ;;  %v6694_v46 = vpop.f32.mrb[68].mxu1  ;;  %v6244_v47 = vpop.f32.mrb[69].mxu0 }
 0x380   :  { %v6851_v55 = vadd.f32 %v6850_v39, %v6849_v6  ;;  %v6844_v30 = vadd.f32 %v6843_v61, %v6842_v25  ;;  %v6781_v50 = vmul.f32 %v11905_v56, %v6694_v46  ;;  %v6780_v51 = vmul.f32 %v11915_v11, %v6244_v47  ;;  %v6696_v52 = vpop.f32.mrb[69].mxu1  ;;  %v6246_v53 = vpop.f32.mrb[70].mxu0 }
 0x381   :  { %v6838_v24 = vrot.slane %v6837_v41, 2  ;;  %v6858_v8 = vadd.f32 %v6857_v43, %v6856_v37  ;;  %v6782_v57 = vmul.f32 %v11930_v38, %v6696_v52  ;;  %v6783_v60 = vmul.f32 %v11910_v35, %v6246_v53  ;;  %v6698_v0 = vpop.f32.mrb[70].mxu1  ;;  %v6248_v1 = vpop.f32.mrb[71].mxu0 }
 0x382   :  { %v6852_v2 = vrot.slane %v6851_v55, 2  ;;  %v6845_v54 = vrot.slane %v6844_v30, 2  ;;  %v6785_v49 = vmul.f32 %v11920_v34, %v6698_v0  ;;  %v6784_v5 = vmul.f32 %v11925_v44, %v6248_v1  ;;  %v6700_v20 = vpop.f32.mrb[71].mxu1 }
 0x383   :  { %v6839_v29 = vadd.f32 %v6838_v24, %v6837_v41  ;;  %v6859_v22 = vrot.slane %v6858_v8, 2  ;;  %v6863_v10 = vadd.f32 %v6783_v60, %v6779_v45  ;;  %v6786_v48 = vmul.f32 %v11935_v9, %v6700_v20 }
 0x384   :  { %v6853_v40 = vadd.f32 %v6852_v2, %v6851_v55  ;;  %v6846_v3 = vadd.f32 %v6845_v54, %v6844_v30  ;;  %v6877_v12 = vadd.f32 %v6785_v49, %v6781_v50  ;;  %v6870_v14 = vadd.f32 %v6784_v5, %v6780_v51 }
 0x385   :  { %v6840_v16 = vrot.slane %v6839_v29, 1  ;;  %v6860_v28 = vadd.f32 %v6859_v22, %v6858_v8  ;;  %v6864_v15 = vrot.slane %v6863_v10, 4  ;;  %v6884_v7 = vadd.f32 %v6786_v48, %v6782_v57 }
 0x386   :  { %v6854_v58 = vrot.slane %v6853_v40, 1  ;;  %v6847_v62 = vrot.slane %v6846_v3, 1  ;;  %v6878_v42 = vrot.slane %v6877_v12, 4  ;;  %v6871_v18 = vrot.slane %v6870_v14, 4  ;;  %v6252_v19 = vpop.f32.mrb[72].mxu0 }
 0x387   :  { %v11953_v23 = vadd.f32 %v6840_v16, %v6839_v29  ;;  %v6861_v26 = vrot.slane %v6860_v28, 1  ;;  %v6865_v21 = vadd.f32 %v6864_v15, %v6863_v10  ;;  %v6885_v13 = vrot.slane %v6884_v7, 4  ;;  %v6704_v27 = vpop.f32.mrb[72].mxu1  ;;  %v6254_v4 = vpop.f32.mrb[73].mxu0 }
 0x388   :  { %v11955_v63 = vadd.f32 %v6854_v58, %v6853_v40  ;;  %v11957_v31 = vadd.f32 %v6847_v62, %v6846_v3  ;;  %v6879_v32 = vadd.f32 %v6878_v42, %v6877_v12  ;;  %v6872_v33 = vadd.f32 %v6871_v18, %v6870_v14  ;;  %v6706_v6 = vpop.f32.mrb[73].mxu1  ;;  %v6256_v25 = vpop.f32.mrb[74].mxu0 }
 0x389   :  { %12410 = vst [vmem:[#allocation2_spill] sm:$0xff] %v11953_v23  ;;  %v11959_v36 = vadd.f32 %v6861_v26, %v6860_v28  ;;  %v6866_v37 = vrot.slane %v6865_v21, 2  ;;  %v6886_v39 = vadd.f32 %v6885_v13, %v6884_v7  ;;  %v6787_v61 = vmul.f32 %v11900_v17, %v6252_v19  ;;  %v6708_v59 = vpop.f32.mrb[74].mxu1  ;;  %v6258_v41 = vpop.f32.mrb[75].mxu0 }
 0x38a   :  { %v6880_v43 = vrot.slane %v6879_v32, 2  ;;  %v6873_v45 = vrot.slane %v6872_v33, 2  ;;  %v6789_v46 = vmul.f32 %v11905_v56, %v6704_v27  ;;  %v6788_v47 = vmul.f32 %v11915_v11, %v6254_v4  ;;  %v6710_v55 = vpop.f32.mrb[75].mxu1 }
 0x38b   :  { %v6867_v30 = vadd.f32 %v6866_v37, %v6865_v21  ;;  %v6887_v50 = vrot.slane %v6886_v39, 2  ;;  %v6790_v51 = vmul.f32 %v11930_v38, %v6706_v6  ;;  %v6791_v52 = vmul.f32 %v11910_v35, %v6256_v25 }
 0x38c   :  { %v6881_v53 = vadd.f32 %v6880_v43, %v6879_v32  ;;  %v6874_v24 = vadd.f32 %v6873_v45, %v6872_v33  ;;  %v6793_v8 = vmul.f32 %v11920_v34, %v6708_v59  ;;  %v6792_v57 = vmul.f32 %v11925_v44, %v6258_v41 }
 0x38d   :  { %v6868_v60 = vrot.slane %v6867_v30, 1  ;;  %v6888_v0 = vadd.f32 %v6887_v50, %v6886_v39  ;;  %v6891_v1 = vadd.f32 %v6791_v52, %v6787_v61  ;;  %v6794_v2 = vmul.f32 %v11935_v9, %v6710_v55 }
 0x38e   :  { %v6882_v54 = vrot.slane %v6881_v53, 1  ;;  %v6875_v49 = vrot.slane %v6874_v24, 1  ;;  %v6905_v5 = vadd.f32 %v6793_v8, %v6789_v46  ;;  %v6898_v20 = vadd.f32 %v6792_v57, %v6788_v47  ;;  %v6262_v29 = vpop.f32.mrb[76].mxu0 }
 0x38f   :  { %v11969_v22 = vadd.f32 %v6868_v60, %v6867_v30  ;;  %v6889_v10 = vrot.slane %v6888_v0, 1  ;;  %v6892_v48 = vrot.slane %v6891_v1, 4  ;;  %v6912_v40 = vadd.f32 %v6794_v2, %v6790_v51  ;;  %v6714_v3 = vpop.f32.mrb[76].mxu1  ;;  %v6264_v12 = vpop.f32.mrb[77].mxu0 }
 0x390   :  { %v11971_v14 = vadd.f32 %v6882_v54, %v6881_v53  ;;  %v11973_v16 = vadd.f32 %v6875_v49, %v6874_v24  ;;  %v6906_v28 = vrot.slane %v6905_v5, 4  ;;  %v6899_v15 = vrot.slane %v6898_v20, 4  ;;  %v6716_v7 = vpop.f32.mrb[77].mxu1  ;;  %v6266_v58 = vpop.f32.mrb[78].mxu0 }
 0x391   :  { %12411 = vst [vmem:[#allocation3_spill] sm:$0xff] %v11969_v22  ;;  %v7092_v62 = vsel %vm7091_vm0, %v11969_v22, %v11953_v23  ;;  %v11978_v42 = vadd.f32 %v6889_v10, %v6888_v0  ;;  %v6893_v18 = vadd.f32 %v6892_v48, %v6891_v1  ;;  %v6913_v19 = vrot.slane %v6912_v40, 4  ;;  %v6718_v26 = vpop.f32.mrb[78].mxu1  ;;  %v6268_v21 = vpop.f32.mrb[79].mxu0 }
 0x392   :  { %v7112_v13 = vsel %vm7091_vm0, %v11971_v14, %v11955_v63  ;;  %v7105_v27 = vsel %vm7091_vm0, %v11973_v16, %v11957_v31  ;;  %v6907_v4 = vadd.f32 %v6906_v28, %v6905_v5  ;;  %v6900_v32 = vadd.f32 %v6899_v15, %v6898_v20  ;;  %v6720_v33 = vpop.f32.mrb[79].mxu1 }
 0x393   :  { %v7119_v6 = vsel %vm7091_vm0, %v11978_v42, %v11959_v36  ;;  %v6894_v25 = vrot.slane %v6893_v18, 2  ;;  %v6914_v37 = vadd.f32 %v6913_v19, %v6912_v40  ;;  %v6795_v39 = vmul.f32 %v11900_v17, %v6262_v29 }
 0x394   :  { %v6908_v61 = vrot.slane %v6907_v4, 2  ;;  %v6901_v59 = vrot.slane %v6900_v32, 2  ;;  %v6797_v41 = vmul.f32 %v11905_v56, %v6714_v3  ;;  %v6796_v43 = vmul.f32 %v11915_v11, %v6264_v12 }
 0x395   :  { %v6895_v45 = vadd.f32 %v6894_v25, %v6893_v18  ;;  %v6915_v46 = vrot.slane %v6914_v37, 2  ;;  %v6798_v47 = vmul.f32 %v11930_v38, %v6716_v7  ;;  %v6799_v55 = vmul.f32 %v11910_v35, %v6266_v58 }
 0x396   :  { %v6909_v30 = vadd.f32 %v6908_v61, %v6907_v4  ;;  %v6902_v50 = vadd.f32 %v6901_v59, %v6900_v32  ;;  %v6801_v51 = vmul.f32 %v11920_v34, %v6718_v26  ;;  %v6800_v52 = vmul.f32 %v11925_v44, %v6268_v21  ;;  %v6272_v53 = vpop.f32.mrb[80].mxu0 }
 0x397   :  { %v6896_v24 = vrot.slane %v6895_v45, 1  ;;  %v6916_v8 = vadd.f32 %v6915_v46, %v6914_v37  ;;  %v6919_v57 = vadd.f32 %v6799_v55, %v6795_v39  ;;  %v6802_v60 = vmul.f32 %v11935_v9, %v6720_v33  ;;  %v6724_v0 = vpop.f32.mrb[80].mxu1  ;;  %v6274_v1 = vpop.f32.mrb[81].mxu0 }
 0x398   :  { %v6910_v2 = vrot.slane %v6909_v30, 1  ;;  %v6903_v54 = vrot.slane %v6902_v50, 1  ;;  %v6933_v49 = vadd.f32 %v6801_v51, %v6797_v41  ;;  %v6926_v5 = vadd.f32 %v6800_v52, %v6796_v43  ;;  %v6726_v20 = vpop.f32.mrb[81].mxu1  ;;  %v6276_v29 = vpop.f32.mrb[82].mxu0 }
 0x399   :  { %v11997_v10 = vadd.f32 %v6896_v24, %v6895_v45  ;;  %v6917_v48 = vrot.slane %v6916_v8, 1  ;;  %v6920_v40 = vrot.slane %v6919_v57, 4  ;;  %v6940_v3 = vadd.f32 %v6802_v60, %v6798_v47  ;;  %v6728_v12 = vpop.f32.mrb[82].mxu1  ;;  %v6278_v28 = vpop.f32.mrb[83].mxu0 }
 0x39a   :  { %v11999_v15 = vadd.f32 %v6910_v2, %v6909_v30  ;;  %v12001_v7 = vadd.f32 %v6903_v54, %v6902_v50  ;;  %v6934_v58 = vrot.slane %v6933_v49, 4  ;;  %v6927_v18 = vrot.slane %v6926_v5, 4  ;;  %v6730_v19 = vpop.f32.mrb[83].mxu1 }
 0x39b   :  { %12412 = vst [vmem:[#allocation4_spill] sm:$0xff] %v11997_v10  ;;  %v7094_v26 = vsel %vm7093_vm1, %v11997_v10, %v7092_v62  ;;  %v12005_v21 = vadd.f32 %v6917_v48, %v6916_v8  ;;  %v6921_v4 = vadd.f32 %v6920_v40, %v6919_v57  ;;  %v6941_v32 = vrot.slane %v6940_v3, 4 }
 0x39c   :  { %v7113_v33 = vsel %vm7093_vm1, %v11999_v15, %v7112_v13  ;;  %v7106_v25 = vsel %vm7093_vm1, %v12001_v7, %v7105_v27  ;;  %v6935_v37 = vadd.f32 %v6934_v58, %v6933_v49  ;;  %v6928_v39 = vadd.f32 %v6927_v18, %v6926_v5 }
 0x39d   :  { %v7120_v61 = vsel %vm7093_vm1, %v12005_v21, %v7119_v6  ;;  %v6922_v59 = vrot.slane %v6921_v4, 2  ;;  %v6942_v41 = vadd.f32 %v6941_v32, %v6940_v3  ;;  %v6803_v43 = vmul.f32 %v11900_v17, %v6272_v53 }
 0x39e   :  { %v6936_v62 = vrot.slane %v6935_v37, 2  ;;  %v6929_v45 = vrot.slane %v6928_v39, 2  ;;  %v6805_v46 = vmul.f32 %v11905_v56, %v6724_v0  ;;  %v6804_v47 = vmul.f32 %v11915_v11, %v6274_v1  ;;  %v6282_v55 = vpop.f32.mrb[84].mxu0 }
 0x39f   :  { %v6923_v13 = vadd.f32 %v6922_v59, %v6921_v4  ;;  %v6943_v30 = vrot.slane %v6942_v41, 2  ;;  %v6806_v27 = vmul.f32 %v11930_v38, %v6726_v20  ;;  %v6807_v50 = vmul.f32 %v11910_v35, %v6276_v29  ;;  %v6734_v51 = vpop.f32.mrb[84].mxu1  ;;  %v6284_v52 = vpop.f32.mrb[85].mxu0 }
 0x3a0   :  { %v6937_v6 = vadd.f32 %v6936_v62, %v6935_v37  ;;  %v6930_v24 = vadd.f32 %v6929_v45, %v6928_v39  ;;  %v6809_v8 = vmul.f32 %v11920_v34, %v6728_v12  ;;  %v6808_v53 = vmul.f32 %v11925_v44, %v6278_v28  ;;  %v6736_v57 = vpop.f32.mrb[85].mxu1  ;;  %v6286_v60 = vpop.f32.mrb[86].mxu0 }
 0x3a1   :  { %v6924_v0 = vrot.slane %v6923_v13, 1  ;;  %v6944_v2 = vadd.f32 %v6943_v30, %v6942_v41  ;;  %v6947_v1 = vadd.f32 %v6807_v50, %v6803_v43  ;;  %v6810_v54 = vmul.f32 %v11935_v9, %v6730_v19  ;;  %v6738_v49 = vpop.f32.mrb[86].mxu1  ;;  %v6288_v5 = vpop.f32.mrb[87].mxu0 }
 0x3a2   :  { %v6938_v20 = vrot.slane %v6937_v6, 1  ;;  %v6931_v48 = vrot.slane %v6930_v24, 1  ;;  %v6961_v29 = vadd.f32 %v6809_v8, %v6805_v46  ;;  %v6954_v40 = vadd.f32 %v6808_v53, %v6804_v47  ;;  %v6740_v3 = vpop.f32.mrb[87].mxu1 }
 0x3a3   :  { %v12021_v58 = vadd.f32 %v6924_v0, %v6923_v13  ;;  %v6945_v18 = vrot.slane %v6944_v2, 1  ;;  %v6948_v12 = vrot.slane %v6947_v1, 4  ;;  %v6968_v4 = vadd.f32 %v6810_v54, %v6806_v27 }
 0x3a4   :  { %v12023_v28 = vadd.f32 %v6938_v20, %v6937_v6  ;;  %v12025_v32 = vadd.f32 %v6931_v48, %v6930_v24  ;;  %v6962_v37 = vrot.slane %v6961_v29, 4  ;;  %v6955_v39 = vrot.slane %v6954_v40, 4 }
 0x3a5   :  { %12413 = vst [vmem:[#allocation5_spill] sm:$0xff] %v12021_v58  ;;  %v7096_v19 = vsel %vm7095_vm2, %v12021_v58, %v7094_v26  ;;  %v12029_v59 = vadd.f32 %v6945_v18, %v6944_v2  ;;  %v6949_v41 = vadd.f32 %v6948_v12, %v6947_v1  ;;  %v6969_v43 = vrot.slane %v6968_v4, 4 }
 0x3a6   :  { %v7114_v62 = vsel %vm7095_vm2, %v12023_v28, %v7113_v33  ;;  %v7107_v45 = vsel %vm7095_vm2, %v12025_v32, %v7106_v25  ;;  %v6963_v46 = vadd.f32 %v6962_v37, %v6961_v29  ;;  %v6956_v47 = vadd.f32 %v6955_v39, %v6954_v40  ;;  %v6292_v13 = vpop.f32.mrb[88].mxu0 }
 0x3a7   :  { %12414 = vst [vmem:[#allocation6_spill] sm:$0xff] %v12029_v59  ;;  %v7121_v30 = vsel %vm7095_vm2, %v12029_v59, %v7120_v61  ;;  %v6950_v27 = vrot.slane %v6949_v41, 2  ;;  %v6970_v50 = vadd.f32 %v6969_v43, %v6968_v4  ;;  %v6811_v26 = vmul.f32 %v11900_v17, %v6282_v55  ;;  %v6744_v6 = vpop.f32.mrb[88].mxu1  ;;  %v6294_v24 = vpop.f32.mrb[89].mxu0 }
 0x3a8   :  { %v6964_v8 = vrot.slane %v6963_v46, 2  ;;  %v6957_v53 = vrot.slane %v6956_v47, 2  ;;  %v6813_v0 = vmul.f32 %v11905_v56, %v6734_v51  ;;  %v6812_v33 = vmul.f32 %v11915_v11, %v6284_v52  ;;  %v6746_v2 = vpop.f32.mrb[89].mxu1  ;;  %v6296_v25 = vpop.f32.mrb[90].mxu0 }
 0x3a9   :  { %v6951_v1 = vadd.f32 %v6950_v27, %v6949_v41  ;;  %v6971_v54 = vrot.slane %v6970_v50, 2  ;;  %v6814_v20 = vmul.f32 %v11930_v38, %v6736_v57  ;;  %v6815_v61 = vmul.f32 %v11910_v35, %v6286_v60  ;;  %v6748_v48 = vpop.f32.mrb[90].mxu1  ;;  %v6298_v29 = vpop.f32.mrb[91].mxu0 }
 0x3aa   :  { %v6965_v40 = vadd.f32 %v6964_v8, %v6963_v46  ;;  %v6958_v55 = vadd.f32 %v6957_v53, %v6956_v47  ;;  %v6817_v18 = vmul.f32 %v11920_v34, %v6738_v49  ;;  %v6816_v12 = vmul.f32 %v11925_v44, %v6288_v5  ;;  %v6750_v4 = vpop.f32.mrb[91].mxu1 }
 0x3ab   :  { %v6952_v51 = vrot.slane %v6951_v1, 1  ;;  %v6972_v37 = vadd.f32 %v6971_v54, %v6970_v50  ;;  %v6975_v52 = vadd.f32 %v6815_v61, %v6811_v26  ;;  %v6818_v39 = vmul.f32 %v11935_v9, %v6740_v3 }
 0x3ac   :  { %v6966_v41 = vrot.slane %v6965_v40, 1  ;;  %v6959_v43 = vrot.slane %v6958_v55, 1  ;;  %v6989_v27 = vadd.f32 %v6817_v18, %v6813_v0  ;;  %v6982_v57 = vadd.f32 %v6816_v12, %v6812_v33 }
 0x3ad   :  { %v12045_v58 = vadd.f32 %v6952_v51, %v6951_v1  ;;  %v6973_v60 = vrot.slane %v6972_v37, 1  ;;  %v6976_v10 = vrot.slane %v6975_v52, 4  ;;  %v6996_v46 = vadd.f32 %v6818_v39, %v6814_v20 }
 0x3ae   :  { %v12047_v47 = vadd.f32 %v6966_v41, %v6965_v40  ;;  %v12049_v49 = vadd.f32 %v6959_v43, %v6958_v55  ;;  %v6990_v5 = vrot.slane %v6989_v27, 4  ;;  %v6983_v8 = vrot.slane %v6982_v57, 4  ;;  %v6302_v50 = vpop.f32.mrb[92].mxu0 }
 0x3af   :  { %12415 = vst [vmem:[#allocation7_spill] sm:$0xff] %v12045_v58  ;;  %v7098_v3 = vsel %vm7097_vm3, %v12045_v58, %v7096_v19  ;;  %v12053_v26 = vadd.f32 %v6973_v60, %v6972_v37  ;;  %v6977_v53 = vadd.f32 %v6976_v10, %v6975_v52  ;;  %v6997_v0 = vrot.slane %v6996_v46, 4  ;;  %v6754_v33 = vpop.f32.mrb[92].mxu1  ;;  %v6304_v1 = vpop.f32.mrb[93].mxu0 }
 0x3b0   :  { %v7115_v54 = vsel %vm7097_vm3, %v12047_v47, %v7114_v62  ;;  %v7108_v20 = vsel %vm7097_vm3, %v12049_v49, %v7107_v45  ;;  %v6991_v61 = vadd.f32 %v6990_v5, %v6989_v27  ;;  %v6984_v40 = vadd.f32 %v6983_v8, %v6982_v57  ;;  %v6756_v55 = vpop.f32.mrb[93].mxu1  ;;  %v6306_v18 = vpop.f32.mrb[94].mxu0 }
 0x3b1   :  { %12416 = vst [vmem:[#allocation8_spill] sm:$0xff] %v12053_v26  ;;  %v7122_v12 = vsel %vm7097_vm3, %v12053_v26, %v7121_v30  ;;  %v6978_v19 = vrot.slane %v6977_v53, 2  ;;  %v6998_v51 = vadd.f32 %v6997_v0, %v6996_v46  ;;  %v6819_v10 = vmul.f32 %v11900_v17, %v6292_v13  ;;  %v6758_v37 = vpop.f32.mrb[94].mxu1  ;;  %v6308_v52 = vpop.f32.mrb[95].mxu0 }
 0x3b2   :  { %v6992_v39 = vrot.slane %v6991_v61, 2  ;;  %v6985_v41 = vrot.slane %v6984_v40, 2  ;;  %v6821_v62 = vmul.f32 %v11905_v56, %v6744_v6  ;;  %v6820_v43 = vmul.f32 %v11915_v11, %v6294_v24  ;;  %v6760_v45 = vpop.f32.mrb[95].mxu1 }
 0x3b3   :  { %v6979_v27 = vadd.f32 %v6978_v19, %v6977_v53  ;;  %v6999_v57 = vrot.slane %v6998_v51, 2  ;;  %v6822_v60 = vmul.f32 %v11930_v38, %v6746_v2  ;;  %v6823_v5 = vmul.f32 %v11910_v35, %v6296_v25 }
 0x3b4   :  { %v6993_v30 = vadd.f32 %v6992_v39, %v6991_v61  ;;  %v6986_v8 = vadd.f32 %v6985_v41, %v6984_v40  ;;  %v6825_v46 = vmul.f32 %v11920_v34, %v6748_v48  ;;  %v6824_v13 = vmul.f32 %v11925_v44, %v6298_v29 }
 0x3b5   :  { %v6980_v0 = vrot.slane %v6979_v27, 1  ;;  %v7000_v58 = vadd.f32 %v6999_v57, %v6998_v51  ;;  %v7003_v22 = vadd.f32 %v6823_v5, %v6819_v10  ;;  %v6826_v6 = vmul.f32 %v11935_v9, %v6750_v4 }
 0x3b6   :  { %v6994_v23 = vrot.slane %v6993_v30, 1  ;;  %v6987_v24 = vrot.slane %v6986_v8, 1  ;;  %v7017_v26 = vadd.f32 %v6825_v46, %v6821_v62  ;;  %v7010_v53 = vadd.f32 %v6824_v13, %v6820_v43 }
 0x3b7   :  { %v12069_v19 = vadd.f32 %v6980_v0, %v6979_v27  ;;  %v7001_v2 = vrot.slane %v7000_v58, 1  ;;  %v7004_v59 = vrot.slane %v7003_v22, 4  ;;  %v7024_v25 = vadd.f32 %v6826_v6, %v6822_v60 }
 0x3b8   :  { %v12071_v61 = vadd.f32 %v6994_v23, %v6993_v30  ;;  %v12073_v40 = vadd.f32 %v6987_v24, %v6986_v8  ;;  %v7018_v48 = vrot.slane %v7017_v26, 4  ;;  %v7011_v29 = vrot.slane %v7010_v53, 4 }
 0x3b9   :  { %v7100_v51 = vsel %vm7099_vm4, %v12069_v19, %v7098_v3  ;;  %v12077_v4 = vadd.f32 %v7001_v2, %v7000_v58  ;;  %v7005_v10 = vadd.f32 %v7004_v59, %v7003_v22  ;;  %v7025_v39 = vrot.slane %v7024_v25, 4 }
 0x3ba   :  { %v7116_v41 = vsel %vm7099_vm4, %v12071_v61, %v7115_v54  ;;  %v7109_v62 = vsel %vm7099_vm4, %v12073_v40, %v7108_v20  ;;  %v7019_v23 = vadd.f32 %v7018_v48, %v7017_v26  ;;  %v7012_v43 = vadd.f32 %v7011_v29, %v7010_v53 }
 0x3bb   :  { %v7123_v27 = vsel %vm7099_vm4, %v12077_v4, %v7122_v12  ;;  %v7006_v57 = vrot.slane %v7005_v10, 2  ;;  %v7026_v60 = vadd.f32 %v7025_v39, %v7024_v25  ;;  %v6827_v5 = vmul.f32 %v11900_v17, %v6302_v50 }
 0x3bc   :  { %v7020_v3 = vrot.slane %v7019_v23, 2  ;;  %v7013_v58 = vrot.slane %v7012_v43, 2  ;;  %v6829_v22 = vmul.f32 %v11905_v56, %v6754_v33  ;;  %v6828_v59 = vmul.f32 %v11915_v11, %v6304_v1 }
 0x3bd   :  { %v7007_v30 = vadd.f32 %v7006_v57, %v7005_v10  ;;  %v7027_v54 = vrot.slane %v7026_v60, 2  ;;  %v6830_v8 = vmul.f32 %v11930_v38, %v6756_v55  ;;  %v6831_v26 = vmul.f32 %v11910_v35, %v6306_v18 }
 0x3be   :  { %v7021_v20 = vadd.f32 %v7020_v3, %v7019_v23  ;;  %v7014_v46 = vadd.f32 %v7013_v58, %v7012_v43  ;;  %v6833_v12 = vmul.f32 %v11920_v34, %v6758_v37  ;;  %v6832_v13 = vmul.f32 %v11925_v44, %v6308_v52 }
 0x3bf   :  { %v7008_v0 = vrot.slane %v7007_v30, 1  ;;  %v7028_v17 = vadd.f32 %v7027_v54, %v7026_v60  ;;  %v7031_v50 = vadd.f32 %v6831_v26, %v6827_v5  ;;  %v6834_v6 = vmul.f32 %v11935_v9, %v6760_v45 }
 0x3c0   :  { %v7022_v56 = vrot.slane %v7021_v20, 1  ;;  %v7015_v33 = vrot.slane %v7014_v46, 1  ;;  %v7045_v11 = vadd.f32 %v6833_v12, %v6829_v22  ;;  %v7038_v1 = vadd.f32 %v6832_v13, %v6828_v59 }
 0x3c1   :  { %v12093_v24 = vadd.f32 %v7008_v0, %v7007_v30  ;;  %v7029_v38 = vrot.slane %v7028_v17, 1  ;;  %v7032_v55 = vrot.slane %v7031_v50, 4  ;;  %v7052_v35 = vadd.f32 %v6834_v6, %v6830_v8 }
 0x3c2   :  { %v7023_v18 = vadd.f32 %v7022_v56, %v7021_v20  ;;  %v12095_v53 = vadd.f32 %v7015_v33, %v7014_v46  ;;  %v7046_v34 = vrot.slane %v7045_v11, 4  ;;  %v7039_v37 = vrot.slane %v7038_v1, 4 }
 0x3c3   :  { %v7102_v44 = vsel %vm7101_vm5, %v12093_v24, %v7100_v51  ;;  %v12099_v52 = vadd.f32 %v7029_v38, %v7028_v17  ;;  %v7033_v9 = vadd.f32 %v7032_v55, %v7031_v50  ;;  %v7053_v45 = vrot.slane %v7052_v35, 4 }
 0x3c4   :  { %v7117_v2 = vsel %vm7101_vm5, %v7023_v18, %v7116_v41  ;;  %v7110_v25 = vsel %vm7101_vm5, %v12095_v53, %v7109_v62  ;;  %v7047_v48 = vadd.f32 %v7046_v34, %v7045_v11  ;;  %v7040_v29 = vadd.f32 %v7039_v37, %v7038_v1 }
 0x3c5   :  { %v7124_v10 = vsel %vm7101_vm5, %v12099_v52, %v7123_v27  ;;  %v7034_v39 = vrot.slane %v7033_v9, 2  ;;  %v7054_v23 = vadd.f32 %v7053_v45, %v7052_v35 }
 0x3c6   :  { %v7048_v43 = vrot.slane %v7047_v48, 2  ;;  %v7041_v57 = vrot.slane %v7040_v29, 2 }
 0x3c7   :  { %v7035_v60 = vadd.f32 %v7034_v39, %v7033_v9  ;;  %v7055_v51 = vrot.slane %v7054_v23, 2 }
 0x3c8   :  { %v7049_v5 = vadd.f32 %v7048_v43, %v7047_v48  ;;  %v7042_v3 = vadd.f32 %v7041_v57, %v7040_v29 }
 0x3c9   :  { %v7036_v58 = vrot.slane %v7035_v60, 1  ;;  %v7056_v22 = vadd.f32 %v7055_v51, %v7054_v23 }
 0x3ca   :  { %v7050_v41 = vrot.slane %v7049_v5, 1  ;;  %v7043_v59 = vrot.slane %v7042_v3, 1 }
 0x3cb   :  { %v12106_v30 = vadd.f32 %v7036_v58, %v7035_v60  ;;  %v7057_v62 = vrot.slane %v7056_v22, 1 }
 0x3cc   :  { %v7051_v54 = vadd.f32 %v7050_v41, %v7049_v5  ;;  %v12110_v8 = vadd.f32 %v7043_v59, %v7042_v3 }
 0x3cd   :  { %v7104_v27 = vsel %vm7103_vm6, %v12106_v30, %v7102_v44  ;;  %v12112_v26 = vadd.f32 %v7057_v62, %v7056_v22 }
 0x3ce   :  { %v7128_v20 = vrot.slane %v7104_v27, 1  ;;  %v7132_v46 = vrot.slane %v7104_v27, 2  ;;  %v7136_v12 = vrot.slane %v7104_v27, 3  ;;  %v7140_v13 = vrot.slane %v7104_v27, 4 }
 0x3cf   :  { %v7144_v0 = vrot.slane %v7104_v27, 5  ;;  %v12115_v17 = vadd.f32 %v7104_v27, %v11955_v63  ;;  %v12118_v50 = vsel %vm7103_vm6, %v7051_v54, %v7117_v2  ;;  %v7148_v6 = vrot.slane %v7104_v27, 6 }
 0x3d0   :  { %v12121_v56 = vadd.f32 %v7128_v20, %v11971_v14  ;;  %v12124_v33 = vadd.f32 %v7132_v46, %v11999_v15  ;;  %v12127_v11 = vadd.f32 %v7136_v12, %v12023_v28  ;;  %v7152_v1 = vrot.slane %v7104_v27, 7 }
 0x3d1   :  { %v12130_v38 = vadd.f32 %v7140_v13, %v12047_v47  ;;  %v12133_v63 = vadd.f32 %v7144_v0, %v12071_v61  ;;  %v12135_v55 = vadd.f32 %v7148_v6, %v7023_v18  ;;  %v7111_v35 = vsel %vm7103_vm6, %v12110_v8, %v7110_v25 }
 0x3d2   :  { %v7256_v14 = vrot.slane %v12121_v56, 7  ;;  %v12140_v34 = vadd.f32 %v7152_v1, %v7051_v54  ;;  %v7258_v15 = vrot.slane %v12124_v33, 6  ;;  %v7260_v28 = vrot.slane %v12127_v11, 5 }
 0x3d3   :  { %v7262_v37 = vrot.slane %v12130_v38, 4  ;;  %v7264_v47 = vrot.slane %v12133_v63, 3  ;;  %v12148_v61 = vsel %vm7103_vm6, %v12112_v26, %v7124_v10  ;;  %v7266_v44 = vrot.slane %v12135_v55, 2 }
 0x3d4   :  { %v7257_v18 = vsel %vm7091_vm0, %v7256_v14, %v12115_v17  ;;  %v7127_v9 = vrot.slane %v12148_v61, 1  ;;  %v7131_v45 = vrot.slane %v12148_v61, 2  ;;  %v7135_v25 = vrot.slane %v12148_v61, 3  ;;  %v12417_v14 = vld [vmem:[#allocation6_spill] sm:$0xff] }
 0x3d5   :  { %v7259_v2 = vsel %vm7093_vm1, %v7258_v15, %v7257_v18  ;;  %v7139_v48 = vrot.slane %v12148_v61, 4  ;;  %v7143_v29 = vrot.slane %v12148_v61, 5  ;;  %v7268_v39 = vrot.slane %v12140_v34, 1 }
 0x3d6   :  { %v7261_v10 = vsel %vm7095_vm2, %v7260_v28, %v7259_v2  ;;  %v7147_v23 = vrot.slane %v12148_v61, 6  ;;  %v7187_v43 = vadd.f32 %v12148_v61, %v11957_v31  ;;  %v7191_v60 = vadd.f32 %v7127_v9, %v11973_v16  ;;  %v12418_v28 = vld [vmem:[#allocation8_spill] sm:$0xff] }
 0x3d7   :  { %v7263_v57 = vsel %vm7097_vm3, %v7262_v37, %v7261_v10  ;;  %v7195_v51 = vadd.f32 %v7131_v45, %v12001_v7  ;;  %v12168_v5 = vadd.f32 %v7135_v25, %v12025_v32  ;;  %v12172_v58 = vadd.f32 %v7139_v48, %v12049_v49 }
 0x3d8   :  { %v7265_v3 = vsel %vm7099_vm4, %v7264_v47, %v7263_v57  ;;  %v12175_v22 = vadd.f32 %v7143_v29, %v12073_v40  ;;  %v12178_v41 = vadd.f32 %v7147_v23, %v12095_v53  ;;  %v7242_v59 = vrot.slane %v7191_v60, 7 }
 0x3d9   :  { %v7267_v31 = vsel %vm7101_vm5, %v7266_v44, %v7265_v3  ;;  %v7244_v16 = vrot.slane %v7195_v51, 6  ;;  %v7151_v32 = vrot.slane %v12148_v61, 7  ;;  %v7246_v62 = vrot.slane %v12168_v5, 5 }
 0x3da   :  { %v7269_v7 = vsel %vm7103_vm6, %v7268_v39, %v7267_v31  ;;  %v7129_v54 = vrot.slane %v7111_v35, 1  ;;  %v7243_v49 = vsel %vm7091_vm0, %v7242_v59, %v7187_v43  ;;  %v7133_v27 = vrot.slane %v7111_v35, 2 }
 0x3db   :  { %v7137_v20 = vrot.slane %v7111_v35, 3  ;;  %v7141_v40 = vrot.slane %v7111_v35, 4  ;;  %v12186_v46 = vsel %vm7093_vm1, %v7244_v16, %v7243_v49  ;;  %v7145_v53 = vrot.slane %v7111_v35, 5 }
 0x3dc   :  { %v7149_v12 = vrot.slane %v7111_v35, 6  ;;  %v7153_v13 = vrot.slane %v7111_v35, 7  ;;  %v7189_v0 = vadd.f32 %v7111_v35, %v11959_v36  ;;  %v7193_v6 = vadd.f32 %v7129_v54, %v11978_v42 }
 0x3dd   :  { %v7197_v1 = vadd.f32 %v7133_v27, %v12005_v21  ;;  %v7201_v15 = vadd.f32 %v7137_v20, %v12417_v14  ;;  %v7205_v37 = vadd.f32 %v7141_v40, %v12418_v28  ;;  %v7209_v47 = vadd.f32 %v7145_v53, %v12077_v4 }
 0x3de   :  { %v7213_v18 = vadd.f32 %v7149_v12, %v12099_v52  ;;  %v7217_v44 = vadd.f32 %v7153_v13, %v12112_v26  ;;  %v7286_v2 = vrot.slane %v7269_v7, 1  ;;  %v7289_v25 = vrot.slane %v7269_v7, 2 }
 0x3df   :  { %v7272_v9 = vrot.slane %v7197_v1, 6  ;;  %v7274_v45 = vrot.slane %v7201_v15, 5  ;;  %v7276_v48 = vrot.slane %v7205_v37, 4  ;;  %v7278_v36 = vrot.slane %v7209_v47, 3 }
 0x3e0   :  { %v7280_v35 = vrot.slane %v7213_v18, 2  ;;  %v7282_v42 = vrot.slane %v7217_v44, 1  ;;  %v7292_v29 = vrot.slane %v7269_v7, 3  ;;  %v7295_v21 = vrot.slane %v7269_v7, 4 }
 0x3e1   :  { %v7298_v10 = vrot.slane %v7269_v7, 5  ;;  %v7301_v39 = vrot.slane %v7269_v7, 6  ;;  %v7304_v23 = vrot.slane %v7269_v7, 7  ;;  %v12196_v43 = vadd.f32 %v7269_v7, %v7189_v0 }
 0x3e2   :  { %v12198_v4 = vadd.f32 %v7286_v2, %v7193_v6  ;;  %v12200_v52 = vadd.f32 %v7289_v25, %v7197_v1  ;;  %v12202_v26 = vadd.f32 %v7292_v29, %v7201_v15  ;;  %v12204_v57 = vadd.f32 %v7295_v21, %v7205_v37  ;;  %v12419_v29 = vld [vmem:[#allocation2_spill] sm:$0xff] }
 0x3e3   :  { %v12206_v60 = vadd.f32 %v7298_v10, %v7209_v47  ;;  %v12208_v51 = vadd.f32 %v7301_v39, %v7213_v18  ;;  %v12210_v3 = vadd.f32 %v7304_v23, %v7217_v44  ;;  %v7270_v16 = vrot.slane %v7193_v6, 7 }
 0x3e4   :  { %v7405_v31 = vrot.slane %v12198_v4, 7  ;;  %v7407_v59 = vrot.slane %v12200_v52, 6  ;;  %v7409_v7 = vrot.slane %v12202_v26, 5  ;;  %v7411_v54 = vrot.slane %v12204_v57, 4 }
 0x3e5   :  { %v7413_v49 = vrot.slane %v12206_v60, 3  ;;  %v7415_v27 = vrot.slane %v12208_v51, 2  ;;  %v7417_v40 = vrot.slane %v12210_v3, 1  ;;  %v7271_v53 = vsel %vm7091_vm0, %v7270_v16, %v7189_v0 }
 0x3e6   :  { %v7406_v20 = vsel %vm7091_vm0, %v7405_v31, %v12196_v43  ;;  %v7126_v12 = vrot.slane %v12118_v50, 1  ;;  %v7273_v6 = vsel %vm7093_vm1, %v7272_v9, %v7271_v53  ;;  %v7130_v1 = vrot.slane %v12118_v50, 2  ;;  %v12421_v31 = vld [vmem:[#allocation4_spill] sm:$0xff] }
 0x3e7   :  { %v7408_v13 = vsel %vm7093_vm1, %v7407_v59, %v7406_v20  ;;  %v7134_v14 = vrot.slane %v12118_v50, 3  ;;  %v7275_v28 = vsel %vm7095_vm2, %v7274_v45, %v7273_v6  ;;  %v7138_v37 = vrot.slane %v12118_v50, 4  ;;  %v12420_v45 = vld [vmem:[#allocation3_spill] sm:$0xff] }
 0x3e8   :  { %v7410_v15 = vsel %vm7095_vm2, %v7409_v7, %v7408_v13  ;;  %v7142_v47 = vrot.slane %v12118_v50, 5  ;;  %v7277_v18 = vsel %vm7097_vm3, %v7276_v48, %v7275_v28  ;;  %v7146_v44 = vrot.slane %v12118_v50, 6  ;;  %v12422_v48 = vld [vmem:[#allocation5_spill] sm:$0xff] }
 0x3e9   :  { %v7412_v0 = vsel %vm7097_vm3, %v7411_v54, %v7410_v15  ;;  %v7150_v9 = vrot.slane %v12118_v50, 7  ;;  %v7279_v25 = vsel %vm7099_vm4, %v7278_v36, %v7277_v18  ;;  %v7186_v21 = vadd.f32 %v12118_v50, %v12419_v29 }
 0x3ea   :  { %v7414_v2 = vsel %vm7099_vm4, %v7413_v49, %v7412_v0  ;;  %v7190_v10 = vadd.f32 %v7126_v12, %v12420_v45  ;;  %v7281_v23 = vsel %vm7101_vm5, %v7280_v35, %v7279_v25  ;;  %v7194_v59 = vadd.f32 %v7130_v1, %v12421_v31  ;;  %v12423_v49 = vld [vmem:[#allocation7_spill] sm:$0xff] }
 0x3eb   :  { %v7416_v39 = vsel %vm7101_vm5, %v7415_v27, %v7414_v2  ;;  %v7198_v16 = vadd.f32 %v7134_v14, %v12422_v48  ;;  %v7283_v54 = vsel %vm7103_vm6, %v7282_v42, %v7281_v23  ;;  %v7202_v20 = vadd.f32 %v7138_v37, %v12423_v49 }
 0x3ec   :  { %v7418_v7 = vsel %vm7103_vm6, %v7417_v40, %v7416_v39  ;;  %v7206_v36 = vadd.f32 %v7142_v47, %v12069_v19  ;;  %v7210_v50 = vadd.f32 %v7146_v44, %v12093_v24  ;;  %v7214_v27 = vadd.f32 %v7150_v9, %v12106_v30 }
 0x3ed   :  { %7426 = vrot.lane.b32.xlu1 %v7418_v7, %s9276_s4  ;;  %v7284_v35 = vrot.slane %v7283_v54, 1  ;;  %v7287_v53 = vrot.slane %v7283_v54, 2  ;;  %v7290_v12 = vrot.slane %v7283_v54, 3  ;;  %v7293_v13 = vrot.slane %v7283_v54, 4 }
 0x3ee   :  { %v7296_v6 = vrot.slane %v7283_v54, 5  ;;  %v7299_v1 = vrot.slane %v7283_v54, 6  ;;  %v7302_v40 = vrot.slane %v7283_v54, 7  ;;  %v12251_v14 = vadd.f32 %v7283_v54, %v7186_v21 }
 0x3ef   :  { %v12253_v42 = vadd.f32 %v7284_v35, %v7190_v10  ;;  %v12255_v15 = vadd.f32 %v7287_v53, %v7194_v59  ;;  %v12257_v19 = vadd.f32 %v7290_v12, %v7198_v16  ;;  %v12259_v28 = vadd.f32 %v7293_v13, %v7202_v20 }
 0x3f0   :  { %v12261_v24 = vadd.f32 %v7296_v6, %v7206_v36  ;;  %v12263_v30 = vadd.f32 %v7299_v1, %v7210_v50  ;;  %v12265_v37 = vadd.f32 %v7302_v40, %v7214_v27  ;;  %v7215_v18 = vadd.f32 %v7151_v32, %v12110_v8 }
 0x3f1   :  { %v7377_v47 = vrot.slane %v12253_v42, 7  ;;  %v7379_v0 = vrot.slane %v12255_v15, 6  ;;  %v7248_v44 = vrot.slane %v12172_v58, 4  ;;  %v7250_v9 = vrot.slane %v12175_v22, 3 }
 0x3f2   :  { %v7381_v25 = vrot.slane %v12257_v19, 5  ;;  %v7247_v29 = vsel %vm7095_vm2, %v7246_v62, %v12186_v46  ;;  %v7383_v45 = vrot.slane %v12259_v28, 4  ;;  %v7252_v61 = vrot.slane %v12178_v41, 2 }
 0x3f3   :  { %v7378_v2 = vsel %vm7091_vm0, %v7377_v47, %v12251_v14  ;;  %v7249_v8 = vsel %vm7097_vm3, %v7248_v44, %v7247_v29  ;;  %v7385_v22 = vrot.slane %v12261_v24, 3  ;;  %v7254_v10 = vrot.slane %v7215_v18, 1 }
 0x3f4   :  { %v7380_v21 = vsel %vm7093_vm1, %v7379_v0, %v7378_v2  ;;  %v7251_v32 = vsel %vm7099_vm4, %v7250_v9, %v7249_v8  ;;  %v7387_v5 = vrot.slane %v12263_v30, 2  ;;  %v7389_v23 = vrot.slane %v12265_v37, 1 }
 0x3f5   :  { %v7382_v58 = vsel %vm7095_vm2, %v7381_v25, %v7380_v21  ;;  %v7253_v62 = vsel %vm7101_vm5, %v7252_v61, %v7251_v32  ;;  %v7428_v2 = vlaneseq }
 0x3f6   :  { %v7384_v39 = vsel %vm7097_vm3, %v7383_v45, %v7382_v58  ;;  %v7255_v31 = vsel %vm7103_vm6, %v7254_v10, %v7253_v62 }
 0x3f7   :  { %v7386_v46 = vsel %vm7099_vm4, %v7385_v22, %v7384_v39  ;;  %v7285_v59 = vrot.slane %v7255_v31, 1  ;;  %v7288_v48 = vrot.slane %v7255_v31, 2  ;;  %v7291_v16 = vrot.slane %v7255_v31, 3 }
 0x3f8   :  { %v7388_v41 = vsel %vm7101_vm5, %v7387_v5, %v7386_v46  ;;  %v7294_v54 = vrot.slane %v7255_v31, 4  ;;  %v7297_v49 = vrot.slane %v7255_v31, 5  ;;  %v7300_v20 = vrot.slane %v7255_v31, 6 }
 0x3f9   :  { %v7390_v7 = vsel %vm7103_vm6, %v7389_v23, %v7388_v41  ;;  %v7303_v36 = vrot.slane %v7255_v31, 7  ;;  %v7330_v50 = vadd.f32 %v7255_v31, %v12115_v17  ;;  %v7333_v27 = vadd.f32 %v7285_v59, %v12121_v56 }
 0x3fa   :  { %7422 = vrot.lane.b32.xlu0 %v7390_v7, %s9276_s4  ;;  %v7336_v35 = vadd.f32 %v7288_v48, %v12124_v33  ;;  %v7339_v53 = vadd.f32 %v7291_v16, %v12127_v11  ;;  %v7342_v12 = vadd.f32 %v7294_v54, %v12130_v38  ;;  %v7345_v13 = vadd.f32 %v7297_v49, %v12133_v63 }
 0x3fb   :  { %v7348_v6 = vadd.f32 %v7300_v20, %v12135_v55  ;;  %v7351_v1 = vadd.f32 %v7303_v36, %v12140_v34  ;;  %v7391_v40 = vrot.slane %v7333_v27, 7  ;;  %v12313_v25 = vand.u32 127, %v7428_v2 }
 0x3fc   :  { %v7393_v47 = vrot.slane %v7336_v35, 6  ;;  %v7395_v18 = vrot.slane %v7339_v53, 5  ;;  %v7397_v56 = vrot.slane %v7342_v12, 4  ;;  %v7399_v44 = vrot.slane %v7345_v13, 3 }
 0x3fd   :  { %v7392_v0 = vsel %vm7091_vm0, %v7391_v40, %v7330_v50  ;;  %v7401_v38 = vrot.slane %v7348_v6, 2  ;;  %v7403_v9 = vrot.slane %v7351_v1, 1  ;;  %vm7430_vm7 = vcmp.lt.s32.totalorder %v12313_v25, 64 }
 0x3fe   :  { %v7394_v17 = vsel %vm7093_vm1, %v7393_v47, %v7392_v0  ;;  %vm7531_vm8 = vcmp.lt.s32.totalorder %v12313_v25, 32 }
 0x3ff   :  { %v7396_v33 = vsel %vm7095_vm2, %v7395_v18, %v7394_v17 }
 0x400   :  { %v7398_v11 = vsel %vm7097_vm3, %v7397_v56, %v7396_v33 }
 0x401   :  { %v7400_v63 = vsel %vm7099_vm4, %v7399_v44, %v7398_v11 }
 0x402   :  { %v7402_v55 = vsel %vm7101_vm5, %v7401_v38, %v7400_v63 }
 0x403   :  { %v7404_v34 = vsel %vm7103_vm6, %v7403_v9, %v7402_v55 }
 0x404   :  { %7424 = vrot.lane.b32.xlu0 %v7404_v34, %s9276_s4 }
 0x45f   :  { %v7427_v29 = vpop.permute.xlu1 %7426 }
 0x46c   :  { %v7423_v21 = vpop.permute.xlu0 %7422 }
 0x46d   :  { %v7432_v45 = vsel %vm7430_vm7, %v7427_v29, %v7423_v21 }
 0x46e   :  { %v7435_v8 = vrot.slane %v7432_v45, 1  ;;  %v7437_v61 = vrot.slane %v7432_v45, 2  ;;  %v7439_v58 = vrot.slane %v7432_v45, 3  ;;  %v7441_v22 = vrot.slane %v7432_v45, 4 }
 0x46f   :  { %v7443_v32 = vrot.slane %v7432_v45, 5  ;;  %v7445_v10 = vrot.slane %v7432_v45, 6  ;;  %v7447_v5 = vrot.slane %v7432_v45, 7  ;;  %v12331_v31 = vadd.f32 %v7432_v45, %v12251_v14 }
 0x470   :  { %v12319_v39 = vadd.f32 %v7435_v8, %v12253_v42  ;;  %v12322_v62 = vadd.f32 %v7437_v61, %v12255_v15  ;;  %v12325_v46 = vadd.f32 %v7439_v58, %v12257_v19  ;;  %v12328_v23 = vadd.f32 %v7441_v22, %v12259_v28 }
 0x471   :  { %v12334_v41 = vadd.f32 %v7443_v32, %v12261_v24  ;;  %v12339_v48 = vadd.f32 %v7445_v10, %v12263_v30  ;;  %v12342_v15 = vadd.f32 %v7447_v5, %v12265_v37 }
 0x472   :  { %v7497_v59 = vrot.slane %v12319_v39, 7  ;;  %v7499_v42 = vrot.slane %v12322_v62, 6  ;;  %v7501_v28 = vrot.slane %v12325_v46, 5  ;;  %v7503_v24 = vrot.slane %v12328_v23, 4 }
 0x473   :  { %v7505_v7 = vrot.slane %v12334_v41, 3  ;;  %v7507_v49 = vrot.slane %v12339_v48, 2  ;;  %v7509_v36 = vrot.slane %v12342_v15, 1 }
 0x474   :  { %v7498_v19 = vsel %vm7091_vm0, %v7497_v59, %v12331_v31 }
 0x475   :  { %v7500_v14 = vsel %vm7093_vm1, %v7499_v42, %v7498_v19 }
 0x476   :  { %v7502_v16 = vsel %vm7095_vm2, %v7501_v28, %v7500_v14  ;;  %v7425_v54 = vpop.permute.xlu0 %7424  ;;  %v8289_v14 = vld [vmem:[%s12401_s5] ss:$0 sm:$0xff] }
 0x477   :  { %v7504_v30 = vsel %vm7097_vm3, %v7503_v24, %v7502_v16  ;;  %v7431_v37 = vsel %vm7430_vm7, %v7425_v54, %v7427_v29 }
 0x478   :  { %v7506_v20 = vsel %vm7099_vm4, %v7505_v7, %v7504_v30  ;;  %v7436_v50 = vrot.slane %v7431_v37, 1  ;;  %v7438_v27 = vrot.slane %v7431_v37, 2  ;;  %v7440_v12 = vrot.slane %v7431_v37, 3 }
 0x479   :  { %v7508_v35 = vsel %vm7101_vm5, %v7507_v49, %v7506_v20  ;;  %v7442_v13 = vrot.slane %v7431_v37, 4  ;;  %v7444_v6 = vrot.slane %v7431_v37, 5  ;;  %v7446_v40 = vrot.slane %v7431_v37, 6 }
 0x47a   :  { %v7510_v53 = vsel %vm7103_vm6, %v7509_v36, %v7508_v35  ;;  %v7468_v1 = vadd.f32 %v7436_v50, %v12198_v4  ;;  %v7448_v47 = vrot.slane %v7431_v37, 7  ;;  %v7470_v0 = vadd.f32 %v7438_v27, %v12200_v52 }
 0x47b   :  { %7527 = vrot.lane.b32.xlu1 %v7510_v53, %s9277_s28  ;;  %v7472_v18 = vadd.f32 %v7440_v12, %v12202_v26  ;;  %v7474_v17 = vadd.f32 %v7442_v13, %v12204_v57  ;;  %v7466_v56 = vadd.f32 %v7431_v37, %v12196_v43  ;;  %v7476_v33 = vadd.f32 %v7444_v6, %v12206_v60 }
 0x47c   :  { %v7511_v44 = vrot.slane %v7468_v1, 7  ;;  %v7513_v11 = vrot.slane %v7470_v0, 6  ;;  %v7478_v38 = vadd.f32 %v7446_v40, %v12208_v51  ;;  %v7480_v4 = vadd.f32 %v7448_v47, %v12210_v3 }
 0x47d   :  { %v7515_v9 = vrot.slane %v7472_v18, 5  ;;  %v7517_v52 = vrot.slane %v7474_v17, 4  ;;  %v7519_v34 = vrot.slane %v7476_v33, 3 }
 0x47e   :  { %v7512_v63 = vsel %vm7091_vm0, %v7511_v44, %v7466_v56  ;;  %v7521_v43 = vrot.slane %v7478_v38, 2  ;;  %v7523_v2 = vrot.slane %v7480_v4, 1 }
 0x47f   :  { %v7514_v55 = vsel %vm7093_vm1, %v7513_v11, %v7512_v63 }
 0x480   :  { %v7516_v26 = vsel %vm7095_vm2, %v7515_v9, %v7514_v55 }
 0x481   :  { %v7518_v57 = vsel %vm7097_vm3, %v7517_v52, %v7516_v26 }
 0x482   :  { %v7520_v60 = vsel %vm7099_vm4, %v7519_v34, %v7518_v57 }
 0x483   :  { %v7522_v29 = vsel %vm7101_vm5, %v7521_v43, %v7520_v60 }
 0x484   :  { %v7524_v51 = vsel %vm7103_vm6, %v7523_v2, %v7522_v29 }
 0x485   :  { %7529 = vrot.lane.b32.xlu0 %v7524_v51, %s9277_s28 }
 0x4ed   :  { %v7528_v3 = vpop.permute.xlu1 %7527 }
 0x4f7   :  { %v7530_v21 = vpop.permute.xlu0 %7529 }
 0x4f8   :  { %v7532_v45 = vsel %vm7531_vm8, %v7530_v21, %v7528_v3 }
 0x4f9   :  { %v7534_v8 = vrot.slane %v7532_v45, 1  ;;  %v7535_v61 = vrot.slane %v7532_v45, 2  ;;  %v7536_v58 = vrot.slane %v7532_v45, 3  ;;  %v7537_v22 = vrot.slane %v7532_v45, 4 }
 0x4fa   :  { %v7538_v32 = vrot.slane %v7532_v45, 5  ;;  %v7539_v10 = vrot.slane %v7532_v45, 6  ;;  %v7540_v5 = vrot.slane %v7532_v45, 7  ;;  %v7549_v59 = vadd.f32 %v7532_v45, %v12331_v31 }
 0x4fb   :  { %v7550_v42 = vadd.f32 %v7534_v8, %v12319_v39  ;;  %v7551_v19 = vadd.f32 %v7535_v61, %v12322_v62  ;;  %v7552_v28 = vadd.f32 %v7536_v58, %v12325_v46  ;;  %v7553_v25 = vadd.f32 %v7537_v22, %v12328_v23 }
 0x4fc   :  { %v7554_v24 = vadd.f32 %v7538_v32, %v12334_v41  ;;  %v7555_v16 = vadd.f32 %v7539_v10, %v12339_v48  ;;  %v7556_v7 = vadd.f32 %v7540_v5, %v12342_v15  ;;  %v7564_v49 = vadd.f32 %v8289_v14, %v7549_v59 }
 0x4fd   :  { %v7565_v54 = vadd.f32 %v8289_v14, %v7550_v42  ;;  %v7566_v31 = vadd.f32 %v8289_v14, %v7551_v19  ;;  %v7567_v30 = vadd.f32 %v8289_v14, %v7552_v28  ;;  %v7568_v39 = vadd.f32 %v8289_v14, %v7553_v25 }
 0x4fe   :  { %v7569_v62 = vadd.f32 %v8289_v14, %v7554_v24  ;;  %v7570_v20 = vadd.f32 %v8289_v14, %v7555_v16  ;;  %v7571_v23 = vadd.f32 %v8289_v14, %v7556_v7 }
 0x4ff   :  { %v7580_v37 = vrot.slane %v7565_v54, 7  ;;  %v7582_v46 = vrot.slane %v7566_v31, 6  ;;  %v7584_v50 = vrot.slane %v7567_v30, 5  ;;  %v7586_v41 = vrot.slane %v7568_v39, 4 }
 0x500   :  { %v7588_v35 = vrot.slane %v7569_v62, 3  ;;  %v7590_v53 = vrot.slane %v7570_v20, 2  ;;  %v7592_v13 = vrot.slane %v7571_v23, 1 }
 0x501   :  { %v7581_v36 = vsel %vm7091_vm0, %v7580_v37, %v7564_v49 }
 0x502   :  { %v7583_v27 = vsel %vm7093_vm1, %v7582_v46, %v7581_v36 }
 0x503   :  { %v7585_v48 = vsel %vm7095_vm2, %v7584_v50, %v7583_v27 }
 0x504   :  { %v7587_v15 = vsel %vm7097_vm3, %v7586_v41, %v7585_v48 }
 0x505   :  { %v7589_v12 = vsel %vm7099_vm4, %v7588_v35, %v7587_v15 }
 0x506   :  { %v7591_v6 = vsel %vm7101_vm5, %v7590_v53, %v7589_v12 }
 0x507   :  { %v7593_v1 = vsel %vm7103_vm6, %v7592_v13, %v7591_v6 }
 0x508   :  { %7596 = vst.msk [vmem:[%s12402_s6] sm:$0xff] %vm7595_vm9, %v7593_v1 }

</bundles_post_ra>
